<compile_context>
chip_gen: v6e
topology: v6e:2x2x1
jax: 0.10.0
libtpu: 0.0.40
codegen_flags: <defaults>
</compile_context>

<pallas_src>
import functools

import jax
import jax.numpy as jnp
from jax import lax
from jax.experimental import pallas as pl
from jax.experimental.pallas import tpu as pltpu


# ------------------------------ fused kernel --------------------------------


def _fused_forward_kernel(
    x_ref,                       # (B, input_dim)
    emb_w_ref, emb_b_ref,        # (input_dim, H), (1, H)  -- bias includes pos
    wv_ref, bv_ref,              # (L, H, H), (L, 1, H)
    wo_ref, bo_ref,              # (L, H, H), (L, 1, H)
    ln1_g_ref, ln1_b_ref,        # (L, 1, H)
    w1_ref, b1_ref,              # (L, H, F), (L, 1, F)
    w2t_ref, b2_ref,             # (L, H, F) lane-dense transposed, (L, 1, H)
    ln2_g_ref, ln2_b_ref,        # (L, 1, H)
    fc1_w_ref, fc1_b_ref,        # (H, H), (1, H)
    fc2_w_ref, fc2_b_ref,        # (H, H), (1, H)
    out_w_ref, out_b_ref,        # (H, O), (1, O)
    rng_ref,                     # (3, O): rows = mins, maxs, column mask
    o_ref,                       # (B, O)
    *,
    num_layers,
):
    def matmul(a, w):
        return jnp.dot(a, w, preferred_element_type=jnp.float32)

    def layernorm(z, g, b):
        m = jnp.mean(z, axis=-1, keepdims=True)
        v = jnp.mean((z - m) ** 2, axis=-1, keepdims=True)
        return (z - m) * lax.rsqrt(v + 1e-5) * g + b

    # embedding + positional encoding (folded into bias) + relu
    h = jnp.maximum(matmul(x_ref[...], emb_w_ref[...]) + emb_b_ref[...], 0.0)

    # encoder stack (static unroll; seq_len == 1 => attn == out_proj(v_proj(x)))
    for l in range(num_layers):
        v = matmul(h, wv_ref[l]) + bv_ref[l]
        attn = matmul(v, wo_ref[l]) + bo_ref[l]
        h = layernorm(h + attn, ln1_g_ref[l], ln1_b_ref[l])

        ff = jnp.maximum(matmul(h, w1_ref[l]) + b1_ref[l], 0.0)        # (B, F)
        ff2 = lax.dot_general(                                         # (B, H)
            ff, w2t_ref[l],
            dimension_numbers=(((1,), (1,)), ((), ())),
            preferred_element_type=jnp.float32,
        ) + b2_ref[l]
        h = layernorm(h + ff2, ln2_g_ref[l], ln2_b_ref[l])

    # head
    h = jnp.maximum(matmul(h, fc1_w_ref[...]) + fc1_b_ref[...], 0.0)
    h = jnp.maximum(matmul(h, fc2_w_ref[...]) + fc2_b_ref[...], 0.0)
    t = jnp.tanh(matmul(h, out_w_ref[...]) + out_b_ref[...])

    # row-0 / first-len(output_range)-columns rescale on post-tanh values
    mins = rng_ref[0:1, :]
    maxs = rng_ref[1:2, :]
    mask = rng_ref[2:3, :]
    scaled = jax.nn.sigmoid(t) * (maxs - mins) + mins
    rows = lax.broadcasted_iota(jnp.int32, t.shape, 0)
    sel = jnp.logical_and(rows == 0, mask > 0.5)
    o_ref[...] = jnp.where(sel, scaled, t)


# ------------------------------ pallas_call glue -----------------------------


def transformer_generator_forward(params, x, rng_packed):
    num_layers = params["wv"].shape[0]
    batch = x.shape[0]
    input_dim = params["emb_w"].shape[0]
    hidden_dim = params["emb_w"].shape[1]
    dim_ff = params["w1"].shape[2]
    output_dim = params["out_w"].shape[1]

    emb_bias = params["emb_b"] + params["pos"]  # fold positional encoding

    inputs = (
        x,
        params["emb_w"], emb_bias,
        params["wv"], params["bv"], params["wo"], params["bo"],
        params["ln1_g"], params["ln1_b"],
        params["w1"], params["b1"], params["w2t"], params["b2"],
        params["ln2_g"], params["ln2_b"],
        params["fc1_w"], params["fc1_b"],
        params["fc2_w"], params["fc2_b"],
        params["out_w"], params["out_b"],
        rng_packed,
    )

    flops = 2 * batch * (
        input_dim * hidden_dim
        + num_layers * (2 * hidden_dim * hidden_dim + 2 * hidden_dim * dim_ff)
        + 2 * hidden_dim * hidden_dim
        + hidden_dim * output_dim
    )
    bytes_accessed = sum(int(a.size) * 4 for a in inputs) + batch * output_dim * 4

    vmem = pl.BlockSpec(memory_space=pltpu.MemorySpace.VMEM)
    return pl.pallas_call(
        functools.partial(_fused_forward_kernel, num_layers=num_layers),
        out_shape=jax.ShapeDtypeStruct((batch, output_dim), jnp.float32),
        in_specs=[vmem] * len(inputs),
        out_specs=vmem,
        cost_estimate=pl.CostEstimate(
            flops=int(flops),
            transcendentals=int(4 * batch * output_dim + 2 * num_layers * batch),
            bytes_accessed=int(bytes_accessed),
        ),
    )(*inputs)


# ------------------------------ model definition ----------------------------


def init_params(key, input_dim, hidden_dim, output_dim, num_layers, dim_ff):
    keys = iter(jax.random.split(key, 32))

    def w(shape, scale=0.05):
        return (scale * jax.random.normal(next(keys), shape)).astype(jnp.float32)

    return {
        "emb_w": w((input_dim, hidden_dim)),
        "emb_b": w((1, hidden_dim)),
        "pos": w((1, hidden_dim)),
        # Q/K projections omitted: with seq_len == 1 they cannot influence the
        # output (softmax over one key == 1).
        "wv": w((num_layers, hidden_dim, hidden_dim)),
        "bv": w((num_layers, 1, hidden_dim)),
        "wo": w((num_layers, hidden_dim, hidden_dim)),
        "bo": w((num_layers, 1, hidden_dim)),
        "ln1_g": jnp.ones((num_layers, 1, hidden_dim), jnp.float32),
        "ln1_b": jnp.zeros((num_layers, 1, hidden_dim), jnp.float32),
        "w1": w((num_layers, hidden_dim, dim_ff)),
        "b1": w((num_layers, 1, dim_ff)),
        # FFN down-projection stored transposed (lane-dense: wide dim last).
        "w2t": w((num_layers, hidden_dim, dim_ff)),
        "b2": w((num_layers, 1, hidden_dim)),
        "ln2_g": jnp.ones((num_layers, 1, hidden_dim), jnp.float32),
        "ln2_b": jnp.zeros((num_layers, 1, hidden_dim), jnp.float32),
        "fc1_w": w((hidden_dim, hidden_dim)),
        "fc1_b": w((1, hidden_dim)),
        "fc2_w": w((hidden_dim, hidden_dim)),
        "fc2_b": w((1, hidden_dim)),
        "out_w": w((hidden_dim, output_dim)),
        "out_b": w((1, output_dim)),
    }


# ------------------------------ pure-JAX reference ---------------------------


def reference_forward(params, x, output_range):
    def lin(a, w, b):
        return a @ w + b

    def ln(z, g, b):
        m = jnp.mean(z, -1, keepdims=True)
        v = jnp.mean((z - m) ** 2, -1, keepdims=True)
        return (z - m) / jnp.sqrt(v + 1e-5) * g + b

    h = jax.nn.relu(lin(x, params["emb_w"], params["emb_b"] + params["pos"]))
    num_layers = params["wv"].shape[0]
    for l in range(num_layers):
        attn = lin(lin(h, params["wv"][l], params["bv"][l]),
                   params["wo"][l], params["bo"][l])
        h = ln(h + attn, params["ln1_g"][l], params["ln1_b"][l])
        ff = lin(jax.nn.relu(lin(h, params["w1"][l], params["b1"][l])),
                 params["w2t"][l].T, params["b2"][l])
        h = ln(h + ff, params["ln2_g"][l], params["ln2_b"][l])
    h = jax.nn.relu(lin(h, params["fc1_w"], params["fc1_b"]))
    h = jax.nn.relu(lin(h, params["fc2_w"], params["fc2_b"]))
    t = jnp.tanh(lin(h, params["out_w"], params["out_b"]))
    row0 = t[0]
    for i, (lo, hi) in enumerate(output_range):
        row0 = row0.at[i].set(jax.nn.sigmoid(row0[i]) * (hi - lo) + lo)
    return t.at[0].set(row0)


# ----------------------------------- main ------------------------------------

if __name__ == "__main__":
    batch = 8
    input_dim = 16
    hidden_dim = 32
    output_dim = 8
    num_layers = 6
    dim_ff = 2048  # nn.TransformerEncoderLayer default dim_feedforward
    output_range = [(-1.0, 1.0), (0.0, 2.0), (-0.5, 0.5), (0.0, 1.0)]

    key = jax.random.PRNGKey(0)
    pkey, xkey = jax.random.split(key)
    params = init_params(pkey, input_dim, hidden_dim, output_dim, num_layers, dim_ff)
    x = jax.random.normal(xkey, (batch, input_dim), dtype=jnp.float32)

    nr = len(output_range)
    mins = jnp.zeros((output_dim,), jnp.float32).at[:nr].set(
        jnp.array([r[0] for r in output_range], jnp.float32))
    maxs = jnp.zeros((output_dim,), jnp.float32).at[:nr].set(
        jnp.array([r[1] for r in output_range], jnp.float32))
    col_mask = jnp.zeros((output_dim,), jnp.float32).at[:nr].set(1.0)
    rng_packed = jnp.stack([mins, maxs, col_mask], axis=0)  # (3, output_dim)

    fwd = jax.jit(transformer_generator_forward)
    out = jax.block_until_ready(fwd(params, x, rng_packed))

    ref = reference_forward(params, x, output_range)
    assert out.shape == (batch, output_dim)
    assert jnp.allclose(out, ref, atol=1e-4, rtol=1e-4), "mismatch vs reference"

    print("KERNEL_OK")
</pallas_src>

<mosaic_0001>
module attributes {stable_mosaic.version = 11 : i64} {
  func.func @_fused_forward_kernel(%arg0: memref<8x16xf32, #tpu.memory_space<vmem>>, %arg1: memref<16x32xf32, #tpu.memory_space<vmem>>, %arg2: memref<1x32xf32, #tpu.memory_space<vmem>>, %arg3: memref<6x32x32xf32, #tpu.memory_space<vmem>>, %arg4: memref<6x1x32xf32, #tpu.memory_space<vmem>>, %arg5: memref<6x32x32xf32, #tpu.memory_space<vmem>>, %arg6: memref<6x1x32xf32, #tpu.memory_space<vmem>>, %arg7: memref<6x1x32xf32, #tpu.memory_space<vmem>>, %arg8: memref<6x1x32xf32, #tpu.memory_space<vmem>>, %arg9: memref<6x32x2048xf32, #tpu.memory_space<vmem>>, %arg10: memref<6x1x2048xf32, #tpu.memory_space<vmem>>, %arg11: memref<6x32x2048xf32, #tpu.memory_space<vmem>>, %arg12: memref<6x1x32xf32, #tpu.memory_space<vmem>>, %arg13: memref<6x1x32xf32, #tpu.memory_space<vmem>>, %arg14: memref<6x1x32xf32, #tpu.memory_space<vmem>>, %arg15: memref<32x32xf32, #tpu.memory_space<vmem>>, %arg16: memref<1x32xf32, #tpu.memory_space<vmem>>, %arg17: memref<32x32xf32, #tpu.memory_space<vmem>>, %arg18: memref<1x32xf32, #tpu.memory_space<vmem>>, %arg19: memref<32x8xf32, #tpu.memory_space<vmem>>, %arg20: memref<1x8xf32, #tpu.memory_space<vmem>>, %arg21: memref<3x8xf32, #tpu.memory_space<vmem>>, %arg22: memref<8x8xf32, #tpu.memory_space<vmem>>) attributes {dimension_semantics = [], scalar_prefetch = 0 : i64, scratch_operands = 0 : i64, tpu.core_type = #tpu.core_type<tc>} {
    %c0 = arith.constant 0 : index
    %c0_0 = arith.constant 0 : index
    %0 = vector.load %arg0[%c0, %c0_0] : memref<8x16xf32, #tpu.memory_space<vmem>>, vector<8x16xf32>
    %c0_1 = arith.constant 0 : index
    %c0_2 = arith.constant 0 : index
    %1 = vector.load %arg1[%c0_1, %c0_2] : memref<16x32xf32, #tpu.memory_space<vmem>>, vector<16x32xf32>
    %cst = arith.constant dense<0.000000e+00> : vector<8x32xf32>
    %2 = tpu.matmul %0, %1, %cst {dimension_numbers = #tpu.dot_dimension_numbers<[1], [0], [0], [1], [0, 0, 1, 1], [], []>} : vector<8x16xf32>, vector<16x32xf32>, vector<8x32xf32> -> vector<8x32xf32>
    %c0_3 = arith.constant 0 : index
    %c0_4 = arith.constant 0 : index
    %3 = vector.load %arg2[%c0_3, %c0_4] : memref<1x32xf32, #tpu.memory_space<vmem>>, vector<1x32xf32>
    %4 = vector.broadcast %3 : vector<1x32xf32> to vector<8x32xf32>
    %5 = arith.addf %2, %4 : vector<8x32xf32>
    %cst_5 = arith.constant 0.000000e+00 : f32
    %6 = vector.broadcast %cst_5 : f32 to vector<8x32xf32>
    %7 = arith.maximumf %5, %6 : vector<8x32xf32>
    %c0_6 = arith.constant 0 : index
    %c0_7 = arith.constant 0 : index
    %c0_8 = arith.constant 0 : index
    %8 = vector.load %arg3[%c0_6, %c0_7, %c0_8] : memref<6x32x32xf32, #tpu.memory_space<vmem>>, vector<1x32x32xf32>
    %9 = vector.shape_cast %8 : vector<1x32x32xf32> to vector<32x32xf32>
    %cst_9 = arith.constant dense<0.000000e+00> : vector<8x32xf32>
    %10 = tpu.matmul %7, %9, %cst_9 {dimension_numbers = #tpu.dot_dimension_numbers<[1], [0], [0], [1], [0, 0, 1, 1], [], []>} : vector<8x32xf32>, vector<32x32xf32>, vector<8x32xf32> -> vector<8x32xf32>
    %c0_10 = arith.constant 0 : index
    %c0_11 = arith.constant 0 : index
    %c0_12 = arith.constant 0 : index
    %11 = vector.load %arg4[%c0_10, %c0_11, %c0_12] : memref<6x1x32xf32, #tpu.memory_space<vmem>>, vector<1x1x32xf32>
    %12 = vector.shape_cast %11 : vector<1x1x32xf32> to vector<1x32xf32>
    %13 = vector.broadcast %12 : vector<1x32xf32> to vector<8x32xf32>
    %14 = arith.addf %10, %13 : vector<8x32xf32>
    %c0_13 = arith.constant 0 : index
    %c0_14 = arith.constant 0 : index
    %c0_15 = arith.constant 0 : index
    %15 = vector.load %arg5[%c0_13, %c0_14, %c0_15] : memref<6x32x32xf32, #tpu.memory_space<vmem>>, vector<1x32x32xf32>
    %16 = vector.shape_cast %15 : vector<1x32x32xf32> to vector<32x32xf32>
    %cst_16 = arith.constant dense<0.000000e+00> : vector<8x32xf32>
    %17 = tpu.matmul %14, %16, %cst_16 {dimension_numbers = #tpu.dot_dimension_numbers<[1], [0], [0], [1], [0, 0, 1, 1], [], []>} : vector<8x32xf32>, vector<32x32xf32>, vector<8x32xf32> -> vector<8x32xf32>
    %c0_17 = arith.constant 0 : index
    %c0_18 = arith.constant 0 : index
    %c0_19 = arith.constant 0 : index
    %18 = vector.load %arg6[%c0_17, %c0_18, %c0_19] : memref<6x1x32xf32, #tpu.memory_space<vmem>>, vector<1x1x32xf32>
    %19 = vector.shape_cast %18 : vector<1x1x32xf32> to vector<1x32xf32>
    %20 = vector.broadcast %19 : vector<1x32xf32> to vector<8x32xf32>
    %21 = arith.addf %17, %20 : vector<8x32xf32>
    %22 = arith.addf %7, %21 : vector<8x32xf32>
    %c0_20 = arith.constant 0 : index
    %c0_21 = arith.constant 0 : index
    %c0_22 = arith.constant 0 : index
    %23 = vector.load %arg7[%c0_20, %c0_21, %c0_22] : memref<6x1x32xf32, #tpu.memory_space<vmem>>, vector<1x1x32xf32>
    %24 = vector.shape_cast %23 : vector<1x1x32xf32> to vector<1x32xf32>
    %c0_23 = arith.constant 0 : index
    %c0_24 = arith.constant 0 : index
    %c0_25 = arith.constant 0 : index
    %25 = vector.load %arg8[%c0_23, %c0_24, %c0_25] : memref<6x1x32xf32, #tpu.memory_space<vmem>>, vector<1x1x32xf32>
    %26 = vector.shape_cast %25 : vector<1x1x32xf32> to vector<1x32xf32>
    %cst_26 = arith.constant dense<0.000000e+00> : vector<8xf32>
    %27 = vector.multi_reduction <add>, %22, %cst_26 [1] : vector<8x32xf32> to vector<8xf32>
    %28 = vector.shape_cast %27 : vector<8xf32> to vector<8x1xf32>
    %cst_27 = arith.constant 3.200000e+01 : f32
    %29 = vector.broadcast %cst_27 : f32 to vector<8x1xf32>
    %30 = arith.divf %28, %29 : vector<8x1xf32>
    %31 = vector.broadcast %30 : vector<8x1xf32> to vector<8x32xf32>
    %32 = arith.subf %22, %31 : vector<8x32xf32>
    %33 = arith.mulf %32, %32 : vector<8x32xf32>
    %cst_28 = arith.constant dense<0.000000e+00> : vector<8xf32>
    %34 = vector.multi_reduction <add>, %33, %cst_28 [1] : vector<8x32xf32> to vector<8xf32>
    %35 = vector.shape_cast %34 : vector<8xf32> to vector<8x1xf32>
    %cst_29 = arith.constant 3.200000e+01 : f32
    %36 = vector.broadcast %cst_29 : f32 to vector<8x1xf32>
    %37 = arith.divf %35, %36 : vector<8x1xf32>
    %38 = vector.broadcast %30 : vector<8x1xf32> to vector<8x32xf32>
    %39 = arith.subf %22, %38 : vector<8x32xf32>
    %cst_30 = arith.constant 9.99999974E-6 : f32
    %40 = vector.broadcast %cst_30 : f32 to vector<8x1xf32>
    %41 = arith.addf %37, %40 : vector<8x1xf32>
    %42 = math.rsqrt %41 : vector<8x1xf32>
    %43 = vector.broadcast %42 : vector<8x1xf32> to vector<8x32xf32>
    %44 = arith.mulf %39, %43 : vector<8x32xf32>
    %45 = vector.broadcast %24 : vector<1x32xf32> to vector<8x32xf32>
    %46 = arith.mulf %44, %45 : vector<8x32xf32>
    %47 = vector.broadcast %26 : vector<1x32xf32> to vector<8x32xf32>
    %48 = arith.addf %46, %47 : vector<8x32xf32>
    %c0_31 = arith.constant 0 : index
    %c0_32 = arith.constant 0 : index
    %c0_33 = arith.constant 0 : index
    %49 = vector.load %arg9[%c0_31, %c0_32, %c0_33] : memref<6x32x2048xf32, #tpu.memory_space<vmem>>, vector<1x32x2048xf32>
    %50 = vector.shape_cast %49 : vector<1x32x2048xf32> to vector<32x2048xf32>
    %cst_34 = arith.constant dense<0.000000e+00> : vector<8x2048xf32>
    %51 = tpu.matmul %48, %50, %cst_34 {dimension_numbers = #tpu.dot_dimension_numbers<[1], [0], [0], [1], [0, 0, 1, 1], [], []>} : vector<8x32xf32>, vector<32x2048xf32>, vector<8x2048xf32> -> vector<8x2048xf32>
    %c0_35 = arith.constant 0 : index
    %c0_36 = arith.constant 0 : index
    %c0_37 = arith.constant 0 : index
    %52 = vector.load %arg10[%c0_35, %c0_36, %c0_37] : memref<6x1x2048xf32, #tpu.memory_space<vmem>>, vector<1x1x2048xf32>
    %53 = vector.shape_cast %52 : vector<1x1x2048xf32> to vector<1x2048xf32>
    %54 = vector.broadcast %53 : vector<1x2048xf32> to vector<8x2048xf32>
    %55 = arith.addf %51, %54 : vector<8x2048xf32>
    %cst_38 = arith.constant 0.000000e+00 : f32
    %56 = vector.broadcast %cst_38 : f32 to vector<8x2048xf32>
    %57 = arith.maximumf %55, %56 : vector<8x2048xf32>
    %c0_39 = arith.constant 0 : index
    %c0_40 = arith.constant 0 : index
    %c0_41 = arith.constant 0 : index
    %58 = vector.load %arg11[%c0_39, %c0_40, %c0_41] : memref<6x32x2048xf32, #tpu.memory_space<vmem>>, vector<1x32x2048xf32>
    %59 = vector.shape_cast %58 : vector<1x32x2048xf32> to vector<32x2048xf32>
    %cst_42 = arith.constant dense<0.000000e+00> : vector<8x32xf32>
    %60 = tpu.matmul %57, %59, %cst_42 {dimension_numbers = #tpu.dot_dimension_numbers<[1], [1], [0], [0], [0, 0, 1, 0], [], []>} : vector<8x2048xf32>, vector<32x2048xf32>, vector<8x32xf32> -> vector<8x32xf32>
    %c0_43 = arith.constant 0 : index
    %c0_44 = arith.constant 0 : index
    %c0_45 = arith.constant 0 : index
    %61 = vector.load %arg12[%c0_43, %c0_44, %c0_45] : memref<6x1x32xf32, #tpu.memory_space<vmem>>, vector<1x1x32xf32>
    %62 = vector.shape_cast %61 : vector<1x1x32xf32> to vector<1x32xf32>
    %63 = vector.broadcast %62 : vector<1x32xf32> to vector<8x32xf32>
    %64 = arith.addf %60, %63 : vector<8x32xf32>
    %65 = arith.addf %48, %64 : vector<8x32xf32>
    %c0_46 = arith.constant 0 : index
    %c0_47 = arith.constant 0 : index
    %c0_48 = arith.constant 0 : index
    %66 = vector.load %arg13[%c0_46, %c0_47, %c0_48] : memref<6x1x32xf32, #tpu.memory_space<vmem>>, vector<1x1x32xf32>
    %67 = vector.shape_cast %66 : vector<1x1x32xf32> to vector<1x32xf32>
    %c0_49 = arith.constant 0 : index
    %c0_50 = arith.constant 0 : index
    %c0_51 = arith.constant 0 : index
    %68 = vector.load %arg14[%c0_49, %c0_50, %c0_51] : memref<6x1x32xf32, #tpu.memory_space<vmem>>, vector<1x1x32xf32>
    %69 = vector.shape_cast %68 : vector<1x1x32xf32> to vector<1x32xf32>
    %cst_52 = arith.constant dense<0.000000e+00> : vector<8xf32>
    %70 = vector.multi_reduction <add>, %65, %cst_52 [1] : vector<8x32xf32> to vector<8xf32>
    %71 = vector.shape_cast %70 : vector<8xf32> to vector<8x1xf32>
    %cst_53 = arith.constant 3.200000e+01 : f32
    %72 = vector.broadcast %cst_53 : f32 to vector<8x1xf32>
    %73 = arith.divf %71, %72 : vector<8x1xf32>
    %74 = vector.broadcast %73 : vector<8x1xf32> to vector<8x32xf32>
    %75 = arith.subf %65, %74 : vector<8x32xf32>
    %76 = arith.mulf %75, %75 : vector<8x32xf32>
    %cst_54 = arith.constant dense<0.000000e+00> : vector<8xf32>
    %77 = vector.multi_reduction <add>, %76, %cst_54 [1] : vector<8x32xf32> to vector<8xf32>
    %78 = vector.shape_cast %77 : vector<8xf32> to vector<8x1xf32>
    %cst_55 = arith.constant 3.200000e+01 : f32
    %79 = vector.broadcast %cst_55 : f32 to vector<8x1xf32>
    %80 = arith.divf %78, %79 : vector<8x1xf32>
    %81 = vector.broadcast %73 : vector<8x1xf32> to vector<8x32xf32>
    %82 = arith.subf %65, %81 : vector<8x32xf32>
    %cst_56 = arith.constant 9.99999974E-6 : f32
    %83 = vector.broadcast %cst_56 : f32 to vector<8x1xf32>
    %84 = arith.addf %80, %83 : vector<8x1xf32>
    %85 = math.rsqrt %84 : vector<8x1xf32>
    %86 = vector.broadcast %85 : vector<8x1xf32> to vector<8x32xf32>
    %87 = arith.mulf %82, %86 : vector<8x32xf32>
    %88 = vector.broadcast %67 : vector<1x32xf32> to vector<8x32xf32>
    %89 = arith.mulf %87, %88 : vector<8x32xf32>
    %90 = vector.broadcast %69 : vector<1x32xf32> to vector<8x32xf32>
    %91 = arith.addf %89, %90 : vector<8x32xf32>
    %c1 = arith.constant 1 : index
    %c0_57 = arith.constant 0 : index
    %c0_58 = arith.constant 0 : index
    %92 = vector.load %arg3[%c1, %c0_57, %c0_58] : memref<6x32x32xf32, #tpu.memory_space<vmem>>, vector<1x32x32xf32>
    %93 = vector.shape_cast %92 : vector<1x32x32xf32> to vector<32x32xf32>
    %cst_59 = arith.constant dense<0.000000e+00> : vector<8x32xf32>
    %94 = tpu.matmul %91, %93, %cst_59 {dimension_numbers = #tpu.dot_dimension_numbers<[1], [0], [0], [1], [0, 0, 1, 1], [], []>} : vector<8x32xf32>, vector<32x32xf32>, vector<8x32xf32> -> vector<8x32xf32>
    %c1_60 = arith.constant 1 : index
    %c0_61 = arith.constant 0 : index
    %c0_62 = arith.constant 0 : index
    %95 = vector.load %arg4[%c1_60, %c0_61, %c0_62] : memref<6x1x32xf32, #tpu.memory_space<vmem>>, vector<1x1x32xf32>
    %96 = vector.shape_cast %95 : vector<1x1x32xf32> to vector<1x32xf32>
    %97 = vector.broadcast %96 : vector<1x32xf32> to vector<8x32xf32>
    %98 = arith.addf %94, %97 : vector<8x32xf32>
    %c1_63 = arith.constant 1 : index
    %c0_64 = arith.constant 0 : index
    %c0_65 = arith.constant 0 : index
    %99 = vector.load %arg5[%c1_63, %c0_64, %c0_65] : memref<6x32x32xf32, #tpu.memory_space<vmem>>, vector<1x32x32xf32>
    %100 = vector.shape_cast %99 : vector<1x32x32xf32> to vector<32x32xf32>
    %cst_66 = arith.constant dense<0.000000e+00> : vector<8x32xf32>
    %101 = tpu.matmul %98, %100, %cst_66 {dimension_numbers = #tpu.dot_dimension_numbers<[1], [0], [0], [1], [0, 0, 1, 1], [], []>} : vector<8x32xf32>, vector<32x32xf32>, vector<8x32xf32> -> vector<8x32xf32>
    %c1_67 = arith.constant 1 : index
    %c0_68 = arith.constant 0 : index
    %c0_69 = arith.constant 0 : index
    %102 = vector.load %arg6[%c1_67, %c0_68, %c0_69] : memref<6x1x32xf32, #tpu.memory_space<vmem>>, vector<1x1x32xf32>
    %103 = vector.shape_cast %102 : vector<1x1x32xf32> to vector<1x32xf32>
    %104 = vector.broadcast %103 : vector<1x32xf32> to vector<8x32xf32>
    %105 = arith.addf %101, %104 : vector<8x32xf32>
    %106 = arith.addf %91, %105 : vector<8x32xf32>
    %c1_70 = arith.constant 1 : index
    %c0_71 = arith.constant 0 : index
    %c0_72 = arith.constant 0 : index
    %107 = vector.load %arg7[%c1_70, %c0_71, %c0_72] : memref<6x1x32xf32, #tpu.memory_space<vmem>>, vector<1x1x32xf32>
    %108 = vector.shape_cast %107 : vector<1x1x32xf32> to vector<1x32xf32>
    %c1_73 = arith.constant 1 : index
    %c0_74 = arith.constant 0 : index
    %c0_75 = arith.constant 0 : index
    %109 = vector.load %arg8[%c1_73, %c0_74, %c0_75] : memref<6x1x32xf32, #tpu.memory_space<vmem>>, vector<1x1x32xf32>
    %110 = vector.shape_cast %109 : vector<1x1x32xf32> to vector<1x32xf32>
    %cst_76 = arith.constant dense<0.000000e+00> : vector<8xf32>
    %111 = vector.multi_reduction <add>, %106, %cst_76 [1] : vector<8x32xf32> to vector<8xf32>
    %112 = vector.shape_cast %111 : vector<8xf32> to vector<8x1xf32>
    %cst_77 = arith.constant 3.200000e+01 : f32
    %113 = vector.broadcast %cst_77 : f32 to vector<8x1xf32>
    %114 = arith.divf %112, %113 : vector<8x1xf32>
    %115 = vector.broadcast %114 : vector<8x1xf32> to vector<8x32xf32>
    %116 = arith.subf %106, %115 : vector<8x32xf32>
    %117 = arith.mulf %116, %116 : vector<8x32xf32>
    %cst_78 = arith.constant dense<0.000000e+00> : vector<8xf32>
    %118 = vector.multi_reduction <add>, %117, %cst_78 [1] : vector<8x32xf32> to vector<8xf32>
    %119 = vector.shape_cast %118 : vector<8xf32> to vector<8x1xf32>
    %cst_79 = arith.constant 3.200000e+01 : f32
    %120 = vector.broadcast %cst_79 : f32 to vector<8x1xf32>
    %121 = arith.divf %119, %120 : vector<8x1xf32>
    %122 = vector.broadcast %114 : vector<8x1xf32> to vector<8x32xf32>
    %123 = arith.subf %106, %122 : vector<8x32xf32>
    %cst_80 = arith.constant 9.99999974E-6 : f32
    %124 = vector.broadcast %cst_80 : f32 to vector<8x1xf32>
    %125 = arith.addf %121, %124 : vector<8x1xf32>
    %126 = math.rsqrt %125 : vector<8x1xf32>
    %127 = vector.broadcast %126 : vector<8x1xf32> to vector<8x32xf32>
    %128 = arith.mulf %123, %127 : vector<8x32xf32>
    %129 = vector.broadcast %108 : vector<1x32xf32> to vector<8x32xf32>
    %130 = arith.mulf %128, %129 : vector<8x32xf32>
    %131 = vector.broadcast %110 : vector<1x32xf32> to vector<8x32xf32>
    %132 = arith.addf %130, %131 : vector<8x32xf32>
    %c1_81 = arith.constant 1 : index
    %c0_82 = arith.constant 0 : index
    %c0_83 = arith.constant 0 : index
    %133 = vector.load %arg9[%c1_81, %c0_82, %c0_83] : memref<6x32x2048xf32, #tpu.memory_space<vmem>>, vector<1x32x2048xf32>
    %134 = vector.shape_cast %133 : vector<1x32x2048xf32> to vector<32x2048xf32>
    %cst_84 = arith.constant dense<0.000000e+00> : vector<8x2048xf32>
    %135 = tpu.matmul %132, %134, %cst_84 {dimension_numbers = #tpu.dot_dimension_numbers<[1], [0], [0], [1], [0, 0, 1, 1], [], []>} : vector<8x32xf32>, vector<32x2048xf32>, vector<8x2048xf32> -> vector<8x2048xf32>
    %c1_85 = arith.constant 1 : index
    %c0_86 = arith.constant 0 : index
    %c0_87 = arith.constant 0 : index
    %136 = vector.load %arg10[%c1_85, %c0_86, %c0_87] : memref<6x1x2048xf32, #tpu.memory_space<vmem>>, vector<1x1x2048xf32>
    %137 = vector.shape_cast %136 : vector<1x1x2048xf32> to vector<1x2048xf32>
    %138 = vector.broadcast %137 : vector<1x2048xf32> to vector<8x2048xf32>
    %139 = arith.addf %135, %138 : vector<8x2048xf32>
    %cst_88 = arith.constant 0.000000e+00 : f32
    %140 = vector.broadcast %cst_88 : f32 to vector<8x2048xf32>
    %141 = arith.maximumf %139, %140 : vector<8x2048xf32>
    %c1_89 = arith.constant 1 : index
    %c0_90 = arith.constant 0 : index
    %c0_91 = arith.constant 0 : index
    %142 = vector.load %arg11[%c1_89, %c0_90, %c0_91] : memref<6x32x2048xf32, #tpu.memory_space<vmem>>, vector<1x32x2048xf32>
    %143 = vector.shape_cast %142 : vector<1x32x2048xf32> to vector<32x2048xf32>
    %cst_92 = arith.constant dense<0.000000e+00> : vector<8x32xf32>
    %144 = tpu.matmul %141, %143, %cst_92 {dimension_numbers = #tpu.dot_dimension_numbers<[1], [1], [0], [0], [0, 0, 1, 0], [], []>} : vector<8x2048xf32>, vector<32x2048xf32>, vector<8x32xf32> -> vector<8x32xf32>
    %c1_93 = arith.constant 1 : index
    %c0_94 = arith.constant 0 : index
    %c0_95 = arith.constant 0 : index
    %145 = vector.load %arg12[%c1_93, %c0_94, %c0_95] : memref<6x1x32xf32, #tpu.memory_space<vmem>>, vector<1x1x32xf32>
    %146 = vector.shape_cast %145 : vector<1x1x32xf32> to vector<1x32xf32>
    %147 = vector.broadcast %146 : vector<1x32xf32> to vector<8x32xf32>
    %148 = arith.addf %144, %147 : vector<8x32xf32>
    %149 = arith.addf %132, %148 : vector<8x32xf32>
    %c1_96 = arith.constant 1 : index
    %c0_97 = arith.constant 0 : index
    %c0_98 = arith.constant 0 : index
    %150 = vector.load %arg13[%c1_96, %c0_97, %c0_98] : memref<6x1x32xf32, #tpu.memory_space<vmem>>, vector<1x1x32xf32>
    %151 = vector.shape_cast %150 : vector<1x1x32xf32> to vector<1x32xf32>
    %c1_99 = arith.constant 1 : index
    %c0_100 = arith.constant 0 : index
    %c0_101 = arith.constant 0 : index
    %152 = vector.load %arg14[%c1_99, %c0_100, %c0_101] : memref<6x1x32xf32, #tpu.memory_space<vmem>>, vector<1x1x32xf32>
    %153 = vector.shape_cast %152 : vector<1x1x32xf32> to vector<1x32xf32>
    %cst_102 = arith.constant dense<0.000000e+00> : vector<8xf32>
    %154 = vector.multi_reduction <add>, %149, %cst_102 [1] : vector<8x32xf32> to vector<8xf32>
    %155 = vector.shape_cast %154 : vector<8xf32> to vector<8x1xf32>
    %cst_103 = arith.constant 3.200000e+01 : f32
    %156 = vector.broadcast %cst_103 : f32 to vector<8x1xf32>
    %157 = arith.divf %155, %156 : vector<8x1xf32>
    %158 = vector.broadcast %157 : vector<8x1xf32> to vector<8x32xf32>
    %159 = arith.subf %149, %158 : vector<8x32xf32>
    %160 = arith.mulf %159, %159 : vector<8x32xf32>
    %cst_104 = arith.constant dense<0.000000e+00> : vector<8xf32>
    %161 = vector.multi_reduction <add>, %160, %cst_104 [1] : vector<8x32xf32> to vector<8xf32>
    %162 = vector.shape_cast %161 : vector<8xf32> to vector<8x1xf32>
    %cst_105 = arith.constant 3.200000e+01 : f32
    %163 = vector.broadcast %cst_105 : f32 to vector<8x1xf32>
    %164 = arith.divf %162, %163 : vector<8x1xf32>
    %165 = vector.broadcast %157 : vector<8x1xf32> to vector<8x32xf32>
    %166 = arith.subf %149, %165 : vector<8x32xf32>
    %cst_106 = arith.constant 9.99999974E-6 : f32
    %167 = vector.broadcast %cst_106 : f32 to vector<8x1xf32>
    %168 = arith.addf %164, %167 : vector<8x1xf32>
    %169 = math.rsqrt %168 : vector<8x1xf32>
    %170 = vector.broadcast %169 : vector<8x1xf32> to vector<8x32xf32>
    %171 = arith.mulf %166, %170 : vector<8x32xf32>
    %172 = vector.broadcast %151 : vector<1x32xf32> to vector<8x32xf32>
    %173 = arith.mulf %171, %172 : vector<8x32xf32>
    %174 = vector.broadcast %153 : vector<1x32xf32> to vector<8x32xf32>
    %175 = arith.addf %173, %174 : vector<8x32xf32>
    %c2 = arith.constant 2 : index
    %c0_107 = arith.constant 0 : index
    %c0_108 = arith.constant 0 : index
    %176 = vector.load %arg3[%c2, %c0_107, %c0_108] : memref<6x32x32xf32, #tpu.memory_space<vmem>>, vector<1x32x32xf32>
    %177 = vector.shape_cast %176 : vector<1x32x32xf32> to vector<32x32xf32>
    %cst_109 = arith.constant dense<0.000000e+00> : vector<8x32xf32>
    %178 = tpu.matmul %175, %177, %cst_109 {dimension_numbers = #tpu.dot_dimension_numbers<[1], [0], [0], [1], [0, 0, 1, 1], [], []>} : vector<8x32xf32>, vector<32x32xf32>, vector<8x32xf32> -> vector<8x32xf32>
    %c2_110 = arith.constant 2 : index
    %c0_111 = arith.constant 0 : index
    %c0_112 = arith.constant 0 : index
    %179 = vector.load %arg4[%c2_110, %c0_111, %c0_112] : memref<6x1x32xf32, #tpu.memory_space<vmem>>, vector<1x1x32xf32>
    %180 = vector.shape_cast %179 : vector<1x1x32xf32> to vector<1x32xf32>
    %181 = vector.broadcast %180 : vector<1x32xf32> to vector<8x32xf32>
    %182 = arith.addf %178, %181 : vector<8x32xf32>
    %c2_113 = arith.constant 2 : index
    %c0_114 = arith.constant 0 : index
    %c0_115 = arith.constant 0 : index
    %183 = vector.load %arg5[%c2_113, %c0_114, %c0_115] : memref<6x32x32xf32, #tpu.memory_space<vmem>>, vector<1x32x32xf32>
    %184 = vector.shape_cast %183 : vector<1x32x32xf32> to vector<32x32xf32>
    %cst_116 = arith.constant dense<0.000000e+00> : vector<8x32xf32>
    %185 = tpu.matmul %182, %184, %cst_116 {dimension_numbers = #tpu.dot_dimension_numbers<[1], [0], [0], [1], [0, 0, 1, 1], [], []>} : vector<8x32xf32>, vector<32x32xf32>, vector<8x32xf32> -> vector<8x32xf32>
    %c2_117 = arith.constant 2 : index
    %c0_118 = arith.constant 0 : index
    %c0_119 = arith.constant 0 : index
    %186 = vector.load %arg6[%c2_117, %c0_118, %c0_119] : memref<6x1x32xf32, #tpu.memory_space<vmem>>, vector<1x1x32xf32>
    %187 = vector.shape_cast %186 : vector<1x1x32xf32> to vector<1x32xf32>
    %188 = vector.broadcast %187 : vector<1x32xf32> to vector<8x32xf32>
    %189 = arith.addf %185, %188 : vector<8x32xf32>
    %190 = arith.addf %175, %189 : vector<8x32xf32>
    %c2_120 = arith.constant 2 : index
    %c0_121 = arith.constant 0 : index
    %c0_122 = arith.constant 0 : index
    %191 = vector.load %arg7[%c2_120, %c0_121, %c0_122] : memref<6x1x32xf32, #tpu.memory_space<vmem>>, vector<1x1x32xf32>
    %192 = vector.shape_cast %191 : vector<1x1x32xf32> to vector<1x32xf32>
    %c2_123 = arith.constant 2 : index
    %c0_124 = arith.constant 0 : index
    %c0_125 = arith.constant 0 : index
    %193 = vector.load %arg8[%c2_123, %c0_124, %c0_125] : memref<6x1x32xf32, #tpu.memory_space<vmem>>, vector<1x1x32xf32>
    %194 = vector.shape_cast %193 : vector<1x1x32xf32> to vector<1x32xf32>
    %cst_126 = arith.constant dense<0.000000e+00> : vector<8xf32>
    %195 = vector.multi_reduction <add>, %190, %cst_126 [1] : vector<8x32xf32> to vector<8xf32>
    %196 = vector.shape_cast %195 : vector<8xf32> to vector<8x1xf32>
    %cst_127 = arith.constant 3.200000e+01 : f32
    %197 = vector.broadcast %cst_127 : f32 to vector<8x1xf32>
    %198 = arith.divf %196, %197 : vector<8x1xf32>
    %199 = vector.broadcast %198 : vector<8x1xf32> to vector<8x32xf32>
    %200 = arith.subf %190, %199 : vector<8x32xf32>
    %201 = arith.mulf %200, %200 : vector<8x32xf32>
    %cst_128 = arith.constant dense<0.000000e+00> : vector<8xf32>
    %202 = vector.multi_reduction <add>, %201, %cst_128 [1] : vector<8x32xf32> to vector<8xf32>
    %203 = vector.shape_cast %202 : vector<8xf32> to vector<8x1xf32>
    %cst_129 = arith.constant 3.200000e+01 : f32
    %204 = vector.broadcast %cst_129 : f32 to vector<8x1xf32>
    %205 = arith.divf %203, %204 : vector<8x1xf32>
    %206 = vector.broadcast %198 : vector<8x1xf32> to vector<8x32xf32>
    %207 = arith.subf %190, %206 : vector<8x32xf32>
    %cst_130 = arith.constant 9.99999974E-6 : f32
    %208 = vector.broadcast %cst_130 : f32 to vector<8x1xf32>
    %209 = arith.addf %205, %208 : vector<8x1xf32>
    %210 = math.rsqrt %209 : vector<8x1xf32>
    %211 = vector.broadcast %210 : vector<8x1xf32> to vector<8x32xf32>
    %212 = arith.mulf %207, %211 : vector<8x32xf32>
    %213 = vector.broadcast %192 : vector<1x32xf32> to vector<8x32xf32>
    %214 = arith.mulf %212, %213 : vector<8x32xf32>
    %215 = vector.broadcast %194 : vector<1x32xf32> to vector<8x32xf32>
    %216 = arith.addf %214, %215 : vector<8x32xf32>
    %c2_131 = arith.constant 2 : index
    %c0_132 = arith.constant 0 : index
    %c0_133 = arith.constant 0 : index
    %217 = vector.load %arg9[%c2_131, %c0_132, %c0_133] : memref<6x32x2048xf32, #tpu.memory_space<vmem>>, vector<1x32x2048xf32>
    %218 = vector.shape_cast %217 : vector<1x32x2048xf32> to vector<32x2048xf32>
    %cst_134 = arith.constant dense<0.000000e+00> : vector<8x2048xf32>
    %219 = tpu.matmul %216, %218, %cst_134 {dimension_numbers = #tpu.dot_dimension_numbers<[1], [0], [0], [1], [0, 0, 1, 1], [], []>} : vector<8x32xf32>, vector<32x2048xf32>, vector<8x2048xf32> -> vector<8x2048xf32>
    %c2_135 = arith.constant 2 : index
    %c0_136 = arith.constant 0 : index
    %c0_137 = arith.constant 0 : index
    %220 = vector.load %arg10[%c2_135, %c0_136, %c0_137] : memref<6x1x2048xf32, #tpu.memory_space<vmem>>, vector<1x1x2048xf32>
    %221 = vector.shape_cast %220 : vector<1x1x2048xf32> to vector<1x2048xf32>
    %222 = vector.broadcast %221 : vector<1x2048xf32> to vector<8x2048xf32>
    %223 = arith.addf %219, %222 : vector<8x2048xf32>
    %cst_138 = arith.constant 0.000000e+00 : f32
    %224 = vector.broadcast %cst_138 : f32 to vector<8x2048xf32>
    %225 = arith.maximumf %223, %224 : vector<8x2048xf32>
    %c2_139 = arith.constant 2 : index
    %c0_140 = arith.constant 0 : index
    %c0_141 = arith.constant 0 : index
    %226 = vector.load %arg11[%c2_139, %c0_140, %c0_141] : memref<6x32x2048xf32, #tpu.memory_space<vmem>>, vector<1x32x2048xf32>
    %227 = vector.shape_cast %226 : vector<1x32x2048xf32> to vector<32x2048xf32>
    %cst_142 = arith.constant dense<0.000000e+00> : vector<8x32xf32>
    %228 = tpu.matmul %225, %227, %cst_142 {dimension_numbers = #tpu.dot_dimension_numbers<[1], [1], [0], [0], [0, 0, 1, 0], [], []>} : vector<8x2048xf32>, vector<32x2048xf32>, vector<8x32xf32> -> vector<8x32xf32>
    %c2_143 = arith.constant 2 : index
    %c0_144 = arith.constant 0 : index
    %c0_145 = arith.constant 0 : index
    %229 = vector.load %arg12[%c2_143, %c0_144, %c0_145] : memref<6x1x32xf32, #tpu.memory_space<vmem>>, vector<1x1x32xf32>
    %230 = vector.shape_cast %229 : vector<1x1x32xf32> to vector<1x32xf32>
    %231 = vector.broadcast %230 : vector<1x32xf32> to vector<8x32xf32>
    %232 = arith.addf %228, %231 : vector<8x32xf32>
    %233 = arith.addf %216, %232 : vector<8x32xf32>
    %c2_146 = arith.constant 2 : index
    %c0_147 = arith.constant 0 : index
    %c0_148 = arith.constant 0 : index
    %234 = vector.load %arg13[%c2_146, %c0_147, %c0_148] : memref<6x1x32xf32, #tpu.memory_space<vmem>>, vector<1x1x32xf32>
    %235 = vector.shape_cast %234 : vector<1x1x32xf32> to vector<1x32xf32>
    %c2_149 = arith.constant 2 : index
    %c0_150 = arith.constant 0 : index
    %c0_151 = arith.constant 0 : index
    %236 = vector.load %arg14[%c2_149, %c0_150, %c0_151] : memref<6x1x32xf32, #tpu.memory_space<vmem>>, vector<1x1x32xf32>
    %237 = vector.shape_cast %236 : vector<1x1x32xf32> to vector<1x32xf32>
    %cst_152 = arith.constant dense<0.000000e+00> : vector<8xf32>
    %238 = vector.multi_reduction <add>, %233, %cst_152 [1] : vector<8x32xf32> to vector<8xf32>
    %239 = vector.shape_cast %238 : vector<8xf32> to vector<8x1xf32>
    %cst_153 = arith.constant 3.200000e+01 : f32
    %240 = vector.broadcast %cst_153 : f32 to vector<8x1xf32>
    %241 = arith.divf %239, %240 : vector<8x1xf32>
    %242 = vector.broadcast %241 : vector<8x1xf32> to vector<8x32xf32>
    %243 = arith.subf %233, %242 : vector<8x32xf32>
    %244 = arith.mulf %243, %243 : vector<8x32xf32>
    %cst_154 = arith.constant dense<0.000000e+00> : vector<8xf32>
    %245 = vector.multi_reduction <add>, %244, %cst_154 [1] : vector<8x32xf32> to vector<8xf32>
    %246 = vector.shape_cast %245 : vector<8xf32> to vector<8x1xf32>
    %cst_155 = arith.constant 3.200000e+01 : f32
    %247 = vector.broadcast %cst_155 : f32 to vector<8x1xf32>
    %248 = arith.divf %246, %247 : vector<8x1xf32>
    %249 = vector.broadcast %241 : vector<8x1xf32> to vector<8x32xf32>
    %250 = arith.subf %233, %249 : vector<8x32xf32>
    %cst_156 = arith.constant 9.99999974E-6 : f32
    %251 = vector.broadcast %cst_156 : f32 to vector<8x1xf32>
    %252 = arith.addf %248, %251 : vector<8x1xf32>
    %253 = math.rsqrt %252 : vector<8x1xf32>
    %254 = vector.broadcast %253 : vector<8x1xf32> to vector<8x32xf32>
    %255 = arith.mulf %250, %254 : vector<8x32xf32>
    %256 = vector.broadcast %235 : vector<1x32xf32> to vector<8x32xf32>
    %257 = arith.mulf %255, %256 : vector<8x32xf32>
    %258 = vector.broadcast %237 : vector<1x32xf32> to vector<8x32xf32>
    %259 = arith.addf %257, %258 : vector<8x32xf32>
    %c3 = arith.constant 3 : index
    %c0_157 = arith.constant 0 : index
    %c0_158 = arith.constant 0 : index
    %260 = vector.load %arg3[%c3, %c0_157, %c0_158] : memref<6x32x32xf32, #tpu.memory_space<vmem>>, vector<1x32x32xf32>
    %261 = vector.shape_cast %260 : vector<1x32x32xf32> to vector<32x32xf32>
    %cst_159 = arith.constant dense<0.000000e+00> : vector<8x32xf32>
    %262 = tpu.matmul %259, %261, %cst_159 {dimension_numbers = #tpu.dot_dimension_numbers<[1], [0], [0], [1], [0, 0, 1, 1], [], []>} : vector<8x32xf32>, vector<32x32xf32>, vector<8x32xf32> -> vector<8x32xf32>
    %c3_160 = arith.constant 3 : index
    %c0_161 = arith.constant 0 : index
    %c0_162 = arith.constant 0 : index
    %263 = vector.load %arg4[%c3_160, %c0_161, %c0_162] : memref<6x1x32xf32, #tpu.memory_space<vmem>>, vector<1x1x32xf32>
    %264 = vector.shape_cast %263 : vector<1x1x32xf32> to vector<1x32xf32>
    %265 = vector.broadcast %264 : vector<1x32xf32> to vector<8x32xf32>
    %266 = arith.addf %262, %265 : vector<8x32xf32>
    %c3_163 = arith.constant 3 : index
    %c0_164 = arith.constant 0 : index
    %c0_165 = arith.constant 0 : index
    %267 = vector.load %arg5[%c3_163, %c0_164, %c0_165] : memref<6x32x32xf32, #tpu.memory_space<vmem>>, vector<1x32x32xf32>
    %268 = vector.shape_cast %267 : vector<1x32x32xf32> to vector<32x32xf32>
    %cst_166 = arith.constant dense<0.000000e+00> : vector<8x32xf32>
    %269 = tpu.matmul %266, %268, %cst_166 {dimension_numbers = #tpu.dot_dimension_numbers<[1], [0], [0], [1], [0, 0, 1, 1], [], []>} : vector<8x32xf32>, vector<32x32xf32>, vector<8x32xf32> -> vector<8x32xf32>
    %c3_167 = arith.constant 3 : index
    %c0_168 = arith.constant 0 : index
    %c0_169 = arith.constant 0 : index
    %270 = vector.load %arg6[%c3_167, %c0_168, %c0_169] : memref<6x1x32xf32, #tpu.memory_space<vmem>>, vector<1x1x32xf32>
    %271 = vector.shape_cast %270 : vector<1x1x32xf32> to vector<1x32xf32>
    %272 = vector.broadcast %271 : vector<1x32xf32> to vector<8x32xf32>
    %273 = arith.addf %269, %272 : vector<8x32xf32>
    %274 = arith.addf %259, %273 : vector<8x32xf32>
    %c3_170 = arith.constant 3 : index
    %c0_171 = arith.constant 0 : index
    %c0_172 = arith.constant 0 : index
    %275 = vector.load %arg7[%c3_170, %c0_171, %c0_172] : memref<6x1x32xf32, #tpu.memory_space<vmem>>, vector<1x1x32xf32>
    %276 = vector.shape_cast %275 : vector<1x1x32xf32> to vector<1x32xf32>
    %c3_173 = arith.constant 3 : index
    %c0_174 = arith.constant 0 : index
    %c0_175 = arith.constant 0 : index
    %277 = vector.load %arg8[%c3_173, %c0_174, %c0_175] : memref<6x1x32xf32, #tpu.memory_space<vmem>>, vector<1x1x32xf32>
    %278 = vector.shape_cast %277 : vector<1x1x32xf32> to vector<1x32xf32>
    %cst_176 = arith.constant dense<0.000000e+00> : vector<8xf32>
    %279 = vector.multi_reduction <add>, %274, %cst_176 [1] : vector<8x32xf32> to vector<8xf32>
    %280 = vector.shape_cast %279 : vector<8xf32> to vector<8x1xf32>
    %cst_177 = arith.constant 3.200000e+01 : f32
    %281 = vector.broadcast %cst_177 : f32 to vector<8x1xf32>
    %282 = arith.divf %280, %281 : vector<8x1xf32>
    %283 = vector.broadcast %282 : vector<8x1xf32> to vector<8x32xf32>
    %284 = arith.subf %274, %283 : vector<8x32xf32>
    %285 = arith.mulf %284, %284 : vector<8x32xf32>
    %cst_178 = arith.constant dense<0.000000e+00> : vector<8xf32>
    %286 = vector.multi_reduction <add>, %285, %cst_178 [1] : vector<8x32xf32> to vector<8xf32>
    %287 = vector.shape_cast %286 : vector<8xf32> to vector<8x1xf32>
    %cst_179 = arith.constant 3.200000e+01 : f32
    %288 = vector.broadcast %cst_179 : f32 to vector<8x1xf32>
    %289 = arith.divf %287, %288 : vector<8x1xf32>
    %290 = vector.broadcast %282 : vector<8x1xf32> to vector<8x32xf32>
    %291 = arith.subf %274, %290 : vector<8x32xf32>
    %cst_180 = arith.constant 9.99999974E-6 : f32
    %292 = vector.broadcast %cst_180 : f32 to vector<8x1xf32>
    %293 = arith.addf %289, %292 : vector<8x1xf32>
    %294 = math.rsqrt %293 : vector<8x1xf32>
    %295 = vector.broadcast %294 : vector<8x1xf32> to vector<8x32xf32>
    %296 = arith.mulf %291, %295 : vector<8x32xf32>
    %297 = vector.broadcast %276 : vector<1x32xf32> to vector<8x32xf32>
    %298 = arith.mulf %296, %297 : vector<8x32xf32>
    %299 = vector.broadcast %278 : vector<1x32xf32> to vector<8x32xf32>
    %300 = arith.addf %298, %299 : vector<8x32xf32>
    %c3_181 = arith.constant 3 : index
    %c0_182 = arith.constant 0 : index
    %c0_183 = arith.constant 0 : index
    %301 = vector.load %arg9[%c3_181, %c0_182, %c0_183] : memref<6x32x2048xf32, #tpu.memory_space<vmem>>, vector<1x32x2048xf32>
    %302 = vector.shape_cast %301 : vector<1x32x2048xf32> to vector<32x2048xf32>
    %cst_184 = arith.constant dense<0.000000e+00> : vector<8x2048xf32>
    %303 = tpu.matmul %300, %302, %cst_184 {dimension_numbers = #tpu.dot_dimension_numbers<[1], [0], [0], [1], [0, 0, 1, 1], [], []>} : vector<8x32xf32>, vector<32x2048xf32>, vector<8x2048xf32> -> vector<8x2048xf32>
    %c3_185 = arith.constant 3 : index
    %c0_186 = arith.constant 0 : index
    %c0_187 = arith.constant 0 : index
    %304 = vector.load %arg10[%c3_185, %c0_186, %c0_187] : memref<6x1x2048xf32, #tpu.memory_space<vmem>>, vector<1x1x2048xf32>
    %305 = vector.shape_cast %304 : vector<1x1x2048xf32> to vector<1x2048xf32>
    %306 = vector.broadcast %305 : vector<1x2048xf32> to vector<8x2048xf32>
    %307 = arith.addf %303, %306 : vector<8x2048xf32>
    %cst_188 = arith.constant 0.000000e+00 : f32
    %308 = vector.broadcast %cst_188 : f32 to vector<8x2048xf32>
    %309 = arith.maximumf %307, %308 : vector<8x2048xf32>
    %c3_189 = arith.constant 3 : index
    %c0_190 = arith.constant 0 : index
    %c0_191 = arith.constant 0 : index
    %310 = vector.load %arg11[%c3_189, %c0_190, %c0_191] : memref<6x32x2048xf32, #tpu.memory_space<vmem>>, vector<1x32x2048xf32>
    %311 = vector.shape_cast %310 : vector<1x32x2048xf32> to vector<32x2048xf32>
    %cst_192 = arith.constant dense<0.000000e+00> : vector<8x32xf32>
    %312 = tpu.matmul %309, %311, %cst_192 {dimension_numbers = #tpu.dot_dimension_numbers<[1], [1], [0], [0], [0, 0, 1, 0], [], []>} : vector<8x2048xf32>, vector<32x2048xf32>, vector<8x32xf32> -> vector<8x32xf32>
    %c3_193 = arith.constant 3 : index
    %c0_194 = arith.constant 0 : index
    %c0_195 = arith.constant 0 : index
    %313 = vector.load %arg12[%c3_193, %c0_194, %c0_195] : memref<6x1x32xf32, #tpu.memory_space<vmem>>, vector<1x1x32xf32>
    %314 = vector.shape_cast %313 : vector<1x1x32xf32> to vector<1x32xf32>
    %315 = vector.broadcast %314 : vector<1x32xf32> to vector<8x32xf32>
    %316 = arith.addf %312, %315 : vector<8x32xf32>
    %317 = arith.addf %300, %316 : vector<8x32xf32>
    %c3_196 = arith.constant 3 : index
    %c0_197 = arith.constant 0 : index
    %c0_198 = arith.constant 0 : index
    %318 = vector.load %arg13[%c3_196, %c0_197, %c0_198] : memref<6x1x32xf32, #tpu.memory_space<vmem>>, vector<1x1x32xf32>
    %319 = vector.shape_cast %318 : vector<1x1x32xf32> to vector<1x32xf32>
    %c3_199 = arith.constant 3 : index
    %c0_200 = arith.constant 0 : index
    %c0_201 = arith.constant 0 : index
    %320 = vector.load %arg14[%c3_199, %c0_200, %c0_201] : memref<6x1x32xf32, #tpu.memory_space<vmem>>, vector<1x1x32xf32>
    %321 = vector.shape_cast %320 : vector<1x1x32xf32> to vector<1x32xf32>
    %cst_202 = arith.constant dense<0.000000e+00> : vector<8xf32>
    %322 = vector.multi_reduction <add>, %317, %cst_202 [1] : vector<8x32xf32> to vector<8xf32>
    %323 = vector.shape_cast %322 : vector<8xf32> to vector<8x1xf32>
    %cst_203 = arith.constant 3.200000e+01 : f32
    %324 = vector.broadcast %cst_203 : f32 to vector<8x1xf32>
    %325 = arith.divf %323, %324 : vector<8x1xf32>
    %326 = vector.broadcast %325 : vector<8x1xf32> to vector<8x32xf32>
    %327 = arith.subf %317, %326 : vector<8x32xf32>
    %328 = arith.mulf %327, %327 : vector<8x32xf32>
    %cst_204 = arith.constant dense<0.000000e+00> : vector<8xf32>
    %329 = vector.multi_reduction <add>, %328, %cst_204 [1] : vector<8x32xf32> to vector<8xf32>
    %330 = vector.shape_cast %329 : vector<8xf32> to vector<8x1xf32>
    %cst_205 = arith.constant 3.200000e+01 : f32
    %331 = vector.broadcast %cst_205 : f32 to vector<8x1xf32>
    %332 = arith.divf %330, %331 : vector<8x1xf32>
    %333 = vector.broadcast %325 : vector<8x1xf32> to vector<8x32xf32>
    %334 = arith.subf %317, %333 : vector<8x32xf32>
    %cst_206 = arith.constant 9.99999974E-6 : f32
    %335 = vector.broadcast %cst_206 : f32 to vector<8x1xf32>
    %336 = arith.addf %332, %335 : vector<8x1xf32>
    %337 = math.rsqrt %336 : vector<8x1xf32>
    %338 = vector.broadcast %337 : vector<8x1xf32> to vector<8x32xf32>
    %339 = arith.mulf %334, %338 : vector<8x32xf32>
    %340 = vector.broadcast %319 : vector<1x32xf32> to vector<8x32xf32>
    %341 = arith.mulf %339, %340 : vector<8x32xf32>
    %342 = vector.broadcast %321 : vector<1x32xf32> to vector<8x32xf32>
    %343 = arith.addf %341, %342 : vector<8x32xf32>
    %c4 = arith.constant 4 : index
    %c0_207 = arith.constant 0 : index
    %c0_208 = arith.constant 0 : index
    %344 = vector.load %arg3[%c4, %c0_207, %c0_208] : memref<6x32x32xf32, #tpu.memory_space<vmem>>, vector<1x32x32xf32>
    %345 = vector.shape_cast %344 : vector<1x32x32xf32> to vector<32x32xf32>
    %cst_209 = arith.constant dense<0.000000e+00> : vector<8x32xf32>
    %346 = tpu.matmul %343, %345, %cst_209 {dimension_numbers = #tpu.dot_dimension_numbers<[1], [0], [0], [1], [0, 0, 1, 1], [], []>} : vector<8x32xf32>, vector<32x32xf32>, vector<8x32xf32> -> vector<8x32xf32>
    %c4_210 = arith.constant 4 : index
    %c0_211 = arith.constant 0 : index
    %c0_212 = arith.constant 0 : index
    %347 = vector.load %arg4[%c4_210, %c0_211, %c0_212] : memref<6x1x32xf32, #tpu.memory_space<vmem>>, vector<1x1x32xf32>
    %348 = vector.shape_cast %347 : vector<1x1x32xf32> to vector<1x32xf32>
    %349 = vector.broadcast %348 : vector<1x32xf32> to vector<8x32xf32>
    %350 = arith.addf %346, %349 : vector<8x32xf32>
    %c4_213 = arith.constant 4 : index
    %c0_214 = arith.constant 0 : index
    %c0_215 = arith.constant 0 : index
    %351 = vector.load %arg5[%c4_213, %c0_214, %c0_215] : memref<6x32x32xf32, #tpu.memory_space<vmem>>, vector<1x32x32xf32>
    %352 = vector.shape_cast %351 : vector<1x32x32xf32> to vector<32x32xf32>
    %cst_216 = arith.constant dense<0.000000e+00> : vector<8x32xf32>
    %353 = tpu.matmul %350, %352, %cst_216 {dimension_numbers = #tpu.dot_dimension_numbers<[1], [0], [0], [1], [0, 0, 1, 1], [], []>} : vector<8x32xf32>, vector<32x32xf32>, vector<8x32xf32> -> vector<8x32xf32>
    %c4_217 = arith.constant 4 : index
    %c0_218 = arith.constant 0 : index
    %c0_219 = arith.constant 0 : index
    %354 = vector.load %arg6[%c4_217, %c0_218, %c0_219] : memref<6x1x32xf32, #tpu.memory_space<vmem>>, vector<1x1x32xf32>
    %355 = vector.shape_cast %354 : vector<1x1x32xf32> to vector<1x32xf32>
    %356 = vector.broadcast %355 : vector<1x32xf32> to vector<8x32xf32>
    %357 = arith.addf %353, %356 : vector<8x32xf32>
    %358 = arith.addf %343, %357 : vector<8x32xf32>
    %c4_220 = arith.constant 4 : index
    %c0_221 = arith.constant 0 : index
    %c0_222 = arith.constant 0 : index
    %359 = vector.load %arg7[%c4_220, %c0_221, %c0_222] : memref<6x1x32xf32, #tpu.memory_space<vmem>>, vector<1x1x32xf32>
    %360 = vector.shape_cast %359 : vector<1x1x32xf32> to vector<1x32xf32>
    %c4_223 = arith.constant 4 : index
    %c0_224 = arith.constant 0 : index
    %c0_225 = arith.constant 0 : index
    %361 = vector.load %arg8[%c4_223, %c0_224, %c0_225] : memref<6x1x32xf32, #tpu.memory_space<vmem>>, vector<1x1x32xf32>
    %362 = vector.shape_cast %361 : vector<1x1x32xf32> to vector<1x32xf32>
    %cst_226 = arith.constant dense<0.000000e+00> : vector<8xf32>
    %363 = vector.multi_reduction <add>, %358, %cst_226 [1] : vector<8x32xf32> to vector<8xf32>
    %364 = vector.shape_cast %363 : vector<8xf32> to vector<8x1xf32>
    %cst_227 = arith.constant 3.200000e+01 : f32
    %365 = vector.broadcast %cst_227 : f32 to vector<8x1xf32>
    %366 = arith.divf %364, %365 : vector<8x1xf32>
    %367 = vector.broadcast %366 : vector<8x1xf32> to vector<8x32xf32>
    %368 = arith.subf %358, %367 : vector<8x32xf32>
    %369 = arith.mulf %368, %368 : vector<8x32xf32>
    %cst_228 = arith.constant dense<0.000000e+00> : vector<8xf32>
    %370 = vector.multi_reduction <add>, %369, %cst_228 [1] : vector<8x32xf32> to vector<8xf32>
    %371 = vector.shape_cast %370 : vector<8xf32> to vector<8x1xf32>
    %cst_229 = arith.constant 3.200000e+01 : f32
    %372 = vector.broadcast %cst_229 : f32 to vector<8x1xf32>
    %373 = arith.divf %371, %372 : vector<8x1xf32>
    %374 = vector.broadcast %366 : vector<8x1xf32> to vector<8x32xf32>
    %375 = arith.subf %358, %374 : vector<8x32xf32>
    %cst_230 = arith.constant 9.99999974E-6 : f32
    %376 = vector.broadcast %cst_230 : f32 to vector<8x1xf32>
    %377 = arith.addf %373, %376 : vector<8x1xf32>
    %378 = math.rsqrt %377 : vector<8x1xf32>
    %379 = vector.broadcast %378 : vector<8x1xf32> to vector<8x32xf32>
    %380 = arith.mulf %375, %379 : vector<8x32xf32>
    %381 = vector.broadcast %360 : vector<1x32xf32> to vector<8x32xf32>
    %382 = arith.mulf %380, %381 : vector<8x32xf32>
    %383 = vector.broadcast %362 : vector<1x32xf32> to vector<8x32xf32>
    %384 = arith.addf %382, %383 : vector<8x32xf32>
    %c4_231 = arith.constant 4 : index
    %c0_232 = arith.constant 0 : index
    %c0_233 = arith.constant 0 : index
    %385 = vector.load %arg9[%c4_231, %c0_232, %c0_233] : memref<6x32x2048xf32, #tpu.memory_space<vmem>>, vector<1x32x2048xf32>
    %386 = vector.shape_cast %385 : vector<1x32x2048xf32> to vector<32x2048xf32>
    %cst_234 = arith.constant dense<0.000000e+00> : vector<8x2048xf32>
    %387 = tpu.matmul %384, %386, %cst_234 {dimension_numbers = #tpu.dot_dimension_numbers<[1], [0], [0], [1], [0, 0, 1, 1], [], []>} : vector<8x32xf32>, vector<32x2048xf32>, vector<8x2048xf32> -> vector<8x2048xf32>
    %c4_235 = arith.constant 4 : index
    %c0_236 = arith.constant 0 : index
    %c0_237 = arith.constant 0 : index
    %388 = vector.load %arg10[%c4_235, %c0_236, %c0_237] : memref<6x1x2048xf32, #tpu.memory_space<vmem>>, vector<1x1x2048xf32>
    %389 = vector.shape_cast %388 : vector<1x1x2048xf32> to vector<1x2048xf32>
    %390 = vector.broadcast %389 : vector<1x2048xf32> to vector<8x2048xf32>
    %391 = arith.addf %387, %390 : vector<8x2048xf32>
    %cst_238 = arith.constant 0.000000e+00 : f32
    %392 = vector.broadcast %cst_238 : f32 to vector<8x2048xf32>
    %393 = arith.maximumf %391, %392 : vector<8x2048xf32>
    %c4_239 = arith.constant 4 : index
    %c0_240 = arith.constant 0 : index
    %c0_241 = arith.constant 0 : index
    %394 = vector.load %arg11[%c4_239, %c0_240, %c0_241] : memref<6x32x2048xf32, #tpu.memory_space<vmem>>, vector<1x32x2048xf32>
    %395 = vector.shape_cast %394 : vector<1x32x2048xf32> to vector<32x2048xf32>
    %cst_242 = arith.constant dense<0.000000e+00> : vector<8x32xf32>
    %396 = tpu.matmul %393, %395, %cst_242 {dimension_numbers = #tpu.dot_dimension_numbers<[1], [1], [0], [0], [0, 0, 1, 0], [], []>} : vector<8x2048xf32>, vector<32x2048xf32>, vector<8x32xf32> -> vector<8x32xf32>
    %c4_243 = arith.constant 4 : index
    %c0_244 = arith.constant 0 : index
    %c0_245 = arith.constant 0 : index
    %397 = vector.load %arg12[%c4_243, %c0_244, %c0_245] : memref<6x1x32xf32, #tpu.memory_space<vmem>>, vector<1x1x32xf32>
    %398 = vector.shape_cast %397 : vector<1x1x32xf32> to vector<1x32xf32>
    %399 = vector.broadcast %398 : vector<1x32xf32> to vector<8x32xf32>
    %400 = arith.addf %396, %399 : vector<8x32xf32>
    %401 = arith.addf %384, %400 : vector<8x32xf32>
    %c4_246 = arith.constant 4 : index
    %c0_247 = arith.constant 0 : index
    %c0_248 = arith.constant 0 : index
    %402 = vector.load %arg13[%c4_246, %c0_247, %c0_248] : memref<6x1x32xf32, #tpu.memory_space<vmem>>, vector<1x1x32xf32>
    %403 = vector.shape_cast %402 : vector<1x1x32xf32> to vector<1x32xf32>
    %c4_249 = arith.constant 4 : index
    %c0_250 = arith.constant 0 : index
    %c0_251 = arith.constant 0 : index
    %404 = vector.load %arg14[%c4_249, %c0_250, %c0_251] : memref<6x1x32xf32, #tpu.memory_space<vmem>>, vector<1x1x32xf32>
    %405 = vector.shape_cast %404 : vector<1x1x32xf32> to vector<1x32xf32>
    %cst_252 = arith.constant dense<0.000000e+00> : vector<8xf32>
    %406 = vector.multi_reduction <add>, %401, %cst_252 [1] : vector<8x32xf32> to vector<8xf32>
    %407 = vector.shape_cast %406 : vector<8xf32> to vector<8x1xf32>
    %cst_253 = arith.constant 3.200000e+01 : f32
    %408 = vector.broadcast %cst_253 : f32 to vector<8x1xf32>
    %409 = arith.divf %407, %408 : vector<8x1xf32>
    %410 = vector.broadcast %409 : vector<8x1xf32> to vector<8x32xf32>
    %411 = arith.subf %401, %410 : vector<8x32xf32>
    %412 = arith.mulf %411, %411 : vector<8x32xf32>
    %cst_254 = arith.constant dense<0.000000e+00> : vector<8xf32>
    %413 = vector.multi_reduction <add>, %412, %cst_254 [1] : vector<8x32xf32> to vector<8xf32>
    %414 = vector.shape_cast %413 : vector<8xf32> to vector<8x1xf32>
    %cst_255 = arith.constant 3.200000e+01 : f32
    %415 = vector.broadcast %cst_255 : f32 to vector<8x1xf32>
    %416 = arith.divf %414, %415 : vector<8x1xf32>
    %417 = vector.broadcast %409 : vector<8x1xf32> to vector<8x32xf32>
    %418 = arith.subf %401, %417 : vector<8x32xf32>
    %cst_256 = arith.constant 9.99999974E-6 : f32
    %419 = vector.broadcast %cst_256 : f32 to vector<8x1xf32>
    %420 = arith.addf %416, %419 : vector<8x1xf32>
    %421 = math.rsqrt %420 : vector<8x1xf32>
    %422 = vector.broadcast %421 : vector<8x1xf32> to vector<8x32xf32>
    %423 = arith.mulf %418, %422 : vector<8x32xf32>
    %424 = vector.broadcast %403 : vector<1x32xf32> to vector<8x32xf32>
    %425 = arith.mulf %423, %424 : vector<8x32xf32>
    %426 = vector.broadcast %405 : vector<1x32xf32> to vector<8x32xf32>
    %427 = arith.addf %425, %426 : vector<8x32xf32>
    %c5 = arith.constant 5 : index
    %c0_257 = arith.constant 0 : index
    %c0_258 = arith.constant 0 : index
    %428 = vector.load %arg3[%c5, %c0_257, %c0_258] : memref<6x32x32xf32, #tpu.memory_space<vmem>>, vector<1x32x32xf32>
    %429 = vector.shape_cast %428 : vector<1x32x32xf32> to vector<32x32xf32>
    %cst_259 = arith.constant dense<0.000000e+00> : vector<8x32xf32>
    %430 = tpu.matmul %427, %429, %cst_259 {dimension_numbers = #tpu.dot_dimension_numbers<[1], [0], [0], [1], [0, 0, 1, 1], [], []>} : vector<8x32xf32>, vector<32x32xf32>, vector<8x32xf32> -> vector<8x32xf32>
    %c5_260 = arith.constant 5 : index
    %c0_261 = arith.constant 0 : index
    %c0_262 = arith.constant 0 : index
    %431 = vector.load %arg4[%c5_260, %c0_261, %c0_262] : memref<6x1x32xf32, #tpu.memory_space<vmem>>, vector<1x1x32xf32>
    %432 = vector.shape_cast %431 : vector<1x1x32xf32> to vector<1x32xf32>
    %433 = vector.broadcast %432 : vector<1x32xf32> to vector<8x32xf32>
    %434 = arith.addf %430, %433 : vector<8x32xf32>
    %c5_263 = arith.constant 5 : index
    %c0_264 = arith.constant 0 : index
    %c0_265 = arith.constant 0 : index
    %435 = vector.load %arg5[%c5_263, %c0_264, %c0_265] : memref<6x32x32xf32, #tpu.memory_space<vmem>>, vector<1x32x32xf32>
    %436 = vector.shape_cast %435 : vector<1x32x32xf32> to vector<32x32xf32>
    %cst_266 = arith.constant dense<0.000000e+00> : vector<8x32xf32>
    %437 = tpu.matmul %434, %436, %cst_266 {dimension_numbers = #tpu.dot_dimension_numbers<[1], [0], [0], [1], [0, 0, 1, 1], [], []>} : vector<8x32xf32>, vector<32x32xf32>, vector<8x32xf32> -> vector<8x32xf32>
    %c5_267 = arith.constant 5 : index
    %c0_268 = arith.constant 0 : index
    %c0_269 = arith.constant 0 : index
    %438 = vector.load %arg6[%c5_267, %c0_268, %c0_269] : memref<6x1x32xf32, #tpu.memory_space<vmem>>, vector<1x1x32xf32>
    %439 = vector.shape_cast %438 : vector<1x1x32xf32> to vector<1x32xf32>
    %440 = vector.broadcast %439 : vector<1x32xf32> to vector<8x32xf32>
    %441 = arith.addf %437, %440 : vector<8x32xf32>
    %442 = arith.addf %427, %441 : vector<8x32xf32>
    %c5_270 = arith.constant 5 : index
    %c0_271 = arith.constant 0 : index
    %c0_272 = arith.constant 0 : index
    %443 = vector.load %arg7[%c5_270, %c0_271, %c0_272] : memref<6x1x32xf32, #tpu.memory_space<vmem>>, vector<1x1x32xf32>
    %444 = vector.shape_cast %443 : vector<1x1x32xf32> to vector<1x32xf32>
    %c5_273 = arith.constant 5 : index
    %c0_274 = arith.constant 0 : index
    %c0_275 = arith.constant 0 : index
    %445 = vector.load %arg8[%c5_273, %c0_274, %c0_275] : memref<6x1x32xf32, #tpu.memory_space<vmem>>, vector<1x1x32xf32>
    %446 = vector.shape_cast %445 : vector<1x1x32xf32> to vector<1x32xf32>
    %cst_276 = arith.constant dense<0.000000e+00> : vector<8xf32>
    %447 = vector.multi_reduction <add>, %442, %cst_276 [1] : vector<8x32xf32> to vector<8xf32>
    %448 = vector.shape_cast %447 : vector<8xf32> to vector<8x1xf32>
    %cst_277 = arith.constant 3.200000e+01 : f32
    %449 = vector.broadcast %cst_277 : f32 to vector<8x1xf32>
    %450 = arith.divf %448, %449 : vector<8x1xf32>
    %451 = vector.broadcast %450 : vector<8x1xf32> to vector<8x32xf32>
    %452 = arith.subf %442, %451 : vector<8x32xf32>
    %453 = arith.mulf %452, %452 : vector<8x32xf32>
    %cst_278 = arith.constant dense<0.000000e+00> : vector<8xf32>
    %454 = vector.multi_reduction <add>, %453, %cst_278 [1] : vector<8x32xf32> to vector<8xf32>
    %455 = vector.shape_cast %454 : vector<8xf32> to vector<8x1xf32>
    %cst_279 = arith.constant 3.200000e+01 : f32
    %456 = vector.broadcast %cst_279 : f32 to vector<8x1xf32>
    %457 = arith.divf %455, %456 : vector<8x1xf32>
    %458 = vector.broadcast %450 : vector<8x1xf32> to vector<8x32xf32>
    %459 = arith.subf %442, %458 : vector<8x32xf32>
    %cst_280 = arith.constant 9.99999974E-6 : f32
    %460 = vector.broadcast %cst_280 : f32 to vector<8x1xf32>
    %461 = arith.addf %457, %460 : vector<8x1xf32>
    %462 = math.rsqrt %461 : vector<8x1xf32>
    %463 = vector.broadcast %462 : vector<8x1xf32> to vector<8x32xf32>
    %464 = arith.mulf %459, %463 : vector<8x32xf32>
    %465 = vector.broadcast %444 : vector<1x32xf32> to vector<8x32xf32>
    %466 = arith.mulf %464, %465 : vector<8x32xf32>
    %467 = vector.broadcast %446 : vector<1x32xf32> to vector<8x32xf32>
    %468 = arith.addf %466, %467 : vector<8x32xf32>
    %c5_281 = arith.constant 5 : index
    %c0_282 = arith.constant 0 : index
    %c0_283 = arith.constant 0 : index
    %469 = vector.load %arg9[%c5_281, %c0_282, %c0_283] : memref<6x32x2048xf32, #tpu.memory_space<vmem>>, vector<1x32x2048xf32>
    %470 = vector.shape_cast %469 : vector<1x32x2048xf32> to vector<32x2048xf32>
    %cst_284 = arith.constant dense<0.000000e+00> : vector<8x2048xf32>
    %471 = tpu.matmul %468, %470, %cst_284 {dimension_numbers = #tpu.dot_dimension_numbers<[1], [0], [0], [1], [0, 0, 1, 1], [], []>} : vector<8x32xf32>, vector<32x2048xf32>, vector<8x2048xf32> -> vector<8x2048xf32>
    %c5_285 = arith.constant 5 : index
    %c0_286 = arith.constant 0 : index
    %c0_287 = arith.constant 0 : index
    %472 = vector.load %arg10[%c5_285, %c0_286, %c0_287] : memref<6x1x2048xf32, #tpu.memory_space<vmem>>, vector<1x1x2048xf32>
    %473 = vector.shape_cast %472 : vector<1x1x2048xf32> to vector<1x2048xf32>
    %474 = vector.broadcast %473 : vector<1x2048xf32> to vector<8x2048xf32>
    %475 = arith.addf %471, %474 : vector<8x2048xf32>
    %cst_288 = arith.constant 0.000000e+00 : f32
    %476 = vector.broadcast %cst_288 : f32 to vector<8x2048xf32>
    %477 = arith.maximumf %475, %476 : vector<8x2048xf32>
    %c5_289 = arith.constant 5 : index
    %c0_290 = arith.constant 0 : index
    %c0_291 = arith.constant 0 : index
    %478 = vector.load %arg11[%c5_289, %c0_290, %c0_291] : memref<6x32x2048xf32, #tpu.memory_space<vmem>>, vector<1x32x2048xf32>
    %479 = vector.shape_cast %478 : vector<1x32x2048xf32> to vector<32x2048xf32>
    %cst_292 = arith.constant dense<0.000000e+00> : vector<8x32xf32>
    %480 = tpu.matmul %477, %479, %cst_292 {dimension_numbers = #tpu.dot_dimension_numbers<[1], [1], [0], [0], [0, 0, 1, 0], [], []>} : vector<8x2048xf32>, vector<32x2048xf32>, vector<8x32xf32> -> vector<8x32xf32>
    %c5_293 = arith.constant 5 : index
    %c0_294 = arith.constant 0 : index
    %c0_295 = arith.constant 0 : index
    %481 = vector.load %arg12[%c5_293, %c0_294, %c0_295] : memref<6x1x32xf32, #tpu.memory_space<vmem>>, vector<1x1x32xf32>
    %482 = vector.shape_cast %481 : vector<1x1x32xf32> to vector<1x32xf32>
    %483 = vector.broadcast %482 : vector<1x32xf32> to vector<8x32xf32>
    %484 = arith.addf %480, %483 : vector<8x32xf32>
    %485 = arith.addf %468, %484 : vector<8x32xf32>
    %c5_296 = arith.constant 5 : index
    %c0_297 = arith.constant 0 : index
    %c0_298 = arith.constant 0 : index
    %486 = vector.load %arg13[%c5_296, %c0_297, %c0_298] : memref<6x1x32xf32, #tpu.memory_space<vmem>>, vector<1x1x32xf32>
    %487 = vector.shape_cast %486 : vector<1x1x32xf32> to vector<1x32xf32>
    %c5_299 = arith.constant 5 : index
    %c0_300 = arith.constant 0 : index
    %c0_301 = arith.constant 0 : index
    %488 = vector.load %arg14[%c5_299, %c0_300, %c0_301] : memref<6x1x32xf32, #tpu.memory_space<vmem>>, vector<1x1x32xf32>
    %489 = vector.shape_cast %488 : vector<1x1x32xf32> to vector<1x32xf32>
    %cst_302 = arith.constant dense<0.000000e+00> : vector<8xf32>
    %490 = vector.multi_reduction <add>, %485, %cst_302 [1] : vector<8x32xf32> to vector<8xf32>
    %491 = vector.shape_cast %490 : vector<8xf32> to vector<8x1xf32>
    %cst_303 = arith.constant 3.200000e+01 : f32
    %492 = vector.broadcast %cst_303 : f32 to vector<8x1xf32>
    %493 = arith.divf %491, %492 : vector<8x1xf32>
    %494 = vector.broadcast %493 : vector<8x1xf32> to vector<8x32xf32>
    %495 = arith.subf %485, %494 : vector<8x32xf32>
    %496 = arith.mulf %495, %495 : vector<8x32xf32>
    %cst_304 = arith.constant dense<0.000000e+00> : vector<8xf32>
    %497 = vector.multi_reduction <add>, %496, %cst_304 [1] : vector<8x32xf32> to vector<8xf32>
    %498 = vector.shape_cast %497 : vector<8xf32> to vector<8x1xf32>
    %cst_305 = arith.constant 3.200000e+01 : f32
    %499 = vector.broadcast %cst_305 : f32 to vector<8x1xf32>
    %500 = arith.divf %498, %499 : vector<8x1xf32>
    %501 = vector.broadcast %493 : vector<8x1xf32> to vector<8x32xf32>
    %502 = arith.subf %485, %501 : vector<8x32xf32>
    %cst_306 = arith.constant 9.99999974E-6 : f32
    %503 = vector.broadcast %cst_306 : f32 to vector<8x1xf32>
    %504 = arith.addf %500, %503 : vector<8x1xf32>
    %505 = math.rsqrt %504 : vector<8x1xf32>
    %506 = vector.broadcast %505 : vector<8x1xf32> to vector<8x32xf32>
    %507 = arith.mulf %502, %506 : vector<8x32xf32>
    %508 = vector.broadcast %487 : vector<1x32xf32> to vector<8x32xf32>
    %509 = arith.mulf %507, %508 : vector<8x32xf32>
    %510 = vector.broadcast %489 : vector<1x32xf32> to vector<8x32xf32>
    %511 = arith.addf %509, %510 : vector<8x32xf32>
    %c0_307 = arith.constant 0 : index
    %c0_308 = arith.constant 0 : index
    %512 = vector.load %arg15[%c0_307, %c0_308] : memref<32x32xf32, #tpu.memory_space<vmem>>, vector<32x32xf32>
    %cst_309 = arith.constant dense<0.000000e+00> : vector<8x32xf32>
    %513 = tpu.matmul %511, %512, %cst_309 {dimension_numbers = #tpu.dot_dimension_numbers<[1], [0], [0], [1], [0, 0, 1, 1], [], []>} : vector<8x32xf32>, vector<32x32xf32>, vector<8x32xf32> -> vector<8x32xf32>
    %c0_310 = arith.constant 0 : index
    %c0_311 = arith.constant 0 : index
    %514 = vector.load %arg16[%c0_310, %c0_311] : memref<1x32xf32, #tpu.memory_space<vmem>>, vector<1x32xf32>
    %515 = vector.broadcast %514 : vector<1x32xf32> to vector<8x32xf32>
    %516 = arith.addf %513, %515 : vector<8x32xf32>
    %cst_312 = arith.constant 0.000000e+00 : f32
    %517 = vector.broadcast %cst_312 : f32 to vector<8x32xf32>
    %518 = arith.maximumf %516, %517 : vector<8x32xf32>
    %c0_313 = arith.constant 0 : index
    %c0_314 = arith.constant 0 : index
    %519 = vector.load %arg17[%c0_313, %c0_314] : memref<32x32xf32, #tpu.memory_space<vmem>>, vector<32x32xf32>
    %cst_315 = arith.constant dense<0.000000e+00> : vector<8x32xf32>
    %520 = tpu.matmul %518, %519, %cst_315 {dimension_numbers = #tpu.dot_dimension_numbers<[1], [0], [0], [1], [0, 0, 1, 1], [], []>} : vector<8x32xf32>, vector<32x32xf32>, vector<8x32xf32> -> vector<8x32xf32>
    %c0_316 = arith.constant 0 : index
    %c0_317 = arith.constant 0 : index
    %521 = vector.load %arg18[%c0_316, %c0_317] : memref<1x32xf32, #tpu.memory_space<vmem>>, vector<1x32xf32>
    %522 = vector.broadcast %521 : vector<1x32xf32> to vector<8x32xf32>
    %523 = arith.addf %520, %522 : vector<8x32xf32>
    %cst_318 = arith.constant 0.000000e+00 : f32
    %524 = vector.broadcast %cst_318 : f32 to vector<8x32xf32>
    %525 = arith.maximumf %523, %524 : vector<8x32xf32>
    %c0_319 = arith.constant 0 : index
    %c0_320 = arith.constant 0 : index
    %526 = vector.load %arg19[%c0_319, %c0_320] : memref<32x8xf32, #tpu.memory_space<vmem>>, vector<32x8xf32>
    %cst_321 = arith.constant dense<0.000000e+00> : vector<8x8xf32>
    %527 = tpu.matmul %525, %526, %cst_321 {dimension_numbers = #tpu.dot_dimension_numbers<[1], [0], [0], [1], [0, 0, 1, 1], [], []>} : vector<8x32xf32>, vector<32x8xf32>, vector<8x8xf32> -> vector<8x8xf32>
    %c0_322 = arith.constant 0 : index
    %c0_323 = arith.constant 0 : index
    %528 = vector.load %arg20[%c0_322, %c0_323] : memref<1x8xf32, #tpu.memory_space<vmem>>, vector<1x8xf32>
    %529 = vector.broadcast %528 : vector<1x8xf32> to vector<8x8xf32>
    %530 = arith.addf %527, %529 : vector<8x8xf32>
    %531 = math.tanh %530 : vector<8x8xf32>
    %c0_324 = arith.constant 0 : index
    %c0_325 = arith.constant 0 : index
    %532 = vector.load %arg21[%c0_324, %c0_325] : memref<3x8xf32, #tpu.memory_space<vmem>>, vector<1x8xf32>
    %c1_326 = arith.constant 1 : index
    %c0_327 = arith.constant 0 : index
    %533 = vector.load %arg21[%c1_326, %c0_327] : memref<3x8xf32, #tpu.memory_space<vmem>>, vector<1x8xf32>
    %c2_328 = arith.constant 2 : index
    %c0_329 = arith.constant 0 : index
    %534 = vector.load %arg21[%c2_328, %c0_329] : memref<3x8xf32, #tpu.memory_space<vmem>>, vector<1x8xf32>
    %535 = arith.negf %531 : vector<8x8xf32>
    %536 = math.exp %535 : vector<8x8xf32>
    %cst_330 = arith.constant 1.000000e+00 : f32
    %537 = vector.broadcast %cst_330 : f32 to vector<8x8xf32>
    %538 = arith.addf %537, %536 : vector<8x8xf32>
    %539 = arith.divf %537, %538 : vector<8x8xf32>
    %540 = arith.subf %533, %532 : vector<1x8xf32>
    %541 = vector.broadcast %540 : vector<1x8xf32> to vector<8x8xf32>
    %542 = arith.mulf %539, %541 : vector<8x8xf32>
    %543 = vector.broadcast %532 : vector<1x8xf32> to vector<8x8xf32>
    %544 = arith.addf %542, %543 : vector<8x8xf32>
    %545 = tpu.iota {dimensions = array<i32: 0>} : vector<8x8xi32>
    %c0_i32 = arith.constant 0 : i32
    %546 = vector.broadcast %c0_i32 : i32 to vector<8x8xi32>
    %547 = arith.cmpi eq, %545, %546 : vector<8x8xi32>
    %cst_331 = arith.constant 5.000000e-01 : f32
    %548 = vector.broadcast %cst_331 : f32 to vector<1x8xf32>
    %549 = arith.cmpf ogt, %534, %548 : vector<1x8xf32>
    %550 = vector.broadcast %549 : vector<1x8xi1> to vector<8x8xi1>
    %551 = arith.andi %547, %550 : vector<8x8xi1>
    %552 = arith.select %551, %544, %531 : vector<8x8xi1>, vector<8x8xf32>
    %c0_332 = arith.constant 0 : index
    %c0_333 = arith.constant 0 : index
    %553 = vector.load %arg22[%c0_332, %c0_333] : memref<8x8xf32, #tpu.memory_space<vmem>>, vector<8x8xf32>
    tpu.vector_store %arg22[%c0_332, %c0_333], %552 {strides = array<i32>} : memref<8x8xf32, #tpu.memory_space<vmem>>, vector<8x8xf32>,
    return
  }
}

</mosaic_0001>

<bundles_post_ra>
// kernel: transformer_generator_forward.1
= control target key start
LH: loop header
LB: loop body
LE: loop exit
PB: predicated region body
PF: predicated region fallthrough
CT: control target
= control target key end

     0   :  { %s12012_s0 = inlined_call_operand.hbm [shape: f32[8,16], index: 0, kind: input, shape index: {}]   ;;  %s12013_s1 = inlined_call_operand.hbm [shape: f32[16,32], index: 1, kind: input, shape index: {}]   ;;  %s12014_s2 = inlined_call_operand.vmem [shape: f32[1,32], index: 2, kind: input, shape index: {}]   ;;  %s12015_s3 = inlined_call_operand.hbm [shape: f32[6,32,32], index: 3, kind: input, shape index: {}]   ;;  %s12016_s4 = inlined_call_operand.hbm [shape: f32[6,1,32], index: 4, kind: input, shape index: {}]   ;;  %s12017_s5 = inlined_call_operand.hbm [shape: f32[6,32,32], index: 5, kind: input, shape index: {}]   ;;  %s12018_s6 = inlined_call_operand.hbm [shape: f32[6,1,32], index: 6, kind: input, shape index: {}]   ;;  %s12019_s7 = inlined_call_operand.hbm [shape: f32[6,1,32], index: 7, kind: input, shape index: {}]   ;;  %s12020_s8 = inlined_call_operand.hbm [shape: f32[6,1,32], index: 8, kind: input, shape index: {}]   ;;  %s12021_s9 = inlined_call_operand.hbm [shape: f32[6,32,2048], index: 9, kind: input, shape index: {}]   ;;  %s12022_s10 = inlined_call_operand.hbm [shape: f32[6,1,2048], index: 10, kind: input, shape index: {}]   ;;  %s12023_s11 = inlined_call_operand.hbm [shape: f32[6,32,2048], index: 11, kind: input, shape index: {}]   ;;  %s12024_s12 = inlined_call_operand.hbm [shape: f32[6,1,32], index: 12, kind: input, shape index: {}]   ;;  %s12025_s13 = inlined_call_operand.hbm [shape: f32[6,1,32], index: 13, kind: input, shape index: {}]   ;;  %s12026_s14 = inlined_call_operand.hbm [shape: f32[6,1,32], index: 14, kind: input, shape index: {}]   ;;  %s12027_s15 = inlined_call_operand.hbm [shape: f32[32,32], index: 15, kind: input, shape index: {}]   ;;  %s12028_s16 = inlined_call_operand.hbm [shape: f32[1,32], index: 16, kind: input, shape index: {}]   ;;  %s12029_s17 = inlined_call_operand.hbm [shape: f32[32,32], index: 17, kind: input, shape index: {}]   ;;  %s12030_s18 = inlined_call_operand.hbm [shape: f32[1,32], index: 18, kind: input, shape index: {}]   ;;  %s12031_s19 = inlined_call_operand.vmem [shape: f32[32,8], index: 19, kind: input, shape index: {}]   ;;  %s12032_s20 = inlined_call_operand.hbm [shape: f32[1,8], index: 20, kind: input, shape index: {}]   ;;  %s12033_s21 = inlined_call_operand.hbm [shape: f32[3,8], index: 21, kind: input, shape index: {}]   ;;  %s12034_s22 = inlined_call_operand.hbm [shape: f32[8,8], index: 22, kind: output, shape index: {}]  }
   0x1   :  { %12035 = sst [smem:[#allocation47_spill]] %s12012_s0 }
   0x2   :  { %12036 = sst [smem:[#allocation48_spill]] %s12013_s1 }
   0x3   :  { %12037 = sst [smem:[#allocation49_spill]] %s12014_s2 }
   0x4   :  { %12038 = sst [smem:[#allocation50_spill]] %s12015_s3 }
   0x5   :  { %12039 = sst [smem:[#allocation51_spill]] %s12016_s4 }
   0x6   :  { %12040 = sst [smem:[#allocation52_spill]] %s12017_s5 }
   0x7   :  { %12041 = sst [smem:[#allocation53_spill]] %s12018_s6 }
   0x8   :  { %27 = vsyncpa [#allocation3], 0 }
   0x9   :  { %28 = vsyncpa [#allocation6], 0 }
   0xa   :  { %29 = vsyncpa [#allocation9], 0 }
   0xb   :  { %30 = vsyncpa [#allocation12], 0 }
   0xc   :  { %31 = vsyncpa [#allocation15], 0 }
   0xd   :  { %32 = vsyncpa [#allocation18], 0 }
   0xe   :  { %33 = vsyncpa [#allocation21], 0 }
   0xf   :  { %34 = vsyncpa [#allocation24], 0 }
  0x10   :  { %35 = vsyncpa [#allocation27], 0 }
  0x11   :  { %36 = vsyncpa [#allocation30], 0 }
  0x12   :  { %37 = vsyncpa [#allocation33], 0 }
  0x13   :  { %38 = vsyncpa [#allocation4], 0  ;;  %s11223_s3 = smov [#allocation5]  }
  0x14   :  { %s54_s28 = sshll.u32 %s11223_s3, 4  ;;  %s55_s28 = int_to_ptr.vmem [resolvable:$true] %s54_s28 }
  0x15   :  { %s10787_s29 = scalar_lea.vmem %s55_s28, 256  ;;  %p10792_p1 = scmp.lt.s32.totalorder %s55_s28, %s55_s28 }
  0x16   :  { %p10788_p0 = scmp.ne.s32.totalorder %s55_s28, %s10787_s29  ;;  %p10793_p2 = scmp.lt.s32.totalorder %s10787_s29, %s10787_s29 }
  0x18   :  { %p10794_p3 = por %p10793_p2, %p10792_p1 }
  0x1a   :  { %p10795_p4 = pnand %p10794_p3, %p10788_p0 }
  0x1c   :  { %10798 = shalt.err (!%p10795_p4)
}
  0x1d   :  { %s11224_s30 = smov 128   ;;  %s11225_s4 = smov 8  }
  0x1e   :  { %s12042_s1 = sld [smem:[#allocation48_spill]]  ;;  %s11226_s5 = smov [#allocation8]  }
  0x1f   :  { %s80_s24 = sshll.u32 %s11226_s5, 4  ;;  %s81_s24 = int_to_ptr.vmem [resolvable:$true] %s80_s24 }
  0x20   :  { %s10807_s6 = scalar_lea.vmem %s81_s24, 96  ;;  %p10812_p6 = scmp.lt.s32.totalorder %s81_s24, %s81_s24 }
  0x21   :  { %p10808_p5 = scmp.ne.s32.totalorder %s81_s24, %s10807_s6  ;;  %p10813_p7 = scmp.lt.s32.totalorder %s10807_s6, %s10807_s6 }
  0x23   :  { %p10814_p8 = por %p10813_p7, %p10812_p6 }
  0x24   :  { %60 = dma.hbm_to_vmem [thread:$0]  %s12042_s1, 256, %s55_s28, [#allocation6], %s11224_s30, %s11224_s30, %s11225_s4  }
  0x25   :  { %p10815_p9 = pnand %p10814_p8, %p10808_p5 }
  0x27   :  { %10818 = shalt.err (!%p10815_p9)
}
  0x28   :  { %s11227_s25 = smov 16   ;;  %s11228_s26 = smov 1  }
  0x29   :  { %s12043_s3 = sld [smem:[#allocation51_spill]]  ;;  %s11229_s28 = smov [#allocation11]  }
  0x2a   :  { %s104_s29 = sshll.u32 %s11229_s28, 4  ;;  %s11230_s0 = smov [#allocation14]   ;;  %s105_s29 = int_to_ptr.vmem [resolvable:$true] %s104_s29 }
  0x2b   :  { %s128_s23 = sshll.u32 %s11230_s0, 4  ;;  %s10827_s1 = scalar_lea.vmem %s105_s29, 96  ;;  %s129_s23 = int_to_ptr.vmem [resolvable:$true] %s128_s23 }
  0x2c   :  { %p10828_p10 = scmp.ne.s32.totalorder %s105_s29, %s10827_s1  ;;  %p10832_p11 = scmp.lt.s32.totalorder %s105_s29, %s105_s29 }
  0x2d   :  { %p10833_p12 = scmp.lt.s32.totalorder %s10827_s1, %s10827_s1 }
  0x2f   :  { %86 = dma.hbm_to_vmem [thread:$0]  %s12043_s3, 96, %s81_s24, [#allocation9], %s11227_s25, %s11227_s25, %s11228_s26  }
  0x30   :  { %p10834_p13 = por %p10833_p12, %p10832_p11 }
  0x32   :  { %p10835_p0 = pnand %p10834_p13, %p10828_p10 }
  0x34   :  { %10838 = shalt.err (!%p10835_p0)
}
  0x35   :  { %s12044_s2 = sld [smem:[#allocation53_spill]]  ;;  %s10847_s24 = scalar_lea.vmem %s129_s23, 96 }
  0x36   :  { %p10848_p1 = scmp.ne.s32.totalorder %s129_s23, %s10847_s24  ;;  %p10852_p2 = scmp.lt.s32.totalorder %s129_s23, %s129_s23 }
  0x37   :  { %p10853_p3 = scmp.lt.s32.totalorder %s10847_s24, %s10847_s24 }
  0x39   :  { %p10854_p4 = por %p10853_p3, %p10852_p2 }
  0x3b   :  { %110 = dma.hbm_to_vmem [thread:$0]  %s12044_s2, 96, %s105_s29, [#allocation12], %s11227_s25, %s11227_s25, %s11228_s26  }
  0x3c   :  { %p10855_p5 = pnand %p10854_p4, %p10848_p1 }
  0x3e   :  { %10858 = shalt.err (!%p10855_p5)
}
  0x3f   :  { %134 = dma.hbm_to_vmem [thread:$0]  %s12020_s8, 96, %s129_s23, [#allocation15], %s11227_s25, %s11227_s25, %s11228_s26  }
  0x40   :  { %s11231_s28 = smov [#allocation17]   ;;  %s11232_s1 = smov [#allocation20]  }
  0x41   :  { %s152_s0 = sshll.u32 %s11231_s28, 4  ;;  %s176_s5 = sshll.u32 %s11232_s1, 4  ;;  %s153_s0 = int_to_ptr.vmem [resolvable:$true] %s152_s0  ;;  %s177_s5 = int_to_ptr.vmem [resolvable:$true] %s176_s5 }
  0x42   :  { %s10867_s29 = scalar_lea.vmem %s153_s0, 1536  ;;  %p10872_p7 = scmp.lt.s32.totalorder %s153_s0, %s153_s0 }
  0x43   :  { %p10868_p6 = scmp.ne.s32.totalorder %s153_s0, %s10867_s29  ;;  %p10873_p8 = scmp.lt.s32.totalorder %s10867_s29, %s10867_s29 }
  0x45   :  { %p10874_p9 = por %p10873_p8, %p10872_p7 }
  0x47   :  { %p10875_p10 = pnand %p10874_p9, %p10868_p6 }
  0x49   :  { %10878 = shalt.err (!%p10875_p10)
}
  0x4a   :  { %s11233_s6 = smov 256   ;;  %s10887_s8 = scalar_lea.vmem %s177_s5, 96 }
  0x4b   :  { %158 = dma.hbm_to_vmem [thread:$0]  %s12022_s10, 1536, %s153_s0, [#allocation18], %s11233_s6, %s11233_s6, %s11227_s25  }
  0x4c   :  { %p10888_p11 = scmp.ne.s32.totalorder %s177_s5, %s10887_s8  ;;  %p10892_p12 = scmp.lt.s32.totalorder %s177_s5, %s177_s5 }
  0x4d   :  { %p10893_p13 = scmp.lt.s32.totalorder %s10887_s8, %s10887_s8 }
  0x4f   :  { %p10894_p0 = por %p10893_p13, %p10892_p12 }
  0x51   :  { %p10895_p1 = pnand %p10894_p0, %p10888_p11 }
  0x53   :  { %10898 = shalt.err (!%p10895_p1)
}
  0x54   :  { %182 = dma.hbm_to_vmem [thread:$0]  %s12024_s12, 96, %s177_s5, [#allocation21], %s11227_s25, %s11227_s25, %s11228_s26  }
  0x55   :  { %s11234_s3 = smov [#allocation23]   ;;  %s11235_s1 = smov [#allocation26]  }
  0x56   :  { %s200_s28 = sshll.u32 %s11234_s3, 4  ;;  %s225_s10 = sshll.u32 %s11235_s1, 4  ;;  %s201_s28 = int_to_ptr.vmem [resolvable:$true] %s200_s28  ;;  %s226_s10 = int_to_ptr.vmem [resolvable:$true] %s225_s10 }
  0x57   :  { %s10907_s0 = scalar_lea.vmem %s201_s28, 96  ;;  %p10912_p3 = scmp.lt.s32.totalorder %s201_s28, %s201_s28 }
  0x58   :  { %p10908_p2 = scmp.ne.s32.totalorder %s201_s28, %s10907_s0  ;;  %p10913_p4 = scmp.lt.s32.totalorder %s10907_s0, %s10907_s0 }
  0x5a   :  { %p10914_p5 = por %p10913_p4, %p10912_p3 }
  0x5c   :  { %p10915_p6 = pnand %p10914_p5, %p10908_p2 }
  0x5e   :  { %10918 = shalt.err (!%p10915_p6)
}
  0x5f   :  { %206 = dma.hbm_to_vmem [thread:$0]  %s12026_s14, 96, %s201_s28, [#allocation24], %s11227_s25, %s11227_s25, %s11228_s26  }
  0x60   :  { %s10927_s12 = scalar_lea.vmem %s226_s10, 16  ;;  %s10931_s5 = scalar_lea.vmem %s226_s10, 32 }
  0x61   :  { %p10928_p7 = scmp.ne.s32.totalorder %s226_s10, %s10927_s12  ;;  %p10932_p8 = scmp.lt.s32.totalorder %s226_s10, %s226_s10 }
  0x62   :  { %p10933_p9 = scmp.lt.s32.totalorder %s10931_s5, %s10927_s12 }
  0x64   :  { %p10934_p10 = por %p10933_p9, %p10932_p8 }
  0x66   :  { %p10935_p11 = pnand %p10934_p10, %p10928_p7 }
  0x68   :  { %10938 = shalt.err (!%p10935_p11)
}
  0x69   :  { %228 = dma.hbm_to_vmem [thread:$0]  %s12028_s16, 16, %s226_s10, [#allocation27]  }
  0x6a   :  { %s11236_s8 = smov [#allocation29]   ;;  %s11237_s27 = smov [#allocation2]  }
  0x6b   :  { %s247_s23 = sshll.u32 %s11236_s8, 4  ;;  %s45_s3 = sshll.u32 %s11237_s27, 4  ;;  %s248_s23 = int_to_ptr.vmem [resolvable:$true] %s247_s23  ;;  %s46_s3 = int_to_ptr.vmem [resolvable:$true] %s45_s3 }
  0x6c   :  { %s10947_s1 = scalar_lea.vmem %s248_s23, 16  ;;  %s10951_s14 = scalar_lea.vmem %s248_s23, 32 }
  0x6d   :  { %p10948_p12 = scmp.ne.s32.totalorder %s248_s23, %s10947_s1  ;;  %p10952_p13 = scmp.lt.s32.totalorder %s248_s23, %s248_s23 }
  0x6e   :  { %p10953_p0 = scmp.lt.s32.totalorder %s10951_s14, %s10947_s1 }
  0x70   :  { %p10954_p1 = por %p10953_p0, %p10952_p13 }
  0x72   :  { %p10955_p2 = pnand %p10954_p1, %p10948_p12 }
  0x74   :  { %10958 = shalt.err (!%p10955_p2)
}
  0x75   :  { %250 = dma.hbm_to_vmem [thread:$0]  %s12030_s18, 16, %s248_s23, [#allocation30]  }
  0x76   :  { %s10967_s29 = scalar_lea.vmem %s46_s3, 128  ;;  %p10972_p4 = scmp.lt.s32.totalorder %s46_s3, %s46_s3 }
  0x77   :  { %p10968_p3 = scmp.ne.s32.totalorder %s46_s3, %s10967_s29  ;;  %p10973_p5 = scmp.lt.s32.totalorder %s10967_s29, %s10967_s29 }
  0x79   :  { %p10974_p6 = por %p10973_p5, %p10972_p4 }
  0x7b   :  { %p10975_p7 = pnand %p10974_p6, %p10968_p3 }
  0x7d   :  { %10978 = shalt.err (!%p10975_p7)
}
  0x7e   :  { %s12045_s6 = sld [smem:[#allocation47_spill]]  ;;  %s11238_s12 = smov [#allocation7]  }
  0x7f   :  { %s68_s5 = sshll.u32 %s11238_s12, 4  ;;  %s11239_s2 = smov [#allocation10]   ;;  %s69_s5 = int_to_ptr.vmem [resolvable:$true] %s68_s5 }
  0x80   :  { %s92_s24 = sshll.u32 %s11239_s2, 4  ;;  %s10987_s8 = scalar_lea.vmem %s69_s5, 3072  ;;  %s93_s24 = int_to_ptr.vmem [resolvable:$true] %s92_s24 }
  0x81   :  { %p10988_p8 = scmp.ne.s32.totalorder %s69_s5, %s10987_s8  ;;  %p10992_p9 = scmp.lt.s32.totalorder %s69_s5, %s69_s5 }
  0x82   :  { %p10993_p10 = scmp.lt.s32.totalorder %s10987_s8, %s10987_s8 }
  0x84   :  { %48 = dma.hbm_to_vmem [thread:$0]  %s12045_s6, 128, %s46_s3, [#allocation3]  }
  0x85   :  { %p10994_p11 = por %p10993_p10, %p10992_p9 }
  0x87   :  { %p10995_p12 = pnand %p10994_p11, %p10988_p8 }
  0x89   :  { %10998 = shalt.err (!%p10995_p12)
}
  0x8a   :  { %s12046_s27 = sld [smem:[#allocation50_spill]]  ;;  %s11007_s3 = scalar_lea.vmem %s93_s24, 3072 }
  0x8b   :  { %p11008_p13 = scmp.ne.s32.totalorder %s93_s24, %s11007_s3  ;;  %p11012_p0 = scmp.lt.s32.totalorder %s93_s24, %s93_s24 }
  0x8c   :  { %p11013_p1 = scmp.lt.s32.totalorder %s11007_s3, %s11007_s3 }
  0x8e   :  { %p11014_p2 = por %p11013_p1, %p11012_p0 }
  0x90   :  { %74 = dma.hbm_to_vmem [thread:$0]  %s12046_s27, 3072, %s69_s5, [#allocation6], %s11224_s30, %s11224_s30, %s11225_s4  }
  0x91   :  { %p11015_p3 = pnand %p11014_p2, %p11008_p13 }
  0x93   :  { %11018 = shalt.err (!%p11015_p3)
}
  0x94   :  { %s12047_s28 = sld [smem:[#allocation52_spill]]  ;;  %s11240_s0 = smov [#allocation13]  }
  0x95   :  { %s116_s29 = sshll.u32 %s11240_s0, 4  ;;  %s11241_s16 = smov [#allocation16]   ;;  %s117_s29 = int_to_ptr.vmem [resolvable:$true] %s116_s29 }
  0x96   :  { %s140_s10 = sshll.u32 %s11241_s16, 4  ;;  %s11027_s6 = scalar_lea.vmem %s117_s29, 96  ;;  %s141_s10 = int_to_ptr.vmem [resolvable:$true] %s140_s10 }
  0x97   :  { %p11028_p4 = scmp.ne.s32.totalorder %s117_s29, %s11027_s6  ;;  %p11032_p5 = scmp.lt.s32.totalorder %s117_s29, %s117_s29 }
  0x98   :  { %p11033_p6 = scmp.lt.s32.totalorder %s11027_s6, %s11027_s6 }
  0x9a   :  { %98 = dma.hbm_to_vmem [thread:$0]  %s12047_s28, 3072, %s93_s24, [#allocation9], %s11224_s30, %s11224_s30, %s11225_s4  }
  0x9b   :  { %p11034_p7 = por %p11033_p6, %p11032_p5 }
  0x9d   :  { %p11035_p8 = pnand %p11034_p7, %p11028_p4 }
  0x9f   :  { %11038 = shalt.err (!%p11035_p8)
}
  0xa0   :  { %122 = dma.hbm_to_vmem [thread:$0]  %s12019_s7, 96, %s117_s29, [#allocation12], %s11227_s25, %s11227_s25, %s11228_s26  }
  0xa1   :  { %s11047_s2 = scalar_lea.vmem %s141_s10, 49152  ;;  %p11052_p10 = scmp.lt.s32.totalorder %s141_s10, %s141_s10 }
  0xa2   :  { %p11048_p9 = scmp.ne.s32.totalorder %s141_s10, %s11047_s2  ;;  %p11053_p11 = scmp.lt.s32.totalorder %s11047_s2, %s11047_s2 }
  0xa4   :  { %p11054_p12 = por %p11053_p11, %p11052_p10 }
  0xa6   :  { %p11055_p13 = pnand %p11054_p12, %p11048_p9 }
  0xa8   :  { %11058 = shalt.err (!%p11055_p13)
}
  0xa9   :  { %s11242_s24 = smov 2048   ;;  %s11243_s23 = smov [#allocation19]  }
  0xaa   :  { %146 = dma.hbm_to_vmem [thread:$0]  %s12021_s9, 49152, %s141_s10, [#allocation15], %s11242_s24, %s11242_s24, %s11224_s30  }
  0xab   :  { %s164_s27 = sshll.u32 %s11243_s23, 4  ;;  %s11244_s3 = smov [#allocation22]   ;;  %s165_s27 = int_to_ptr.vmem [resolvable:$true] %s164_s27 }
  0xac   :  { %s188_s1 = sshll.u32 %s11244_s3, 4  ;;  %s11067_s7 = scalar_lea.vmem %s165_s27, 49152  ;;  %s189_s1 = int_to_ptr.vmem [resolvable:$true] %s188_s1 }
  0xad   :  { %p11068_p0 = scmp.ne.s32.totalorder %s165_s27, %s11067_s7  ;;  %p11072_p1 = scmp.lt.s32.totalorder %s165_s27, %s165_s27 }
  0xae   :  { %p11073_p2 = scmp.lt.s32.totalorder %s11067_s7, %s11067_s7 }
  0xb0   :  { %p11074_p3 = por %p11073_p2, %p11072_p1 }
  0xb2   :  { %p11075_p4 = pnand %p11074_p3, %p11068_p0 }
  0xb4   :  { %11078 = shalt.err (!%p11075_p4)
}
  0xb5   :  { %170 = dma.hbm_to_vmem [thread:$0]  %s12023_s11, 49152, %s165_s27, [#allocation18], %s11242_s24, %s11242_s24, %s11224_s30  }
  0xb6   :  { %s11087_s0 = scalar_lea.vmem %s189_s1, 96  ;;  %p11092_p6 = scmp.lt.s32.totalorder %s189_s1, %s189_s1 }
  0xb7   :  { %p11088_p5 = scmp.ne.s32.totalorder %s189_s1, %s11087_s0  ;;  %p11093_p7 = scmp.lt.s32.totalorder %s11087_s0, %s11087_s0 }
  0xb9   :  { %p11094_p8 = por %p11093_p7, %p11092_p6 }
  0xbb   :  { %p11095_p9 = pnand %p11094_p8, %p11088_p5 }
  0xbd   :  { %11098 = shalt.err (!%p11095_p9)
}
  0xbe   :  { %194 = dma.hbm_to_vmem [thread:$0]  %s12025_s13, 96, %s189_s1, [#allocation21], %s11227_s25, %s11227_s25, %s11228_s26  }
  0xbf   :  { %s11245_s16 = smov [#allocation25]   ;;  %s11246_s6 = smov [#allocation28]  }
  0xc0   :  { %s212_s10 = sshll.u32 %s11245_s16, 4  ;;  %s234_s12 = sshll.u32 %s11246_s6, 4  ;;  %s213_s10 = int_to_ptr.vmem [resolvable:$true] %s212_s10  ;;  %s235_s12 = int_to_ptr.vmem [resolvable:$true] %s234_s12 }
  0xc1   :  { %s11107_s11 = scalar_lea.vmem %s213_s10, 512  ;;  %p11112_p11 = scmp.lt.s32.totalorder %s213_s10, %s213_s10 }
  0xc2   :  { %p11108_p10 = scmp.ne.s32.totalorder %s213_s10, %s11107_s11  ;;  %p11113_p12 = scmp.lt.s32.totalorder %s11107_s11, %s11107_s11 }
  0xc4   :  { %p11114_p13 = por %p11113_p12, %p11112_p11 }
  0xc6   :  { %p11115_p0 = pnand %p11114_p13, %p11108_p10 }
  0xc8   :  { %11118 = shalt.err (!%p11115_p0)
}
  0xc9   :  { %218 = dma.hbm_to_vmem [thread:$0]  %s12027_s15, 512, %s213_s10, [#allocation24], %s11224_s30, %s11224_s30, %s11225_s4  }
  0xca   :  { %s11127_s13 = scalar_lea.vmem %s235_s12, 512  ;;  %p11132_p2 = scmp.lt.s32.totalorder %s235_s12, %s235_s12 }
  0xcb   :  { %p11128_p1 = scmp.ne.s32.totalorder %s235_s12, %s11127_s13  ;;  %p11133_p3 = scmp.lt.s32.totalorder %s11127_s13, %s11127_s13 }
  0xcd   :  { %p11134_p4 = por %p11133_p3, %p11132_p2 }
  0xcf   :  { %p11135_p5 = pnand %p11134_p4, %p11128_p1 }
  0xd1   :  { %11138 = shalt.err (!%p11135_p5)
}
  0xd2   :  { %240 = dma.hbm_to_vmem [thread:$0]  %s12029_s17, 512, %s235_s12, [#allocation27], %s11224_s30, %s11224_s30, %s11225_s4  }
  0xd3   :  { %s11247_s24 = smov [#allocation31]   ;;  %s11248_s18 = smov [#allocation32]  }
  0xd4   :  { %s259_s8 = sshll.u32 %s11247_s24, 4  ;;  %s269_s23 = sshll.u32 %s11248_s18, 4  ;;  %s260_s8 = int_to_ptr.vmem [resolvable:$true] %s259_s8  ;;  %s270_s23 = int_to_ptr.vmem [resolvable:$true] %s269_s23 }
  0xd5   :  { %s11147_s15 = scalar_lea.vmem %s260_s8, 16  ;;  %s11151_s27 = scalar_lea.vmem %s260_s8, 32 }
  0xd6   :  { %p11148_p6 = scmp.ne.s32.totalorder %s260_s8, %s11147_s15  ;;  %p11152_p7 = scmp.lt.s32.totalorder %s260_s8, %s260_s8 }
  0xd7   :  { %p11153_p8 = scmp.lt.s32.totalorder %s11151_s27, %s11147_s15 }
  0xd9   :  { %p11154_p9 = por %p11153_p8, %p11152_p7 }
  0xdb   :  { %p11155_p10 = pnand %p11154_p9, %p11148_p6 }
  0xdd   :  { %11158 = shalt.err (!%p11155_p10)
}
  0xde   :  { %262 = dma.hbm_to_vmem [thread:$0]  %s12032_s20, 16, %s260_s8, [#allocation30]  }
  0xdf   :  { %s11167_s7 = scalar_lea.vmem %s270_s23, 64  ;;  %p11172_p12 = scmp.lt.s32.totalorder %s270_s23, %s270_s23 }
  0xe0   :  { %p11168_p11 = scmp.ne.s32.totalorder %s270_s23, %s11167_s7  ;;  %p11173_p13 = scmp.lt.s32.totalorder %s11167_s7, %s11167_s7 }
  0xe2   :  { %p11174_p0 = por %p11173_p13, %p11172_p12 }
  0xe4   :  { %p11175_p1 = pnand %p11174_p0, %p11168_p11 }
  0xe6   :  { %11178 = shalt.err (!%p11175_p1)
}
  0xe7   :  { %272 = dma.hbm_to_vmem [thread:$0]  %s12033_s21, 64, %s270_s23, [#allocation33]  }
  0xe8   :  { %11199 = dma.done.wait [#allocation3], 128  }
  0xe9   :  { %11200 = vsyncadd [#allocation3], 4294967168 }
  0xea   :  { %11201 = dma.done.wait [#allocation6], 3328  }
  0xeb   :  { %11202 = vsyncadd [#allocation6], 4294963968 }
  0xec   :  { %11203 = dma.done.wait [#allocation9], 3168  }
  0xed   :  { %11204 = vsyncadd [#allocation9], 4294964128 }
  0xee   :  { %11205 = dma.done.wait [#allocation12], 192  }
  0xef   :  { %11206 = vsyncadd [#allocation12], 4294967104 }
  0xf0   :  { %11207 = dma.done.wait [#allocation15], 49248  }
  0xf1   :  { %11208 = vsyncadd [#allocation15], 4294918048 }
  0xf2   :  { %11209 = dma.done.wait [#allocation18], 50688  }
  0xf3   :  { %11210 = vsyncadd [#allocation18], 4294916608 }
  0xf4   :  { %11211 = dma.done.wait [#allocation21], 192  }
  0xf5   :  { %11212 = vsyncadd [#allocation21], 4294967104 }
  0xf6   :  { %11213 = dma.done.wait [#allocation24], 608  }
  0xf7   :  { %11214 = vsyncadd [#allocation24], 4294966688 }
  0xf8   :  { %11215 = dma.done.wait [#allocation27], 528  }
  0xf9   :  { %11216 = vsyncadd [#allocation27], 4294966768 }
  0xfa   :  { %11217 = dma.done.wait [#allocation30], 32  }
  0xfb   :  { %11218 = vsyncadd [#allocation30], 4294967264 }
  0xfc   :  { %11219 = dma.done.wait [#allocation33], 64  }
  0xfd   :  { %11220 = vsyncadd [#allocation33], 4294967232  ;;  %v11249_v0 = vmov 0.0   ;;  %vm11250_vm0 = vmmov 0   ;;  %v335_v1 = vld [vmem:[#allocation5 + $0x8] sm:$0xff]  ;;  %v334_v2 = vld [vmem:[#allocation5] sm:$0xff] }
  0xfe   :  { %10547 = vmatprep.subr.mxu0 %v11249_v0  ;;  %10551 = vmatprep.mubr.msk.f32.mxu0 %vm11250_vm0, %v11249_v0  ;;  %v333_v3 = vld [vmem:[#allocation2] sm:$0xff]  ;;  %vm343_vm1 = vcmask 130048   ;;  %v421_v4 = vld [vmem:[#allocation7 + $0x18] sm:$0xff]  ;;  %v420_v5 = vld [vmem:[#allocation7 + $0x10] sm:$0xff]  ;;  %s12048_s4 = sld [smem:[#allocation49_spill]]  ;;  %vm429_vm2 = vcmask 261120  }
  0xff   :  { %10554 = vmatprep.subr.mxu1 %v11249_v0  ;;  %10562 = vmatprep.mubr.msk.f32.mxu1 %vm11250_vm0, %v11249_v0  ;;  %v419_v6 = vld [vmem:[#allocation7 + $0x8] sm:$0xff]  ;;  %v418_v7 = vld [vmem:[#allocation7] sm:$0xff]  ;;  %v505_v9 = vld [vmem:[#allocation10 + $0x10] sm:$0xff]  ;;  %vm10331_vm7 = vcmask 64512  }
 0x100   :  { %10548 = vmatpush3.msra.mxu0 %v335_v1  ;;  %10555 = vmatpush3.msra.mxu1 %v421_v4  ;;  %v506_v8 = vld [vmem:[#allocation10 + $0x18] sm:$0xff]  ;;  %v504_v15 = vld [vmem:[#allocation10 + $0x8] sm:$0xff]  ;;  %v503_v16 = vld [vmem:[#allocation10] sm:$0xff] }
 0x101   :  { %10549 = vmatprep.subr.mxu0 %v11249_v0  ;;  %10556 = vmatprep.subr.mxu1 %v11249_v0  ;;  %v10360_v17 = vld [vmem:[#allocation8] ss:$0 sm:$0xff]  ;;  %v10362_v21 = vld [vmem:[#allocation11] ss:$0 sm:$0xff]  ;;  %v669_v33 = vld [vmem:[#allocation16 + $0x198] sm:$0xff] }
 0x102   :  { %10550 = vmatpush3.msra.mxu0 %v334_v2  ;;  %10557 = vmatpush3.msra.mxu1 %v420_v5  ;;  %v667_v32 = vld [vmem:[#allocation16 + $0x188] sm:$0xff]  ;;  %v666_v34 = vld [vmem:[#allocation16 + $0x180] sm:$0xff]  ;;  %v668_v35 = vld [vmem:[#allocation16 + $0x190] sm:$0xff] }
 0x103   :  { %10552 = vmatmul.mubr.msk.f32.vlgmr.msra.gmra.mxu0 %vm343_vm1, %v333_v3  ;;  %10565 = vmatprep.subr.mxu0 %v11249_v0  ;;  %v651_v36 = vld [vmem:[#allocation16 + $0x108] sm:$0xff]  ;;  %v653_v37 = vld [vmem:[#allocation16 + $0x118] sm:$0xff]  ;;  %v650_v38 = vld [vmem:[#allocation16 + $0x100] sm:$0xff] }
 0x104   :  { %10573 = vmatprep.mubr.msk.f32.mxu0 %vm11250_vm0, %v11249_v0  ;;  %10558 = vmatprep.subr.mxu1 %v11249_v0  ;;  %v10358_v10 = vld [vmem:[%s12048_s4] ss:$0 sm:$0xff]  ;;  %v635_v40 = vld [vmem:[#allocation16 + $0x88] sm:$0xff]  ;;  %v637_v41 = vld [vmem:[#allocation16 + $0x98] sm:$0xff] }
 0x105   :  { %10559 = vmatpush3.msra.mxu1 %v419_v6  ;;  %10566 = vmatpush3.msra.mxu0 %v506_v8  ;;  %v652_v39 = vld [vmem:[#allocation16 + $0x110] sm:$0xff]  ;;  %v634_v42 = vld [vmem:[#allocation16 + $0x80] sm:$0xff]  ;;  %v619_v44 = vld [vmem:[#allocation16 + $0x8] sm:$0xff] }
 0x106   :  { %10560 = vmatprep.subr.mxu1 %v11249_v0  ;;  %10567 = vmatprep.subr.mxu0 %v11249_v0  ;;  %v636_v43 = vld [vmem:[#allocation16 + $0x90] sm:$0xff]  ;;  %v621_v45 = vld [vmem:[#allocation16 + $0x18] sm:$0xff]  ;;  %v618_v46 = vld [vmem:[#allocation16] sm:$0xff] }
 0x107   :  { %10561 = vmatpush3.msra.mxu1 %v418_v7  ;;  %10568 = vmatpush3.msra.mxu0 %v505_v9  ;;  %v620_v47 = vld [vmem:[#allocation16 + $0x10] sm:$0xff]  ;;  %v671_v48 = vld [vmem:[#allocation16 + $0x1a8] sm:$0xff]  ;;  %v673_v49 = vld [vmem:[#allocation16 + $0x1b8] sm:$0xff] }
 0x108   :  { %10569 = vmatprep.subr.mxu0 %v11249_v0  ;;  %793 = vmatprep.subr.mxu1 %v667_v32  ;;  %v10364_v54 = vld [vmem:[#allocation13] ss:$0 sm:$0xff]  ;;  %v10365_v56 = vld [vmem:[#allocation14] ss:$0 sm:$0xff]  ;;  %v670_v59 = vld [vmem:[#allocation16 + $0x1a0] sm:$0xff] }
 0x109   :  { %10570 = vmatpush3.msra.mxu0 %v504_v15  ;;  %v672_v60 = vld [vmem:[#allocation16 + $0x1b0] sm:$0xff]  ;;  %v655_v61 = vld [vmem:[#allocation16 + $0x128] sm:$0xff]  ;;  %v657_v62 = vld [vmem:[#allocation16 + $0x138] sm:$0xff] }
 0x10a   :  { %10571 = vmatprep.subr.mxu0 %v11249_v0  ;;  %v654_v63 = vld [vmem:[#allocation16 + $0x120] sm:$0xff]  ;;  %v656_v1 = vld [vmem:[#allocation16 + $0x130] sm:$0xff]  ;;  %v639_v2 = vld [vmem:[#allocation16 + $0xa8] sm:$0xff] }
 0x10b   :  { %10572 = vmatpush3.msra.mxu0 %v503_v16  ;;  %v641_v3 = vld [vmem:[#allocation16 + $0xb8] sm:$0xff]  ;;  %v638_v4 = vld [vmem:[#allocation16 + $0xa0] sm:$0xff]  ;;  %v640_v5 = vld [vmem:[#allocation16 + $0xb0] sm:$0xff] }
 0x10c   :  { %864 = vmatprep.subr.mxu0 %v669_v33  ;;  %v623_v6 = vld [vmem:[#allocation16 + $0x28] sm:$0xff]  ;;  %v625_v7 = vld [vmem:[#allocation16 + $0x38] sm:$0xff]  ;;  %v622_v8 = vld [vmem:[#allocation16 + $0x20] sm:$0xff] }
 0x10d   :  { %v624_v9 = vld [vmem:[#allocation16 + $0x30] sm:$0xff]  ;;  %v661_v15 = vld [vmem:[#allocation16 + $0x158] sm:$0xff]  ;;  %v658_v16 = vld [vmem:[#allocation16 + $0x140] sm:$0xff] }
 0x10e   :  { %v662_v32 = vld [vmem:[#allocation16 + $0x160] sm:$0xff]  ;;  %v664_v33 = vld [vmem:[#allocation16 + $0x170] sm:$0xff] }
 0x1c3   :  { %v413_v11 = vpop.f32.mrf.mxu0 }
 0x1c4   :  { %v414_v12 = vadd.f32 %v10358_v10, %v413_v11  ;;  %v675_v10 = vld [vmem:[#allocation16 + $0x1c8] sm:$0xff]  ;;  %v677_v11 = vld [vmem:[#allocation16 + $0x1d8] sm:$0xff] }
 0x1c5   :  { %v10553_v13 = vpop.f32.mrf.mxu0 }
 0x1c6   :  { %v417_v14 = vmax.f32 %v414_v12, 0.0  ;;  %v674_v12 = vld [vmem:[#allocation16 + $0x1c0] sm:$0xff]  ;;  %v676_v13 = vld [vmem:[#allocation16 + $0x1d0] sm:$0xff] }
 0x1c8   :  { %10563 = vmatmul.mubr.msk.f32.vlgmr.msra.gmra.mxu1 %vm429_vm2, %v417_v14 }
 0x1c9   :  { %833 = vmatprep.mubr.f32.mxu1 %v11249_v0  ;;  %794 = vmatpush1.msra.mxu1 %v666_v34  ;;  %v647_v34 = vld [vmem:[#allocation16 + $0xe8] sm:$0xff] }
 0x1ca   :  { %795 = vmatprep.subr.mxu1 %v651_v36  ;;  %v646_v36 = vld [vmem:[#allocation16 + $0xe0] sm:$0xff] }
 0x1cb   :  { %796 = vmatpush1.msra.mxu1 %v650_v38  ;;  %v631_v38 = vld [vmem:[#allocation16 + $0x68] sm:$0xff] }
 0x1cc   :  { %797 = vmatprep.subr.mxu1 %v635_v40  ;;  %v630_v40 = vld [vmem:[#allocation16 + $0x60] sm:$0xff] }
 0x1cd   :  { %798 = vmatpush1.msra.mxu1 %v634_v42  ;;  %v1402_v42 = vld [vmem:[#allocation19 + $0x188] sm:$0xff] }
 0x1ce   :  { %799 = vmatprep.subr.mxu1 %v619_v44  ;;  %v1401_v44 = vld [vmem:[#allocation19 + $0x180] sm:$0xff] }
 0x1cf   :  { %800 = vmatpush1.msra.mxu1 %v618_v46  ;;  %v1386_v46 = vld [vmem:[#allocation19 + $0x108] sm:$0xff] }
 0x1d0   :  { %935 = vmatprep.subr.mxu1 %v671_v48  ;;  %v1385_v48 = vld [vmem:[#allocation19 + $0x100] sm:$0xff] }
 0x288   :  { %v499_v18 = vpop.f32.mrf.mxu1 }
 0x289   :  { %v500_v19 = vadd.f32 %v10360_v17, %v499_v18  ;;  %v660_v17 = vld [vmem:[#allocation16 + $0x150] sm:$0xff]  ;;  %v643_v18 = vld [vmem:[#allocation16 + $0xc8] sm:$0xff] }
 0x28a   :  { %v10564_v20 = vpop.f32.mrf.mxu1 }
 0x28b   :  { %10574 = vmatmul.mubr.msk.f32.vlgmr.msra.gmra.mxu0 %vm429_vm2, %v500_v19  ;;  %v645_v19 = vld [vmem:[#allocation16 + $0xd8] sm:$0xff]  ;;  %v642_v20 = vld [vmem:[#allocation16 + $0xc0] sm:$0xff] }
 0x28c   :  { %904 = vmatprep.mubr.f32.mxu0 %v11249_v0  ;;  %865 = vmatpush1.msra.mxu0 %v668_v35  ;;  %v649_v35 = vld [vmem:[#allocation16 + $0xf8] sm:$0xff] }
 0x28d   :  { %866 = vmatprep.subr.mxu0 %v653_v37  ;;  %v648_v37 = vld [vmem:[#allocation16 + $0xf0] sm:$0xff] }
 0x28e   :  { %867 = vmatpush1.msra.mxu0 %v652_v39  ;;  %v633_v39 = vld [vmem:[#allocation16 + $0x78] sm:$0xff] }
 0x28f   :  { %868 = vmatprep.subr.mxu0 %v637_v41  ;;  %v632_v41 = vld [vmem:[#allocation16 + $0x70] sm:$0xff] }
 0x290   :  { %869 = vmatpush1.msra.mxu0 %v636_v43  ;;  %v1404_v43 = vld [vmem:[#allocation19 + $0x198] sm:$0xff] }
 0x291   :  { %870 = vmatprep.subr.mxu0 %v621_v45  ;;  %v1403_v45 = vld [vmem:[#allocation19 + $0x190] sm:$0xff] }
 0x292   :  { %871 = vmatpush1.msra.mxu0 %v620_v47  ;;  %v1388_v47 = vld [vmem:[#allocation19 + $0x118] sm:$0xff] }
 0x293   :  { %1006 = vmatprep.subr.mxu0 %v673_v49  ;;  %v1387_v49 = vld [vmem:[#allocation19 + $0x110] sm:$0xff] }
 0x34b   :  { %v583_v22 = vpop.f32.mrf.mxu0 }
 0x34c   :  { %v584_v23 = vadd.f32 %v10362_v21, %v583_v22  ;;  %v644_v21 = vld [vmem:[#allocation16 + $0xd0] sm:$0xff]  ;;  %v627_v22 = vld [vmem:[#allocation16 + $0x48] sm:$0xff] }
 0x34d   :  { %v10575_v24 = vpop.f32.mrf.mxu0 }
 0x34e   :  { %v587_v25 = vadd.f32 %v584_v23, %v417_v14  ;;  %v659_v14 = vld [vmem:[#allocation16 + $0x148] sm:$0xff]  ;;  %v629_v23 = vld [vmem:[#allocation16 + $0x58] sm:$0xff]  ;;  %v626_v24 = vld [vmem:[#allocation16 + $0x40] sm:$0xff] }
 0x350   :  { %v590_v26 = vsel %vm429_vm2, %v587_v25, 0.0 }
 0x351   :  { %591 = vadd.xlane.f32.xlu0 %v590_v26  ;;  %v679_v26 = vld [vmem:[#allocation16 + $0x1e8] sm:$0xff] }
 0x3da   :  { %v592_v27 = vpop.xlane.xlu0 %591 }
 0x3db   :  { %v594_v28 = vmul.f32 0.03125, %v592_v27  ;;  %v681_v27 = vld [vmem:[#allocation16 + $0x1f8] sm:$0xff] }
 0x3dd   :  { %v595_v29 = vsub.f32 %v587_v25, %v594_v28  ;;  %v628_v25 = vld [vmem:[#allocation16 + $0x50] sm:$0xff]  ;;  %v678_v28 = vld [vmem:[#allocation16 + $0x1e0] sm:$0xff] }
 0x3df   :  { %v596_v30 = vmul.f32 %v595_v29, %v595_v29 }
 0x3e1   :  { %v597_v31 = vsel %vm429_vm2, %v596_v30, 0.0  ;;  %v663_v30 = vld [vmem:[#allocation16 + $0x168] sm:$0xff] }
 0x3e2   :  { %598 = vadd.xlane.f32.xlu0 %v597_v31  ;;  %v665_v31 = vld [vmem:[#allocation16 + $0x178] sm:$0xff] }
 0x46b   :  { %v599_v50 = vpop.xlane.xlu0 %598 }
 0x46c   :  { %v600_v51 = vmul.f32 0.03125, %v599_v50  ;;  %v1370_v50 = vld [vmem:[#allocation19 + $0x88] sm:$0xff] }
 0x46e   :  { %v601_v52 = vadd.f32 1e-05, %v600_v51  ;;  %v1372_v51 = vld [vmem:[#allocation19 + $0x98] sm:$0xff] }
 0x470   :  { %10749 = vrsqrt.f32 %v601_v52  ;;  %v1369_v52 = vld [vmem:[#allocation19 + $0x80] sm:$0xff] }
 0x47d   :  { %v10750_v53 = vpop.eup %10749 }
 0x47e   :  { %v603_v55 = vmul.f32 %v10750_v53, %v595_v29  ;;  %v680_v29 = vld [vmem:[#allocation16 + $0x1f0] sm:$0xff] }
 0x47f   :  { %v1371_v53 = vld [vmem:[#allocation19 + $0x90] sm:$0xff] }
 0x480   :  { %v610_v57 = vmul.f32 %v10364_v54, %v603_v55  ;;  %v1354_v54 = vld [vmem:[#allocation19 + $0x8] sm:$0xff]  ;;  %v1356_v55 = vld [vmem:[#allocation19 + $0x18] sm:$0xff] }
 0x482   :  { %v11492_v58 = vadd.f32 %v10365_v56, %v610_v57  ;;  %v1353_v56 = vld [vmem:[#allocation19] sm:$0xff]  ;;  %v1355_v57 = vld [vmem:[#allocation19 + $0x10] sm:$0xff] }
 0x484   :  { %10366 = vmatmul.mubr.msk.f32.vlgmr.msra.gmra.mxu1 %vm429_vm2, %v11492_v58  ;;  %10367 = vmatmul.mubr.msk.f32.vlgmr.msra.gmra.mxu0 %vm429_vm2, %v11492_v58 }
 0x485   :  { %936 = vmatpush1.msra.mxu1 %v670_v59  ;;  %1007 = vmatpush1.msra.mxu0 %v672_v60  ;;  %v1406_v59 = vld [vmem:[#allocation19 + $0x1a8] sm:$0xff]  ;;  %v1408_v60 = vld [vmem:[#allocation19 + $0x1b8] sm:$0xff] }
 0x486   :  { %937 = vmatprep.subr.mxu1 %v655_v61  ;;  %1008 = vmatprep.subr.mxu0 %v657_v62  ;;  %v686_v61 = vlaneseq }
 0x487   :  { %938 = vmatpush1.msra.mxu1 %v654_v63  ;;  %1009 = vmatpush1.msra.mxu0 %v656_v1 }
 0x488   :  { %939 = vmatprep.subr.mxu1 %v639_v2  ;;  %1010 = vmatprep.subr.mxu0 %v641_v3  ;;  %v11516_v62 = vshrl.u32 %v686_v61, 7  ;;  %v11524_v2 = vld [vmem:[#allocation17] sm:$0xff] }
 0x489   :  { %940 = vmatpush1.msra.mxu1 %v638_v4  ;;  %1011 = vmatpush1.msra.mxu0 %v640_v5 }
 0x48a   :  { %941 = vmatprep.subr.mxu1 %v623_v6  ;;  %1012 = vmatprep.subr.mxu0 %v625_v7  ;;  %v11519_v63 = vsub.s32 0, %v11516_v62  ;;  %v11522_v1 = vsub.s32 2, %v11516_v62  ;;  %v11527_v3 = vsub.s32 1, %v11516_v62  ;;  %v11530_v4 = vsub.s32 3, %v11516_v62 }
 0x48b   :  { %942 = vmatpush1.msra.mxu1 %v622_v8  ;;  %975 = vmatprep.mubr.f32.mxu1 %v11249_v0  ;;  %vm10321_vm4 = vcmp.eq.s32.totalorder %v11516_v62, 0 }
 0x48c   :  { %1013 = vmatpush1.msra.mxu0 %v624_v9  ;;  %1046 = vmatprep.mubr.f32.mxu0 %v11249_v0  ;;  %v689_v5 = vrot.slane %v11524_v2, %v11519_v63  ;;  %v697_v6 = vrot.slane %v11524_v2, %v11522_v1  ;;  %v693_v7 = vrot.slane %v11524_v2, %v11527_v3 }
 0x48d   :  { %10368 = vmatmul.mubr.msk.f32.vlgmr.msra.gmra.mxu1 %vm429_vm2, %v11492_v58  ;;  %10369 = vmatmul.mubr.msk.f32.vlgmr.msra.gmra.mxu0 %vm429_vm2, %v11492_v58  ;;  %v701_v8 = vrot.slane %v11524_v2, %v11530_v4 }
 0x48e   :  { %1077 = vmatprep.subr.mxu1 %v675_v10  ;;  %1148 = vmatprep.subr.mxu0 %v677_v11 }
 0x48f   :  { %1078 = vmatpush1.msra.mxu1 %v674_v12  ;;  %1149 = vmatpush1.msra.mxu0 %v676_v13 }
 0x490   :  { %1079 = vmatprep.subr.mxu1 %v659_v14  ;;  %1150 = vmatprep.subr.mxu0 %v661_v15 }
 0x491   :  { %1080 = vmatpush1.msra.mxu1 %v658_v16  ;;  %1151 = vmatpush1.msra.mxu0 %v660_v17  ;;  %v11541_v17 = vsub.s32 5, %v11516_v62 }
 0x492   :  { %1081 = vmatprep.subr.mxu1 %v643_v18  ;;  %1152 = vmatprep.subr.mxu0 %v645_v19  ;;  %v11544_v18 = vsub.s32 7, %v11516_v62 }
 0x493   :  { %1082 = vmatpush1.msra.mxu1 %v642_v20  ;;  %1153 = vmatpush1.msra.mxu0 %v644_v21 }
 0x494   :  { %1083 = vmatprep.subr.mxu1 %v627_v22  ;;  %1154 = vmatprep.subr.mxu0 %v629_v23  ;;  %v1405_v23 = vld [vmem:[#allocation19 + $0x1a0] sm:$0xff] }
 0x495   :  { %1084 = vmatpush1.msra.mxu1 %v626_v24  ;;  %1117 = vmatprep.mubr.f32.mxu1 %v11249_v0  ;;  %v1407_v24 = vld [vmem:[#allocation19 + $0x1b0] sm:$0xff] }
 0x496   :  { %1155 = vmatpush1.msra.mxu0 %v628_v25  ;;  %1188 = vmatprep.mubr.f32.mxu0 %v11249_v0  ;;  %v1390_v25 = vld [vmem:[#allocation19 + $0x128] sm:$0xff] }
 0x497   :  { %10370 = vmatmul.mubr.msk.f32.vlgmr.msra.gmra.mxu1 %vm429_vm2, %v11492_v58  ;;  %10371 = vmatmul.mubr.msk.f32.vlgmr.msra.gmra.mxu0 %vm429_vm2, %v11492_v58 }
 0x498   :  { %1219 = vmatprep.subr.mxu1 %v679_v26  ;;  %1290 = vmatprep.subr.mxu0 %v681_v27  ;;  %v1392_v26 = vld [vmem:[#allocation19 + $0x138] sm:$0xff]  ;;  %v709_v27 = vrot.slane %v11524_v2, %v11541_v17 }
 0x499   :  { %1220 = vmatpush1.msra.mxu1 %v678_v28  ;;  %1291 = vmatpush1.msra.mxu0 %v680_v29  ;;  %v717_v28 = vrot.slane %v11524_v2, %v11544_v18 }
 0x49a   :  { %1221 = vmatprep.subr.mxu1 %v663_v30  ;;  %1292 = vmatprep.subr.mxu0 %v665_v31  ;;  %v11551_v31 = vsub.s32 4, %v11516_v62 }
 0x49b   :  { %1222 = vmatpush1.msra.mxu1 %v662_v32  ;;  %1293 = vmatpush1.msra.mxu0 %v664_v33  ;;  %v11554_v32 = vsub.s32 6, %v11516_v62  ;;  %v1389_v33 = vld [vmem:[#allocation19 + $0x120] sm:$0xff] }
 0x49c   :  { %1223 = vmatprep.subr.mxu1 %v647_v34  ;;  %1294 = vmatprep.subr.mxu0 %v649_v35  ;;  %v1391_v34 = vld [vmem:[#allocation19 + $0x130] sm:$0xff] }
 0x49d   :  { %1224 = vmatpush1.msra.mxu1 %v646_v36  ;;  %1295 = vmatpush1.msra.mxu0 %v648_v37  ;;  %v1374_v37 = vld [vmem:[#allocation19 + $0xa8] sm:$0xff] }
 0x49e   :  { %1225 = vmatprep.subr.mxu1 %v631_v38  ;;  %1296 = vmatprep.subr.mxu0 %v633_v39  ;;  %v1376_v38 = vld [vmem:[#allocation19 + $0xb8] sm:$0xff] }
 0x49f   :  { %1226 = vmatpush1.msra.mxu1 %v630_v40  ;;  %1259 = vmatprep.mubr.f32.mxu1 %v11249_v0 }
 0x4a0   :  { %1297 = vmatpush1.msra.mxu0 %v632_v41  ;;  %1330 = vmatprep.mubr.f32.mxu0 %v11249_v0  ;;  %v705_v41 = vrot.slane %v11524_v2, %v11551_v31 }
 0x4a1   :  { %10372 = vmatmul.mubr.msk.f32.vlgmr.msra.gmra.mxu1 %vm429_vm2, %v11492_v58  ;;  %10373 = vmatmul.mubr.msk.f32.vlgmr.msra.gmra.mxu0 %vm429_vm2, %v11492_v58 }
 0x4a2   :  { %1448 = vmatprep.subr.mxu1 %v1402_v42  ;;  %1518 = vmatprep.subr.mxu0 %v1404_v43  ;;  %v713_v42 = vrot.slane %v11524_v2, %v11554_v32 }
 0x4a3   :  { %1449 = vmatpush1.xpose.msra.mxu1 %v1401_v44  ;;  %1519 = vmatpush1.xpose.msra.mxu0 %v1403_v45  ;;  %v1373_v45 = vld [vmem:[#allocation19 + $0xa0] sm:$0xff] }
 0x4a4   :  { %1450 = vmatprep.subr.mxu1 %v1386_v46  ;;  %1520 = vmatprep.subr.mxu0 %v1388_v47  ;;  %v1375_v46 = vld [vmem:[#allocation19 + $0xb0] sm:$0xff]  ;;  %v1358_v47 = vld [vmem:[#allocation19 + $0x28] sm:$0xff] }
 0x4a7   :  { %1451 = vmatpush1.xpose.msra.mxu1 %v1385_v48  ;;  %1521 = vmatpush1.xpose.msra.mxu0 %v1387_v49  ;;  %v1360_v48 = vld [vmem:[#allocation19 + $0x38] sm:$0xff]  ;;  %v11560_v49 = vld [vmem:[#allocation17 + $0x8] sm:$0xff] }
 0x4a8   :  { %1452 = vmatprep.subr.mxu1 %v1370_v50  ;;  %1522 = vmatprep.subr.mxu0 %v1372_v51  ;;  %v725_v50 = vrot.slane %v11560_v49, %v11527_v3 }
 0x4ab   :  { %1453 = vmatpush1.xpose.msra.mxu1 %v1369_v52  ;;  %1523 = vmatpush1.xpose.msra.mxu0 %v1371_v53  ;;  %v733_v53 = vrot.slane %v11560_v49, %v11530_v4 }
 0x4ac   :  { %1454 = vmatprep.subr.mxu1 %v1354_v54  ;;  %1524 = vmatprep.subr.mxu0 %v1356_v55  ;;  %v1357_v54 = vld [vmem:[#allocation19 + $0x20] sm:$0xff]  ;;  %v1359_v55 = vld [vmem:[#allocation19 + $0x30] sm:$0xff] }
 0x4af   :  { %1455 = vmatpush1.xpose.msra.mxu1 %v1353_v56  ;;  %1525 = vmatpush1.xpose.msra.mxu0 %v1355_v57 }
 0x4b0   :  { %1588 = vmatprep.subr.mxu1 %v1406_v59  ;;  %1658 = vmatprep.subr.mxu0 %v1408_v60  ;;  %v1410_v59 = vld [vmem:[#allocation19 + $0x1c8] sm:$0xff]  ;;  %v1412_v60 = vld [vmem:[#allocation19 + $0x1d8] sm:$0xff] }
 0x544   :  { %v835_v9 = vpop.f32.mrf.mxu1  ;;  %v906_v10 = vpop.f32.mrf.mxu0 }
 0x545   :  { %v836_v11 = vadd.f32 %v835_v9, %v689_v5  ;;  %v907_v12 = vadd.f32 %v906_v10, %v697_v6  ;;  %v1409_v9 = vld [vmem:[#allocation19 + $0x1c0] sm:$0xff]  ;;  %v1411_v10 = vld [vmem:[#allocation19 + $0x1d0] sm:$0xff] }
 0x546   :  { %v837_v13 = vpop.f32.mrf.mxu1  ;;  %v908_v14 = vpop.f32.mrf.mxu0 }
 0x547   :  { %v838_v15 = vadd.f32 %v837_v13, %v693_v7  ;;  %v909_v16 = vadd.f32 %v908_v14, %v701_v8  ;;  %v1337_v21 = vmax.f32 %v836_v11, 0.0  ;;  %v1339_v22 = vmax.f32 %v907_v12, 0.0  ;;  %v1394_v13 = vld [vmem:[#allocation19 + $0x148] sm:$0xff]  ;;  %v1396_v14 = vld [vmem:[#allocation19 + $0x158] sm:$0xff] }
 0x549   :  { %v1338_v19 = vmax.f32 %v838_v15, 0.0  ;;  %v1340_v20 = vmax.f32 %v909_v16, 0.0  ;;  %v1393_v15 = vld [vmem:[#allocation19 + $0x140] sm:$0xff]  ;;  %v1395_v16 = vld [vmem:[#allocation19 + $0x150] sm:$0xff] }
 0x54b   :  { %1488 = vmatprep.mubr.f32.mxu1 %v1338_v19  ;;  %1558 = vmatprep.mubr.f32.mxu0 %v1340_v20  ;;  %v1378_v19 = vld [vmem:[#allocation19 + $0xc8] sm:$0xff]  ;;  %v1380_v20 = vld [vmem:[#allocation19 + $0xd8] sm:$0xff] }
 0x54c   :  { %1489 = vmatmul.mubr.f32.vlgmr.msra.gmra.mxu1 %v1337_v21  ;;  %1559 = vmatmul.mubr.f32.vlgmr.msra.gmra.mxu0 %v1339_v22 }
 0x54d   :  { %v977_v29 = vpop.f32.mrf.mxu1  ;;  %v1048_v30 = vpop.f32.mrf.mxu0  ;;  %1589 = vmatpush1.xpose.msra.mxu1 %v1405_v23  ;;  %1659 = vmatpush1.xpose.msra.mxu0 %v1407_v24  ;;  %v721_v23 = vrot.slane %v11560_v49, %v11519_v63  ;;  %v729_v24 = vrot.slane %v11560_v49, %v11522_v1 }
 0x54e   :  { %1590 = vmatprep.subr.mxu1 %v1390_v25  ;;  %1660 = vmatprep.subr.mxu0 %v1392_v26  ;;  %v978_v51 = vadd.f32 %v977_v29, %v705_v41  ;;  %v1049_v52 = vadd.f32 %v1048_v30, %v713_v42  ;;  %v1377_v25 = vld [vmem:[#allocation19 + $0xc0] sm:$0xff]  ;;  %v1379_v26 = vld [vmem:[#allocation19 + $0xd0] sm:$0xff]  ;;  %v1364_v29 = vld [vmem:[#allocation19 + $0x58] sm:$0xff] }
 0x54f   :  { %v979_v35 = vpop.f32.mrf.mxu1  ;;  %v1050_v36 = vpop.f32.mrf.mxu0  ;;  %v1416_v41 = vld [vmem:[#allocation19 + $0x1f8] sm:$0xff] }
 0x550   :  { %v980_v39 = vadd.f32 %v979_v35, %v709_v27  ;;  %v1051_v40 = vadd.f32 %v1050_v36, %v717_v28  ;;  %v1341_v5 = vmax.f32 %v978_v51, 0.0  ;;  %v1343_v6 = vmax.f32 %v1049_v52, 0.0  ;;  %v1362_v28 = vld [vmem:[#allocation19 + $0x48] sm:$0xff]  ;;  %v1400_v51 = vld [vmem:[#allocation19 + $0x178] sm:$0xff]  ;;  %v1397_v52 = vld [vmem:[#allocation19 + $0x160] sm:$0xff] }
 0x551   :  { %1591 = vmatpush1.xpose.msra.mxu1 %v1389_v33  ;;  %1661 = vmatpush1.xpose.msra.mxu0 %v1391_v34  ;;  %v741_v27 = vrot.slane %v11560_v49, %v11541_v17  ;;  %v749_v33 = vrot.slane %v11560_v49, %v11544_v18 }
 0x552   :  { %v1342_v43 = vmax.f32 %v980_v39, 0.0  ;;  %v1344_v44 = vmax.f32 %v1051_v40, 0.0  ;;  %1592 = vmatprep.subr.mxu1 %v1374_v37  ;;  %1662 = vmatprep.subr.mxu0 %v1376_v38  ;;  %v1361_v37 = vld [vmem:[#allocation19 + $0x40] sm:$0xff]  ;;  %v1363_v38 = vld [vmem:[#allocation19 + $0x50] sm:$0xff]  ;;  %v1414_v40 = vld [vmem:[#allocation19 + $0x1e8] sm:$0xff] }
 0x554   :  { %1628 = vmatprep.mubr.f32.mxu1 %v1342_v43  ;;  %1698 = vmatprep.mubr.f32.mxu0 %v1344_v44 }
 0x555   :  { %1593 = vmatpush1.xpose.msra.mxu1 %v1373_v45  ;;  %1663 = vmatpush1.xpose.msra.mxu0 %v1375_v46  ;;  %v1413_v45 = vld [vmem:[#allocation19 + $0x1e0] sm:$0xff] }
 0x556   :  { %1594 = vmatprep.subr.mxu1 %v1358_v47  ;;  %1664 = vmatprep.subr.mxu0 %v1360_v48  ;;  %v1415_v47 = vld [vmem:[#allocation19 + $0x1f0] sm:$0xff] }
 0x557   :  { %v1119_v56 = vpop.f32.mrf.mxu1  ;;  %v1190_v57 = vpop.f32.mrf.mxu0 }
 0x558   :  { %v1120_v35 = vadd.f32 %v1119_v56, %v721_v23  ;;  %v1191_v36 = vadd.f32 %v1190_v57, %v729_v24  ;;  %v737_v56 = vrot.slane %v11560_v49, %v11551_v31  ;;  %v1381_v57 = vld [vmem:[#allocation19 + $0xe0] sm:$0xff] }
 0x559   :  { %v1121_v61 = vpop.f32.mrf.mxu1  ;;  %v1192_v2 = vpop.f32.mrf.mxu0  ;;  %1595 = vmatpush1.xpose.msra.mxu1 %v1357_v54  ;;  %1665 = vmatpush1.xpose.msra.mxu0 %v1359_v55  ;;  %v1382_v54 = vld [vmem:[#allocation19 + $0xe8] sm:$0xff]  ;;  %v1384_v55 = vld [vmem:[#allocation19 + $0xf8] sm:$0xff] }
 0x55a   :  { %v1122_v7 = vadd.f32 %v1121_v61, %v725_v50  ;;  %v1193_v8 = vadd.f32 %v1192_v2, %v733_v53  ;;  %1728 = vmatprep.subr.mxu1 %v1410_v59  ;;  %1798 = vmatprep.subr.mxu0 %v1412_v60  ;;  %v1345_v43 = vmax.f32 %v1120_v35, 0.0  ;;  %v1347_v44 = vmax.f32 %v1191_v36, 0.0  ;;  %v1398_v50 = vld [vmem:[#allocation19 + $0x168] sm:$0xff]  ;;  %v1399_v53 = vld [vmem:[#allocation19 + $0x170] sm:$0xff]  ;;  %v1368_v2 = vld [vmem:[#allocation19 + $0x78] sm:$0xff] }
 0x55b   :  { %v745_v59 = vrot.slane %v11560_v49, %v11554_v32  ;;  %v1383_v60 = vld [vmem:[#allocation19 + $0xf0] sm:$0xff]  ;;  %v1366_v61 = vld [vmem:[#allocation19 + $0x68] sm:$0xff] }
 0x55c   :  { %v1346_v11 = vmax.f32 %v1122_v7, 0.0  ;;  %v1348_v12 = vmax.f32 %v1193_v8, 0.0  ;;  %1629 = vmatmul.mubr.f32.vlgmr.msra.gmra.mxu1 %v1341_v5  ;;  %1699 = vmatmul.mubr.f32.vlgmr.msra.gmra.mxu0 %v1343_v6  ;;  %v1365_v6 = vld [vmem:[#allocation19 + $0x60] sm:$0xff]  ;;  %v1367_v8 = vld [vmem:[#allocation19 + $0x70] sm:$0xff] }
 0x55d   :  { %1729 = vmatpush1.xpose.msra.mxu1 %v1409_v9  ;;  %1799 = vmatpush1.xpose.msra.mxu0 %v1411_v10 }
 0x55e   :  { %1768 = vmatprep.mubr.f32.mxu1 %v1346_v11  ;;  %1838 = vmatprep.mubr.f32.mxu0 %v1348_v12 }
 0x55f   :  { %1730 = vmatprep.subr.mxu1 %v1394_v13  ;;  %1800 = vmatprep.subr.mxu0 %v1396_v14 }
 0x561   :  { %v11566_v21 = vpop.f32.mrf.mxu1  ;;  %v11568_v22 = vpop.f32.mrf.mxu0  ;;  %1731 = vmatpush1.xpose.msra.mxu1 %v1393_v15  ;;  %1801 = vmatpush1.xpose.msra.mxu0 %v1395_v16 }
 0x562   :  { %1732 = vmatprep.subr.mxu1 %v1378_v19  ;;  %1802 = vmatprep.subr.mxu0 %v1380_v20  ;;  %v1262_v5 = vadd.f32 %v11566_v21, %v737_v56  ;;  %v1333_v7 = vadd.f32 %v11568_v22, %v745_v59  ;;  %v10374_v20 = vld [vmem:[#allocation20] ss:$0 sm:$0xff]  ;;  %v10375_v56 = vld [vmem:[#allocation22] ss:$0 sm:$0xff]  ;;  %v10376_v59 = vld [vmem:[#allocation23] ss:$0 sm:$0xff] }
 0x563   :  { %v1263_v30 = vpop.f32.mrf.mxu1  ;;  %v1334_v34 = vpop.f32.mrf.mxu0 }
 0x564   :  { %v1264_v39 = vadd.f32 %v1263_v30, %v741_v27  ;;  %v1335_v42 = vadd.f32 %v1334_v34, %v749_v33  ;;  %v1349_v9 = vmax.f32 %v1262_v5, 0.0  ;;  %v1351_v49 = vmax.f32 %v1333_v7, 0.0  ;;  %v2101_v5 = vld [vmem:[#allocation10 + $0x20] sm:$0xff] }
 0x565   :  { %1733 = vmatpush1.xpose.msra.mxu1 %v1377_v25  ;;  %1803 = vmatpush1.xpose.msra.mxu0 %v1379_v26 }
 0x566   :  { %1734 = vmatprep.subr.mxu1 %v1362_v28  ;;  %1804 = vmatprep.subr.mxu0 %v1364_v29  ;;  %v1350_v46 = vmax.f32 %v1264_v39, 0.0  ;;  %v1352_v48 = vmax.f32 %v1335_v42, 0.0 }
 0x569   :  { %1735 = vmatpush1.xpose.msra.mxu1 %v1361_v37  ;;  %1805 = vmatpush1.xpose.msra.mxu0 %v1363_v38 }
 0x56a   :  { %1868 = vmatprep.subr.mxu1 %v1414_v40  ;;  %1938 = vmatprep.subr.mxu0 %v1416_v41 }
 0x56c   :  { %1769 = vmatmul.mubr.f32.vlgmr.msra.gmra.mxu1 %v1345_v43  ;;  %1839 = vmatmul.mubr.f32.vlgmr.msra.gmra.mxu0 %v1347_v44 }
 0x56d   :  { %1869 = vmatpush1.xpose.msra.mxu1 %v1413_v45  ;;  %1908 = vmatprep.mubr.f32.mxu1 %v1350_v46  ;;  %v2018_v46 = vld [vmem:[#allocation7 + $0x38] sm:$0xff] }
 0x56e   :  { %1939 = vmatpush1.xpose.msra.mxu0 %v1415_v47  ;;  %1978 = vmatprep.mubr.f32.mxu0 %v1352_v48  ;;  %v2017_v47 = vld [vmem:[#allocation7 + $0x30] sm:$0xff]  ;;  %v2016_v48 = vld [vmem:[#allocation7 + $0x28] sm:$0xff] }
 0x56f   :  { %1870 = vmatprep.subr.mxu1 %v1398_v50  ;;  %1940 = vmatprep.subr.mxu0 %v1400_v51  ;;  %v2104_v50 = vld [vmem:[#allocation10 + $0x38] sm:$0xff]  ;;  %v2103_v51 = vld [vmem:[#allocation10 + $0x30] sm:$0xff] }
 0x571   :  { %1871 = vmatpush1.xpose.msra.mxu1 %v1397_v52 }
 0x572   :  { %1941 = vmatpush1.xpose.msra.mxu0 %v1399_v53  ;;  %1872 = vmatprep.subr.mxu1 %v1382_v54 }
 0x573   :  { %1942 = vmatprep.subr.mxu0 %v1384_v55 }
 0x575   :  { %1873 = vmatpush1.xpose.msra.mxu1 %v1381_v57 }
 0x576   :  { %1943 = vmatpush1.xpose.msra.mxu0 %v1383_v60  ;;  %1874 = vmatprep.subr.mxu1 %v1366_v61 }
 0x577   :  { %1944 = vmatprep.subr.mxu0 %v1368_v2  ;;  %v2102_v2 = vld [vmem:[#allocation10 + $0x28] sm:$0xff] }
 0x579   :  { %1875 = vmatpush1.xpose.msra.mxu1 %v1365_v6  ;;  %v10377_v6 = vld [vmem:[#allocation8 + $0x1] ss:$0 sm:$0xff] }
 0x57a   :  { %1945 = vmatpush1.xpose.msra.mxu0 %v1367_v8  ;;  %10576 = vmatprep.subr.mxu1 %v11249_v0 }
 0x57b   :  { %10587 = vmatprep.subr.mxu0 %v11249_v0 }
 0x57c   :  { %1909 = vmatmul.mubr.f32.vlgmr.msra.gmra.mxu1 %v1349_v9 }
 0x57d   :  { %1979 = vmatmul.mubr.f32.vlgmr.msra.gmra.mxu0 %v1351_v49  ;;  %10584 = vmatprep.mubr.msk.f32.mxu1 %vm11250_vm0, %v11249_v0  ;;  %v10379_v49 = vld [vmem:[#allocation11 + $0x1] ss:$0 sm:$0xff] }
 0x57e   :  { %10595 = vmatprep.mubr.msk.f32.mxu0 %vm11250_vm0, %v11249_v0  ;;  %10577 = vmatpush3.msra.mxu1 %v2018_v46  ;;  %v10381_v46 = vld [vmem:[#allocation13 + $0x1] ss:$0 sm:$0xff] }
 0x57f   :  { %10578 = vmatprep.subr.mxu1 %v11249_v0  ;;  %10588 = vmatpush3.msra.mxu0 %v2104_v50 }
 0x580   :  { %10579 = vmatpush3.msra.mxu1 %v2017_v47  ;;  %10589 = vmatprep.subr.mxu0 %v11249_v0 }
 0x581   :  { %10580 = vmatprep.subr.mxu1 %v11249_v0  ;;  %10590 = vmatpush3.msra.mxu0 %v2103_v51  ;;  %v2271_v51 = vld [vmem:[#allocation16 + $0x3a0] sm:$0xff] }
 0x582   :  { %10581 = vmatpush3.msra.mxu1 %v2016_v48  ;;  %10591 = vmatprep.subr.mxu0 %v11249_v0  ;;  %v10382_v48 = vld [vmem:[#allocation14 + $0x1] ss:$0 sm:$0xff] }
 0x583   :  { %10582 = vmatprep.subr.mxu1 %v11249_v0  ;;  %10592 = vmatpush3.msra.mxu0 %v2102_v2  ;;  %v2224_v2 = vld [vmem:[#allocation16 + $0x228] sm:$0xff] }
 0x584   :  { %10593 = vmatprep.subr.mxu0 %v11249_v0 }
 0x585   :  { %10594 = vmatpush3.msra.mxu0 %v2101_v5  ;;  %v2226_v5 = vld [vmem:[#allocation16 + $0x238] sm:$0xff] }
 0x60c   :  { %v1490_v10 = vpop.f32.mrf.mxu1  ;;  %v1560_v11 = vpop.f32.mrf.mxu0 }
 0x60d   :  { %v1491_v21 = vadd.f32 %v10374_v20, %v1490_v10 }
 0x60e   :  { %v1492_v12 = vpop.f32.mrf.mxu1  ;;  %v1562_v13 = vpop.f32.mrf.mxu0 }
 0x60f   :  { %v1561_v26 = vadd.f32 %v1560_v11, %v1491_v21 }
 0x61c   :  { %v1630_v14 = vpop.f32.mrf.mxu1  ;;  %v1700_v15 = vpop.f32.mrf.mxu0 }
 0x61d   :  { %v1631_v27 = vadd.f32 %v1630_v14, %v1561_v26  ;;  %v2252_v26 = vld [vmem:[#allocation16 + $0x308] sm:$0xff] }
 0x61e   :  { %v1632_v16 = vpop.f32.mrf.mxu1  ;;  %v1702_v19 = vpop.f32.mrf.mxu0 }
 0x61f   :  { %v1701_v28 = vadd.f32 %v1700_v15, %v1631_v27  ;;  %v2254_v27 = vld [vmem:[#allocation16 + $0x318] sm:$0xff] }
 0x62c   :  { %v1770_v22 = vpop.f32.mrf.mxu1  ;;  %v1840_v23 = vpop.f32.mrf.mxu0 }
 0x62d   :  { %v1771_v29 = vadd.f32 %v1770_v22, %v1701_v28  ;;  %v2268_v22 = vld [vmem:[#allocation16 + $0x388] sm:$0xff]  ;;  %v2251_v28 = vld [vmem:[#allocation16 + $0x300] sm:$0xff] }
 0x62e   :  { %v1772_v24 = vpop.f32.mrf.mxu1  ;;  %v1842_v25 = vpop.f32.mrf.mxu0 }
 0x62f   :  { %v1841_v30 = vadd.f32 %v1840_v23, %v1771_v29  ;;  %v2270_v23 = vld [vmem:[#allocation16 + $0x398] sm:$0xff]  ;;  %v2267_v24 = vld [vmem:[#allocation16 + $0x380] sm:$0xff]  ;;  %v2269_v25 = vld [vmem:[#allocation16 + $0x390] sm:$0xff] }
 0x630   :  { %2466 = vmatprep.subr.mxu0 %v2270_v23  ;;  %v2253_v29 = vld [vmem:[#allocation16 + $0x310] sm:$0xff]  ;;  %v2227_v23 = vld [vmem:[#allocation16 + $0x240] sm:$0xff] }
 0x63c   :  { %v1910_v33 = vpop.f32.mrf.mxu1 }
 0x63d   :  { %v1911_v34 = vadd.f32 %v1910_v33, %v1841_v30  ;;  %v1980_v35 = vpop.f32.mrf.mxu0  ;;  %v2236_v30 = vld [vmem:[#allocation16 + $0x288] sm:$0xff]  ;;  %v2238_v33 = vld [vmem:[#allocation16 + $0x298] sm:$0xff] }
 0x63e   :  { %v1912_v36 = vpop.f32.mrf.mxu1 }
 0x63f   :  { %v1981_v37 = vadd.f32 %v1980_v35, %v1911_v34  ;;  %v1982_v38 = vpop.f32.mrf.mxu0  ;;  %v2235_v34 = vld [vmem:[#allocation16 + $0x280] sm:$0xff]  ;;  %v2237_v35 = vld [vmem:[#allocation16 + $0x290] sm:$0xff]  ;;  %v2220_v36 = vld [vmem:[#allocation16 + $0x208] sm:$0xff] }
 0x640   :  { %v2219_v38 = vld [vmem:[#allocation16 + $0x200] sm:$0xff] }
 0x641   :  { %v1984_v39 = vadd.f32 %v1981_v37, %v11492_v58  ;;  %v2015_v58 = vld [vmem:[#allocation7 + $0x20] sm:$0xff]  ;;  %v2222_v37 = vld [vmem:[#allocation16 + $0x218] sm:$0xff] }
 0x642   :  { %10583 = vmatpush3.msra.mxu1 %v2015_v58 }
 0x643   :  { %v1987_v40 = vsel %vm429_vm2, %v1984_v39, 0.0  ;;  %2395 = vmatprep.subr.mxu1 %v2268_v22  ;;  %v2230_v22 = vld [vmem:[#allocation16 + $0x258] sm:$0xff] }
 0x644   :  { %1988 = vadd.xlane.f32.xlu1 %v1987_v40  ;;  %v2272_v40 = vld [vmem:[#allocation16 + $0x3a8] sm:$0xff] }
 0x6cd   :  { %v1989_v41 = vpop.xlane.xlu1 %1988 }
 0x6ce   :  { %v1990_v42 = vmul.f32 0.03125, %v1989_v41  ;;  %v2274_v41 = vld [vmem:[#allocation16 + $0x3b8] sm:$0xff] }
 0x6d0   :  { %v1991_v43 = vsub.f32 %v1984_v39, %v1990_v42  ;;  %v2221_v39 = vld [vmem:[#allocation16 + $0x210] sm:$0xff] }
 0x6d2   :  { %v1992_v44 = vmul.f32 %v1991_v43, %v1991_v43 }
 0x6d4   :  { %v1993_v45 = vsel %vm429_vm2, %v1992_v44, 0.0 }
 0x6d5   :  { %1994 = vadd.xlane.f32.xlu1 %v1993_v45 }
 0x75e   :  { %v1995_v52 = vpop.xlane.xlu1 %1994 }
 0x75f   :  { %v1996_v53 = vmul.f32 0.03125, %v1995_v52  ;;  %v2273_v52 = vld [vmem:[#allocation16 + $0x3b0] sm:$0xff] }
 0x761   :  { %v1997_v54 = vadd.f32 1e-05, %v1996_v53  ;;  %v2256_v53 = vld [vmem:[#allocation16 + $0x328] sm:$0xff] }
 0x763   :  { %10751 = vrsqrt.f32 %v1997_v54  ;;  %v2258_v54 = vld [vmem:[#allocation16 + $0x338] sm:$0xff] }
 0x770   :  { %v10752_v55 = vpop.eup %10751 }
 0x771   :  { %v1999_v57 = vmul.f32 %v10752_v55, %v1991_v43  ;;  %v2255_v55 = vld [vmem:[#allocation16 + $0x320] sm:$0xff] }
 0x773   :  { %v2006_v60 = vmul.f32 %v10375_v56, %v1999_v57  ;;  %v2257_v56 = vld [vmem:[#allocation16 + $0x330] sm:$0xff]  ;;  %v2240_v57 = vld [vmem:[#allocation16 + $0x2a8] sm:$0xff] }
 0x775   :  { %v2013_v61 = vadd.f32 %v10376_v59, %v2006_v60  ;;  %v2242_v59 = vld [vmem:[#allocation16 + $0x2b8] sm:$0xff]  ;;  %v2239_v60 = vld [vmem:[#allocation16 + $0x2a0] sm:$0xff] }
 0x777   :  { %10585 = vmatmul.mubr.msk.f32.vlgmr.msra.gmra.mxu1 %vm429_vm2, %v2013_v61 }
 0x778   :  { %2435 = vmatprep.mubr.f32.mxu1 %v11249_v0  ;;  %2396 = vmatpush1.msra.mxu1 %v2267_v24  ;;  %v2229_v24 = vld [vmem:[#allocation16 + $0x250] sm:$0xff] }
 0x779   :  { %2397 = vmatprep.subr.mxu1 %v2252_v26  ;;  %v2282_v26 = vld [vmem:[#allocation16 + $0x3f8] sm:$0xff] }
 0x77a   :  { %2398 = vmatpush1.msra.mxu1 %v2251_v28  ;;  %v2281_v28 = vld [vmem:[#allocation16 + $0x3f0] sm:$0xff] }
 0x77b   :  { %2399 = vmatprep.subr.mxu1 %v2236_v30  ;;  %v2266_v30 = vld [vmem:[#allocation16 + $0x378] sm:$0xff] }
 0x77c   :  { %2400 = vmatpush1.msra.mxu1 %v2235_v34  ;;  %v2265_v34 = vld [vmem:[#allocation16 + $0x370] sm:$0xff] }
 0x77d   :  { %2401 = vmatprep.subr.mxu1 %v2220_v36  ;;  %v2250_v36 = vld [vmem:[#allocation16 + $0x2f8] sm:$0xff] }
 0x77e   :  { %2402 = vmatpush1.msra.mxu1 %v2219_v38  ;;  %v2249_v38 = vld [vmem:[#allocation16 + $0x2f0] sm:$0xff] }
 0x77f   :  { %2537 = vmatprep.subr.mxu1 %v2272_v40  ;;  %v2234_v40 = vld [vmem:[#allocation16 + $0x278] sm:$0xff] }
 0x837   :  { %v2096_v7 = vpop.f32.mrf.mxu1 }
 0x838   :  { %v2097_v8 = vadd.f32 %v10377_v6, %v2096_v7  ;;  %v2223_v6 = vld [vmem:[#allocation16 + $0x220] sm:$0xff]  ;;  %v2225_v7 = vld [vmem:[#allocation16 + $0x230] sm:$0xff] }
 0x839   :  { %v10586_v9 = vpop.f32.mrf.mxu1 }
 0x83a   :  { %10596 = vmatmul.mubr.msk.f32.vlgmr.msra.gmra.mxu0 %vm429_vm2, %v2097_v8  ;;  %v2276_v8 = vld [vmem:[#allocation16 + $0x3c8] sm:$0xff]  ;;  %v2278_v9 = vld [vmem:[#allocation16 + $0x3d8] sm:$0xff] }
 0x83b   :  { %2506 = vmatprep.mubr.f32.mxu0 %v11249_v0  ;;  %2467 = vmatpush1.msra.mxu0 %v2269_v25  ;;  %v2280_v25 = vld [vmem:[#allocation16 + $0x3e8] sm:$0xff] }
 0x83c   :  { %2468 = vmatprep.subr.mxu0 %v2254_v27  ;;  %v2279_v27 = vld [vmem:[#allocation16 + $0x3e0] sm:$0xff] }
 0x83d   :  { %2469 = vmatpush1.msra.mxu0 %v2253_v29  ;;  %v2264_v29 = vld [vmem:[#allocation16 + $0x368] sm:$0xff] }
 0x83e   :  { %2470 = vmatprep.subr.mxu0 %v2238_v33  ;;  %v2263_v33 = vld [vmem:[#allocation16 + $0x360] sm:$0xff] }
 0x83f   :  { %2471 = vmatpush1.msra.mxu0 %v2237_v35  ;;  %v2248_v35 = vld [vmem:[#allocation16 + $0x2e8] sm:$0xff] }
 0x840   :  { %2472 = vmatprep.subr.mxu0 %v2222_v37  ;;  %v2247_v37 = vld [vmem:[#allocation16 + $0x2e0] sm:$0xff] }
 0x841   :  { %2473 = vmatpush1.msra.mxu0 %v2221_v39  ;;  %v2232_v39 = vld [vmem:[#allocation16 + $0x268] sm:$0xff] }
 0x842   :  { %2608 = vmatprep.subr.mxu0 %v2274_v41  ;;  %v2231_v41 = vld [vmem:[#allocation16 + $0x260] sm:$0xff] }
 0x8fa   :  { %v2182_v10 = vpop.f32.mrf.mxu0 }
 0x8fb   :  { %v2183_v11 = vadd.f32 %v10379_v49, %v2182_v10  ;;  %v2275_v49 = vld [vmem:[#allocation16 + $0x3c0] sm:$0xff]  ;;  %v2277_v10 = vld [vmem:[#allocation16 + $0x3d0] sm:$0xff] }
 0x8fc   :  { %v10597_v12 = vpop.f32.mrf.mxu0 }
 0x8fd   :  { %v2186_v13 = vadd.f32 %v2183_v11, %v2013_v61  ;;  %v2241_v61 = vld [vmem:[#allocation16 + $0x2b0] sm:$0xff]  ;;  %v2260_v11 = vld [vmem:[#allocation16 + $0x348] sm:$0xff]  ;;  %v2262_v12 = vld [vmem:[#allocation16 + $0x358] sm:$0xff] }
 0x8ff   :  { %v2191_v14 = vsel %vm429_vm2, %v2186_v13, 0.0 }
 0x900   :  { %2192 = vadd.xlane.f32.xlu0 %v2191_v14  ;;  %v2261_v14 = vld [vmem:[#allocation16 + $0x350] sm:$0xff] }
 0x989   :  { %v2193_v15 = vpop.xlane.xlu0 %2192 }
 0x98a   :  { %v2194_v16 = vmul.f32 0.03125, %v2193_v15  ;;  %v2244_v15 = vld [vmem:[#allocation16 + $0x2c8] sm:$0xff] }
 0x98c   :  { %v2195_v19 = vsub.f32 %v2186_v13, %v2194_v16  ;;  %v2259_v13 = vld [vmem:[#allocation16 + $0x340] sm:$0xff]  ;;  %v2246_v16 = vld [vmem:[#allocation16 + $0x2d8] sm:$0xff] }
 0x98e   :  { %v2196_v20 = vmul.f32 %v2195_v19, %v2195_v19 }
 0x990   :  { %v2197_v21 = vsel %vm429_vm2, %v2196_v20, 0.0  ;;  %v2245_v20 = vld [vmem:[#allocation16 + $0x2d0] sm:$0xff] }
 0x991   :  { %2198 = vadd.xlane.f32.xlu1 %v2197_v21  ;;  %v2228_v21 = vld [vmem:[#allocation16 + $0x248] sm:$0xff] }
 0xa1a   :  { %v2199_v42 = vpop.xlane.xlu1 %2198 }
 0xa1b   :  { %v2200_v43 = vmul.f32 0.03125, %v2199_v42  ;;  %v2233_v42 = vld [vmem:[#allocation16 + $0x270] sm:$0xff] }
 0xa1d   :  { %v2201_v44 = vadd.f32 1e-05, %v2200_v43  ;;  %v3005_v43 = vld [vmem:[#allocation19 + $0x388] sm:$0xff] }
 0xa1f   :  { %10753 = vrsqrt.f32 %v2201_v44  ;;  %v3007_v44 = vld [vmem:[#allocation19 + $0x398] sm:$0xff] }
 0xa2c   :  { %v10754_v45 = vpop.eup %10753 }
 0xa2d   :  { %v2203_v47 = vmul.f32 %v10754_v45, %v2195_v19  ;;  %v2243_v19 = vld [vmem:[#allocation16 + $0x2c0] sm:$0xff] }
 0xa2e   :  { %v3004_v45 = vld [vmem:[#allocation19 + $0x380] sm:$0xff] }
 0xa2f   :  { %v2210_v58 = vmul.f32 %v10381_v46, %v2203_v47  ;;  %v3006_v46 = vld [vmem:[#allocation19 + $0x390] sm:$0xff]  ;;  %v2989_v47 = vld [vmem:[#allocation19 + $0x308] sm:$0xff] }
 0xa31   :  { %v11605_v50 = vadd.f32 %v10382_v48, %v2210_v58  ;;  %v2991_v48 = vld [vmem:[#allocation19 + $0x318] sm:$0xff]  ;;  %v2988_v58 = vld [vmem:[#allocation19 + $0x300] sm:$0xff] }
 0xa33   :  { %10383 = vmatmul.mubr.msk.f32.vlgmr.msra.gmra.mxu1 %vm429_vm2, %v11605_v50  ;;  %10384 = vmatmul.mubr.msk.f32.vlgmr.msra.gmra.mxu0 %vm429_vm2, %v11605_v50 }
 0xa34   :  { %2538 = vmatpush1.msra.mxu1 %v2271_v51  ;;  %2609 = vmatpush1.msra.mxu0 %v2273_v52  ;;  %v2990_v51 = vld [vmem:[#allocation19 + $0x310] sm:$0xff]  ;;  %v2973_v52 = vld [vmem:[#allocation19 + $0x288] sm:$0xff] }
 0xa35   :  { %2539 = vmatprep.subr.mxu1 %v2256_v53  ;;  %2610 = vmatprep.subr.mxu0 %v2258_v54  ;;  %v2975_v53 = vld [vmem:[#allocation19 + $0x298] sm:$0xff]  ;;  %v2972_v54 = vld [vmem:[#allocation19 + $0x280] sm:$0xff] }
 0xa36   :  { %2540 = vmatpush1.msra.mxu1 %v2255_v55  ;;  %2611 = vmatpush1.msra.mxu0 %v2257_v56  ;;  %v2974_v55 = vld [vmem:[#allocation19 + $0x290] sm:$0xff]  ;;  %v2957_v56 = vld [vmem:[#allocation19 + $0x208] sm:$0xff] }
 0xa37   :  { %2541 = vmatprep.subr.mxu1 %v2240_v57  ;;  %2612 = vmatprep.subr.mxu0 %v2242_v59  ;;  %v2959_v57 = vld [vmem:[#allocation19 + $0x218] sm:$0xff]  ;;  %v2956_v59 = vld [vmem:[#allocation19 + $0x200] sm:$0xff] }
 0xa38   :  { %2542 = vmatpush1.msra.mxu1 %v2239_v60  ;;  %2613 = vmatpush1.msra.mxu0 %v2241_v61  ;;  %v2958_v60 = vld [vmem:[#allocation19 + $0x210] sm:$0xff]  ;;  %v3009_v61 = vld [vmem:[#allocation19 + $0x3a8] sm:$0xff] }
 0xa39   :  { %2543 = vmatprep.subr.mxu1 %v2224_v2  ;;  %2614 = vmatprep.subr.mxu0 %v2226_v5  ;;  %v3011_v2 = vld [vmem:[#allocation19 + $0x3b8] sm:$0xff]  ;;  %v2284_v5 = vld [vmem:[#allocation17 + $0x10] sm:$0xff] }
 0xa3a   :  { %2544 = vmatpush1.msra.mxu1 %v2223_v6  ;;  %2577 = vmatprep.mubr.f32.mxu1 %v11249_v0  ;;  %v2291_v6 = vrot.slane %v2284_v5, %v11519_v63 }
 0xa3b   :  { %2615 = vmatpush1.msra.mxu0 %v2225_v7  ;;  %2648 = vmatprep.mubr.f32.mxu0 %v11249_v0  ;;  %v2299_v7 = vrot.slane %v2284_v5, %v11522_v1 }
 0xa3c   :  { %10385 = vmatmul.mubr.msk.f32.vlgmr.msra.gmra.mxu1 %vm429_vm2, %v11605_v50  ;;  %10386 = vmatmul.mubr.msk.f32.vlgmr.msra.gmra.mxu0 %vm429_vm2, %v11605_v50 }
 0xa3d   :  { %2679 = vmatprep.subr.mxu1 %v2276_v8  ;;  %2750 = vmatprep.subr.mxu0 %v2278_v9  ;;  %v2295_v8 = vrot.slane %v2284_v5, %v11527_v3  ;;  %v2303_v9 = vrot.slane %v2284_v5, %v11530_v4 }
 0xa3e   :  { %2680 = vmatpush1.msra.mxu1 %v2275_v49  ;;  %2751 = vmatpush1.msra.mxu0 %v2277_v10 }
 0xa3f   :  { %2681 = vmatprep.subr.mxu1 %v2260_v11  ;;  %2752 = vmatprep.subr.mxu0 %v2262_v12 }
 0xa40   :  { %2682 = vmatpush1.msra.mxu1 %v2259_v13  ;;  %2753 = vmatpush1.msra.mxu0 %v2261_v14 }
 0xa41   :  { %2683 = vmatprep.subr.mxu1 %v2244_v15  ;;  %2754 = vmatprep.subr.mxu0 %v2246_v16 }
 0xa42   :  { %2684 = vmatpush1.msra.mxu1 %v2243_v19  ;;  %2755 = vmatpush1.msra.mxu0 %v2245_v20 }
 0xa43   :  { %2685 = vmatprep.subr.mxu1 %v2228_v21  ;;  %2756 = vmatprep.subr.mxu0 %v2230_v22 }
 0xa44   :  { %2686 = vmatpush1.msra.mxu1 %v2227_v23  ;;  %2719 = vmatprep.mubr.f32.mxu1 %v11249_v0  ;;  %v3008_v23 = vld [vmem:[#allocation19 + $0x3a0] sm:$0xff] }
 0xa45   :  { %2757 = vmatpush1.msra.mxu0 %v2229_v24  ;;  %2790 = vmatprep.mubr.f32.mxu0 %v11249_v0  ;;  %v3010_v24 = vld [vmem:[#allocation19 + $0x3b0] sm:$0xff] }
 0xa46   :  { %10387 = vmatmul.mubr.msk.f32.vlgmr.msra.gmra.mxu1 %vm429_vm2, %v11605_v50  ;;  %10388 = vmatmul.mubr.msk.f32.vlgmr.msra.gmra.mxu0 %vm429_vm2, %v11605_v50 }
 0xa47   :  { %2821 = vmatprep.subr.mxu1 %v2280_v25  ;;  %2892 = vmatprep.subr.mxu0 %v2282_v26  ;;  %v2993_v25 = vld [vmem:[#allocation19 + $0x328] sm:$0xff]  ;;  %v2995_v26 = vld [vmem:[#allocation19 + $0x338] sm:$0xff] }
 0xa48   :  { %2822 = vmatpush1.msra.mxu1 %v2279_v27  ;;  %2893 = vmatpush1.msra.mxu0 %v2281_v28  ;;  %v2311_v27 = vrot.slane %v2284_v5, %v11541_v17  ;;  %v2319_v28 = vrot.slane %v2284_v5, %v11544_v18 }
 0xa49   :  { %2823 = vmatprep.subr.mxu1 %v2264_v29  ;;  %2894 = vmatprep.subr.mxu0 %v2266_v30 }
 0xa4a   :  { %2824 = vmatpush1.msra.mxu1 %v2263_v33  ;;  %2895 = vmatpush1.msra.mxu0 %v2265_v34  ;;  %v2992_v33 = vld [vmem:[#allocation19 + $0x320] sm:$0xff]  ;;  %v2994_v34 = vld [vmem:[#allocation19 + $0x330] sm:$0xff] }
 0xa4b   :  { %2825 = vmatprep.subr.mxu1 %v2248_v35  ;;  %2896 = vmatprep.subr.mxu0 %v2250_v36 }
 0xa4c   :  { %2826 = vmatpush1.msra.mxu1 %v2247_v37  ;;  %2897 = vmatpush1.msra.mxu0 %v2249_v38  ;;  %v2977_v37 = vld [vmem:[#allocation19 + $0x2a8] sm:$0xff]  ;;  %v2979_v38 = vld [vmem:[#allocation19 + $0x2b8] sm:$0xff] }
 0xa4d   :  { %2827 = vmatprep.subr.mxu1 %v2232_v39  ;;  %2898 = vmatprep.subr.mxu0 %v2234_v40 }
 0xa4e   :  { %2828 = vmatpush1.msra.mxu1 %v2231_v41  ;;  %2861 = vmatprep.mubr.f32.mxu1 %v11249_v0  ;;  %v2307_v41 = vrot.slane %v2284_v5, %v11551_v31 }
 0xa4f   :  { %2899 = vmatpush1.msra.mxu0 %v2233_v42  ;;  %2932 = vmatprep.mubr.f32.mxu0 %v11249_v0  ;;  %v2315_v42 = vrot.slane %v2284_v5, %v11554_v32 }
 0xa50   :  { %10389 = vmatmul.mubr.msk.f32.vlgmr.msra.gmra.mxu1 %vm429_vm2, %v11605_v50  ;;  %10390 = vmatmul.mubr.msk.f32.vlgmr.msra.gmra.mxu0 %vm429_vm2, %v11605_v50 }
 0xa51   :  { %3052 = vmatprep.subr.mxu1 %v3005_v43  ;;  %3122 = vmatprep.subr.mxu0 %v3007_v44 }
 0xa52   :  { %3053 = vmatpush1.xpose.msra.mxu1 %v3004_v45  ;;  %3123 = vmatpush1.xpose.msra.mxu0 %v3006_v46  ;;  %v2976_v45 = vld [vmem:[#allocation19 + $0x2a0] sm:$0xff]  ;;  %v2978_v46 = vld [vmem:[#allocation19 + $0x2b0] sm:$0xff] }
 0xa53   :  { %3054 = vmatprep.subr.mxu1 %v2989_v47  ;;  %3124 = vmatprep.subr.mxu0 %v2991_v48  ;;  %v2961_v47 = vld [vmem:[#allocation19 + $0x228] sm:$0xff]  ;;  %v2963_v48 = vld [vmem:[#allocation19 + $0x238] sm:$0xff] }
 0xa56   :  { %3055 = vmatpush1.xpose.msra.mxu1 %v2988_v58  ;;  %3125 = vmatpush1.xpose.msra.mxu0 %v2990_v51  ;;  %v11637_v58 = vld [vmem:[#allocation17 + $0x18] sm:$0xff] }
 0xa57   :  { %3056 = vmatprep.subr.mxu1 %v2973_v52  ;;  %3126 = vmatprep.subr.mxu0 %v2975_v53  ;;  %v2327_v51 = vrot.slane %v11637_v58, %v11527_v3 }
 0xa5a   :  { %3057 = vmatpush1.xpose.msra.mxu1 %v2972_v54  ;;  %3127 = vmatpush1.xpose.msra.mxu0 %v2974_v55  ;;  %v2335_v54 = vrot.slane %v11637_v58, %v11530_v4  ;;  %v2960_v55 = vld [vmem:[#allocation19 + $0x220] sm:$0xff] }
 0xa5b   :  { %3058 = vmatprep.subr.mxu1 %v2957_v56  ;;  %3128 = vmatprep.subr.mxu0 %v2959_v57  ;;  %v2962_v56 = vld [vmem:[#allocation19 + $0x230] sm:$0xff] }
 0xa5e   :  { %3059 = vmatpush1.xpose.msra.mxu1 %v2956_v59  ;;  %3129 = vmatpush1.xpose.msra.mxu0 %v2958_v60  ;;  %v3013_v60 = vld [vmem:[#allocation19 + $0x3c8] sm:$0xff] }
 0xa5f   :  { %3192 = vmatprep.subr.mxu1 %v3009_v61  ;;  %3262 = vmatprep.subr.mxu0 %v3011_v2  ;;  %v3015_v61 = vld [vmem:[#allocation19 + $0x3d8] sm:$0xff] }
 0xaf3   :  { %v2437_v49 = vpop.f32.mrf.mxu1  ;;  %v2508_v10 = vpop.f32.mrf.mxu0 }
 0xaf4   :  { %v2438_v11 = vadd.f32 %v2437_v49, %v2291_v6  ;;  %v2509_v12 = vadd.f32 %v2508_v10, %v2299_v7  ;;  %v3012_v49 = vld [vmem:[#allocation19 + $0x3c0] sm:$0xff]  ;;  %v3014_v10 = vld [vmem:[#allocation19 + $0x3d0] sm:$0xff] }
 0xaf5   :  { %v2439_v13 = vpop.f32.mrf.mxu1  ;;  %v2510_v14 = vpop.f32.mrf.mxu0 }
 0xaf6   :  { %v2440_v15 = vadd.f32 %v2439_v13, %v2295_v8  ;;  %v2511_v16 = vadd.f32 %v2510_v14, %v2303_v9  ;;  %v2939_v21 = vmax.f32 %v2438_v11, 0.0  ;;  %v2941_v22 = vmax.f32 %v2509_v12, 0.0  ;;  %v2997_v13 = vld [vmem:[#allocation19 + $0x348] sm:$0xff]  ;;  %v2999_v14 = vld [vmem:[#allocation19 + $0x358] sm:$0xff] }
 0xaf8   :  { %v2940_v19 = vmax.f32 %v2440_v15, 0.0  ;;  %v2942_v20 = vmax.f32 %v2511_v16, 0.0  ;;  %v2996_v15 = vld [vmem:[#allocation19 + $0x340] sm:$0xff]  ;;  %v2998_v16 = vld [vmem:[#allocation19 + $0x350] sm:$0xff] }
 0xafa   :  { %3092 = vmatprep.mubr.f32.mxu1 %v2940_v19  ;;  %3162 = vmatprep.mubr.f32.mxu0 %v2942_v20  ;;  %v2981_v19 = vld [vmem:[#allocation19 + $0x2c8] sm:$0xff]  ;;  %v2983_v20 = vld [vmem:[#allocation19 + $0x2d8] sm:$0xff] }
 0xafb   :  { %3093 = vmatmul.mubr.f32.vlgmr.msra.gmra.mxu1 %v2939_v21  ;;  %3163 = vmatmul.mubr.f32.vlgmr.msra.gmra.mxu0 %v2941_v22 }
 0xafc   :  { %v2579_v29 = vpop.f32.mrf.mxu1  ;;  %v2650_v30 = vpop.f32.mrf.mxu0  ;;  %3193 = vmatpush1.xpose.msra.mxu1 %v3008_v23  ;;  %3263 = vmatpush1.xpose.msra.mxu0 %v3010_v24  ;;  %v2323_v23 = vrot.slane %v11637_v58, %v11519_v63  ;;  %v2331_v24 = vrot.slane %v11637_v58, %v11522_v1 }
 0xafd   :  { %3194 = vmatprep.subr.mxu1 %v2993_v25  ;;  %3264 = vmatprep.subr.mxu0 %v2995_v26  ;;  %v2580_v52 = vadd.f32 %v2579_v29, %v2307_v41  ;;  %v2651_v53 = vadd.f32 %v2650_v30, %v2315_v42  ;;  %v2980_v25 = vld [vmem:[#allocation19 + $0x2c0] sm:$0xff]  ;;  %v2982_v26 = vld [vmem:[#allocation19 + $0x2d0] sm:$0xff]  ;;  %v2967_v29 = vld [vmem:[#allocation19 + $0x258] sm:$0xff] }
 0xafe   :  { %v2581_v35 = vpop.f32.mrf.mxu1  ;;  %v2652_v36 = vpop.f32.mrf.mxu0  ;;  %v3019_v41 = vld [vmem:[#allocation19 + $0x3f8] sm:$0xff] }
 0xaff   :  { %v2582_v39 = vadd.f32 %v2581_v35, %v2311_v27  ;;  %v2653_v40 = vadd.f32 %v2652_v36, %v2319_v28  ;;  %v2943_v6 = vmax.f32 %v2580_v52, 0.0  ;;  %v2945_v7 = vmax.f32 %v2651_v53, 0.0  ;;  %v2965_v28 = vld [vmem:[#allocation19 + $0x248] sm:$0xff]  ;;  %v3003_v52 = vld [vmem:[#allocation19 + $0x378] sm:$0xff]  ;;  %v3000_v53 = vld [vmem:[#allocation19 + $0x360] sm:$0xff] }
 0xb00   :  { %3195 = vmatpush1.xpose.msra.mxu1 %v2992_v33  ;;  %3265 = vmatpush1.xpose.msra.mxu0 %v2994_v34  ;;  %v2343_v27 = vrot.slane %v11637_v58, %v11541_v17  ;;  %v2351_v33 = vrot.slane %v11637_v58, %v11544_v18 }
 0xb01   :  { %v2944_v43 = vmax.f32 %v2582_v39, 0.0  ;;  %v2946_v44 = vmax.f32 %v2653_v40, 0.0  ;;  %3196 = vmatprep.subr.mxu1 %v2977_v37  ;;  %3266 = vmatprep.subr.mxu0 %v2979_v38  ;;  %v2964_v37 = vld [vmem:[#allocation19 + $0x240] sm:$0xff]  ;;  %v2966_v38 = vld [vmem:[#allocation19 + $0x250] sm:$0xff]  ;;  %v3017_v40 = vld [vmem:[#allocation19 + $0x3e8] sm:$0xff] }
 0xb03   :  { %3232 = vmatprep.mubr.f32.mxu1 %v2944_v43  ;;  %3302 = vmatprep.mubr.f32.mxu0 %v2946_v44 }
 0xb04   :  { %3197 = vmatpush1.xpose.msra.mxu1 %v2976_v45  ;;  %3267 = vmatpush1.xpose.msra.mxu0 %v2978_v46  ;;  %v3016_v45 = vld [vmem:[#allocation19 + $0x3e0] sm:$0xff] }
 0xb05   :  { %3198 = vmatprep.subr.mxu1 %v2961_v47  ;;  %3268 = vmatprep.subr.mxu0 %v2963_v48  ;;  %v3018_v47 = vld [vmem:[#allocation19 + $0x3f0] sm:$0xff] }
 0xb06   :  { %v2721_v57 = vpop.f32.mrf.mxu1  ;;  %v2792_v59 = vpop.f32.mrf.mxu0 }
 0xb07   :  { %v2722_v35 = vadd.f32 %v2721_v57, %v2323_v23  ;;  %v2793_v36 = vadd.f32 %v2792_v59, %v2331_v24  ;;  %v2339_v57 = vrot.slane %v11637_v58, %v11551_v31  ;;  %v2984_v59 = vld [vmem:[#allocation19 + $0x2e0] sm:$0xff] }
 0xb08   :  { %v2723_v2 = vpop.f32.mrf.mxu1  ;;  %v2794_v5 = vpop.f32.mrf.mxu0  ;;  %3199 = vmatpush1.xpose.msra.mxu1 %v2960_v55  ;;  %3269 = vmatpush1.xpose.msra.mxu0 %v2962_v56  ;;  %v2985_v55 = vld [vmem:[#allocation19 + $0x2e8] sm:$0xff]  ;;  %v2987_v56 = vld [vmem:[#allocation19 + $0x2f8] sm:$0xff] }
 0xb09   :  { %v2724_v8 = vadd.f32 %v2723_v2, %v2327_v51  ;;  %v2795_v9 = vadd.f32 %v2794_v5, %v2335_v54  ;;  %3332 = vmatprep.subr.mxu1 %v3013_v60  ;;  %3402 = vmatprep.subr.mxu0 %v3015_v61  ;;  %v2947_v43 = vmax.f32 %v2722_v35, 0.0  ;;  %v2949_v44 = vmax.f32 %v2793_v36, 0.0  ;;  %v3001_v51 = vld [vmem:[#allocation19 + $0x368] sm:$0xff]  ;;  %v3002_v54 = vld [vmem:[#allocation19 + $0x370] sm:$0xff]  ;;  %v2971_v5 = vld [vmem:[#allocation19 + $0x278] sm:$0xff] }
 0xb0a   :  { %v2347_v60 = vrot.slane %v11637_v58, %v11554_v32  ;;  %v2986_v61 = vld [vmem:[#allocation19 + $0x2f0] sm:$0xff]  ;;  %v2969_v2 = vld [vmem:[#allocation19 + $0x268] sm:$0xff] }
 0xb0b   :  { %v2948_v11 = vmax.f32 %v2724_v8, 0.0  ;;  %v2950_v12 = vmax.f32 %v2795_v9, 0.0  ;;  %3233 = vmatmul.mubr.f32.vlgmr.msra.gmra.mxu1 %v2943_v6  ;;  %3303 = vmatmul.mubr.f32.vlgmr.msra.gmra.mxu0 %v2945_v7  ;;  %v2968_v7 = vld [vmem:[#allocation19 + $0x260] sm:$0xff]  ;;  %v2970_v9 = vld [vmem:[#allocation19 + $0x270] sm:$0xff] }
 0xb0c   :  { %3333 = vmatpush1.xpose.msra.mxu1 %v3012_v49  ;;  %3403 = vmatpush1.xpose.msra.mxu0 %v3014_v10 }
 0xb0d   :  { %3372 = vmatprep.mubr.f32.mxu1 %v2948_v11  ;;  %3442 = vmatprep.mubr.f32.mxu0 %v2950_v12 }
 0xb0e   :  { %3334 = vmatprep.subr.mxu1 %v2997_v13  ;;  %3404 = vmatprep.subr.mxu0 %v2999_v14 }
 0xb10   :  { %v11643_v21 = vpop.f32.mrf.mxu1  ;;  %v11645_v22 = vpop.f32.mrf.mxu0  ;;  %3335 = vmatpush1.xpose.msra.mxu1 %v2996_v15  ;;  %3405 = vmatpush1.xpose.msra.mxu0 %v2998_v16 }
 0xb11   :  { %3336 = vmatprep.subr.mxu1 %v2981_v19  ;;  %3406 = vmatprep.subr.mxu0 %v2983_v20  ;;  %v2864_v6 = vadd.f32 %v11643_v21, %v2339_v57  ;;  %v2935_v8 = vadd.f32 %v11645_v22, %v2347_v60  ;;  %v10391_v20 = vld [vmem:[#allocation20 + $0x1] ss:$0 sm:$0xff]  ;;  %v10392_v57 = vld [vmem:[#allocation22 + $0x1] ss:$0 sm:$0xff]  ;;  %v10393_v60 = vld [vmem:[#allocation23 + $0x1] ss:$0 sm:$0xff] }
 0xb12   :  { %v2865_v30 = vpop.f32.mrf.mxu1  ;;  %v2936_v34 = vpop.f32.mrf.mxu0 }
 0xb13   :  { %v2866_v39 = vadd.f32 %v2865_v30, %v2343_v27  ;;  %v2937_v42 = vadd.f32 %v2936_v34, %v2351_v33  ;;  %v2951_v49 = vmax.f32 %v2864_v6, 0.0  ;;  %v2953_v58 = vmax.f32 %v2935_v8, 0.0  ;;  %v3707_v6 = vld [vmem:[#allocation10 + $0x40] sm:$0xff] }
 0xb14   :  { %3337 = vmatpush1.xpose.msra.mxu1 %v2980_v25  ;;  %3407 = vmatpush1.xpose.msra.mxu0 %v2982_v26 }
 0xb15   :  { %3338 = vmatprep.subr.mxu1 %v2965_v28  ;;  %3408 = vmatprep.subr.mxu0 %v2967_v29  ;;  %v2952_v46 = vmax.f32 %v2866_v39, 0.0  ;;  %v2954_v48 = vmax.f32 %v2937_v42, 0.0 }
 0xb18   :  { %3339 = vmatpush1.xpose.msra.mxu1 %v2964_v37  ;;  %3409 = vmatpush1.xpose.msra.mxu0 %v2966_v38 }
 0xb19   :  { %3472 = vmatprep.subr.mxu1 %v3017_v40  ;;  %3542 = vmatprep.subr.mxu0 %v3019_v41 }
 0xb1b   :  { %3373 = vmatmul.mubr.f32.vlgmr.msra.gmra.mxu1 %v2947_v43  ;;  %3443 = vmatmul.mubr.f32.vlgmr.msra.gmra.mxu0 %v2949_v44 }
 0xb1c   :  { %3473 = vmatpush1.xpose.msra.mxu1 %v3016_v45  ;;  %3512 = vmatprep.mubr.f32.mxu1 %v2952_v46  ;;  %v3624_v46 = vld [vmem:[#allocation7 + $0x58] sm:$0xff] }
 0xb1d   :  { %3543 = vmatpush1.xpose.msra.mxu0 %v3018_v47  ;;  %3582 = vmatprep.mubr.f32.mxu0 %v2954_v48  ;;  %v3623_v47 = vld [vmem:[#allocation7 + $0x50] sm:$0xff]  ;;  %v3622_v48 = vld [vmem:[#allocation7 + $0x48] sm:$0xff] }
 0xb1e   :  { %3474 = vmatprep.subr.mxu1 %v3001_v51  ;;  %3544 = vmatprep.subr.mxu0 %v3003_v52  ;;  %v3710_v51 = vld [vmem:[#allocation10 + $0x58] sm:$0xff]  ;;  %v3709_v52 = vld [vmem:[#allocation10 + $0x50] sm:$0xff] }
 0xb20   :  { %3475 = vmatpush1.xpose.msra.mxu1 %v3000_v53 }
 0xb21   :  { %3545 = vmatpush1.xpose.msra.mxu0 %v3002_v54  ;;  %3476 = vmatprep.subr.mxu1 %v2985_v55 }
 0xb22   :  { %3546 = vmatprep.subr.mxu0 %v2987_v56 }
 0xb24   :  { %3477 = vmatpush1.xpose.msra.mxu1 %v2984_v59 }
 0xb25   :  { %3547 = vmatpush1.xpose.msra.mxu0 %v2986_v61  ;;  %3478 = vmatprep.subr.mxu1 %v2969_v2 }
 0xb26   :  { %3548 = vmatprep.subr.mxu0 %v2971_v5  ;;  %v3708_v5 = vld [vmem:[#allocation10 + $0x48] sm:$0xff] }
 0xb28   :  { %3479 = vmatpush1.xpose.msra.mxu1 %v2968_v7  ;;  %v10394_v7 = vld [vmem:[#allocation8 + $0x2] ss:$0 sm:$0xff] }
 0xb29   :  { %3549 = vmatpush1.xpose.msra.mxu0 %v2970_v9  ;;  %10598 = vmatprep.subr.mxu1 %v11249_v0 }
 0xb2a   :  { %10609 = vmatprep.subr.mxu0 %v11249_v0 }
 0xb2b   :  { %3513 = vmatmul.mubr.f32.vlgmr.msra.gmra.mxu1 %v2951_v49 }
 0xb2c   :  { %3583 = vmatmul.mubr.f32.vlgmr.msra.gmra.mxu0 %v2953_v58  ;;  %10606 = vmatprep.mubr.msk.f32.mxu1 %vm11250_vm0, %v11249_v0  ;;  %v10396_v58 = vld [vmem:[#allocation11 + $0x2] ss:$0 sm:$0xff] }
 0xb2d   :  { %10617 = vmatprep.mubr.msk.f32.mxu0 %vm11250_vm0, %v11249_v0  ;;  %10599 = vmatpush3.msra.mxu1 %v3624_v46  ;;  %v10398_v46 = vld [vmem:[#allocation13 + $0x2] ss:$0 sm:$0xff] }
 0xb2e   :  { %10600 = vmatprep.subr.mxu1 %v11249_v0  ;;  %10610 = vmatpush3.msra.mxu0 %v3710_v51 }
 0xb2f   :  { %10601 = vmatpush3.msra.mxu1 %v3623_v47  ;;  %10611 = vmatprep.subr.mxu0 %v11249_v0 }
 0xb30   :  { %10602 = vmatprep.subr.mxu1 %v11249_v0  ;;  %10612 = vmatpush3.msra.mxu0 %v3709_v52  ;;  %v3877_v52 = vld [vmem:[#allocation16 + $0x5a0] sm:$0xff] }
 0xb31   :  { %10603 = vmatpush3.msra.mxu1 %v3622_v48  ;;  %10613 = vmatprep.subr.mxu0 %v11249_v0  ;;  %v10399_v48 = vld [vmem:[#allocation14 + $0x2] ss:$0 sm:$0xff] }
 0xb32   :  { %10604 = vmatprep.subr.mxu1 %v11249_v0  ;;  %10614 = vmatpush3.msra.mxu0 %v3708_v5  ;;  %v3830_v5 = vld [vmem:[#allocation16 + $0x428] sm:$0xff] }
 0xb33   :  { %10615 = vmatprep.subr.mxu0 %v11249_v0 }
 0xb34   :  { %10616 = vmatpush3.msra.mxu0 %v3707_v6  ;;  %v3832_v6 = vld [vmem:[#allocation16 + $0x438] sm:$0xff] }
 0xbbb   :  { %v3094_v10 = vpop.f32.mrf.mxu1  ;;  %v3164_v11 = vpop.f32.mrf.mxu0 }
 0xbbc   :  { %v3095_v21 = vadd.f32 %v10391_v20, %v3094_v10 }
 0xbbd   :  { %v3096_v12 = vpop.f32.mrf.mxu1  ;;  %v3166_v13 = vpop.f32.mrf.mxu0 }
 0xbbe   :  { %v3165_v26 = vadd.f32 %v3164_v11, %v3095_v21 }
 0xbcb   :  { %v3234_v14 = vpop.f32.mrf.mxu1  ;;  %v3304_v15 = vpop.f32.mrf.mxu0 }
 0xbcc   :  { %v3235_v27 = vadd.f32 %v3234_v14, %v3165_v26  ;;  %v3858_v26 = vld [vmem:[#allocation16 + $0x508] sm:$0xff] }
 0xbcd   :  { %v3236_v16 = vpop.f32.mrf.mxu1  ;;  %v3306_v19 = vpop.f32.mrf.mxu0 }
 0xbce   :  { %v3305_v28 = vadd.f32 %v3304_v15, %v3235_v27  ;;  %v3860_v27 = vld [vmem:[#allocation16 + $0x518] sm:$0xff] }
 0xbdb   :  { %v3374_v22 = vpop.f32.mrf.mxu1  ;;  %v3444_v23 = vpop.f32.mrf.mxu0 }
 0xbdc   :  { %v3375_v29 = vadd.f32 %v3374_v22, %v3305_v28  ;;  %v3874_v22 = vld [vmem:[#allocation16 + $0x588] sm:$0xff]  ;;  %v3857_v28 = vld [vmem:[#allocation16 + $0x500] sm:$0xff] }
 0xbdd   :  { %v3376_v24 = vpop.f32.mrf.mxu1  ;;  %v3446_v25 = vpop.f32.mrf.mxu0 }
 0xbde   :  { %v3445_v30 = vadd.f32 %v3444_v23, %v3375_v29  ;;  %v3876_v23 = vld [vmem:[#allocation16 + $0x598] sm:$0xff]  ;;  %v3873_v24 = vld [vmem:[#allocation16 + $0x580] sm:$0xff]  ;;  %v3875_v25 = vld [vmem:[#allocation16 + $0x590] sm:$0xff] }
 0xbdf   :  { %4072 = vmatprep.subr.mxu0 %v3876_v23  ;;  %v3859_v29 = vld [vmem:[#allocation16 + $0x510] sm:$0xff]  ;;  %v3833_v23 = vld [vmem:[#allocation16 + $0x440] sm:$0xff] }
 0xbeb   :  { %v3514_v33 = vpop.f32.mrf.mxu1 }
 0xbec   :  { %v3515_v34 = vadd.f32 %v3514_v33, %v3445_v30  ;;  %v3584_v35 = vpop.f32.mrf.mxu0  ;;  %v3842_v30 = vld [vmem:[#allocation16 + $0x488] sm:$0xff]  ;;  %v3844_v33 = vld [vmem:[#allocation16 + $0x498] sm:$0xff] }
 0xbed   :  { %v3516_v36 = vpop.f32.mrf.mxu1 }
 0xbee   :  { %v3585_v37 = vadd.f32 %v3584_v35, %v3515_v34  ;;  %v3586_v38 = vpop.f32.mrf.mxu0  ;;  %v3841_v34 = vld [vmem:[#allocation16 + $0x480] sm:$0xff]  ;;  %v3843_v35 = vld [vmem:[#allocation16 + $0x490] sm:$0xff]  ;;  %v3826_v36 = vld [vmem:[#allocation16 + $0x408] sm:$0xff] }
 0xbef   :  { %v3825_v38 = vld [vmem:[#allocation16 + $0x400] sm:$0xff] }
 0xbf0   :  { %v3588_v39 = vadd.f32 %v3585_v37, %v11605_v50  ;;  %v3621_v50 = vld [vmem:[#allocation7 + $0x40] sm:$0xff]  ;;  %v3828_v37 = vld [vmem:[#allocation16 + $0x418] sm:$0xff] }
 0xbf1   :  { %10605 = vmatpush3.msra.mxu1 %v3621_v50 }
 0xbf2   :  { %v3593_v40 = vsel %vm429_vm2, %v3588_v39, 0.0  ;;  %4001 = vmatprep.subr.mxu1 %v3874_v22  ;;  %v3836_v22 = vld [vmem:[#allocation16 + $0x458] sm:$0xff] }
 0xbf3   :  { %3594 = vadd.xlane.f32.xlu0 %v3593_v40  ;;  %v3878_v40 = vld [vmem:[#allocation16 + $0x5a8] sm:$0xff] }
 0xc7c   :  { %v3595_v41 = vpop.xlane.xlu0 %3594 }
 0xc7d   :  { %v3596_v42 = vmul.f32 0.03125, %v3595_v41  ;;  %v3880_v41 = vld [vmem:[#allocation16 + $0x5b8] sm:$0xff] }
 0xc7f   :  { %v3597_v43 = vsub.f32 %v3588_v39, %v3596_v42  ;;  %v3827_v39 = vld [vmem:[#allocation16 + $0x410] sm:$0xff] }
 0xc81   :  { %v3598_v44 = vmul.f32 %v3597_v43, %v3597_v43 }
 0xc83   :  { %v3599_v45 = vsel %vm429_vm2, %v3598_v44, 0.0 }
 0xc84   :  { %3600 = vadd.xlane.f32.xlu1 %v3599_v45 }
 0xd0d   :  { %v3601_v53 = vpop.xlane.xlu1 %3600 }
 0xd0e   :  { %v3602_v54 = vmul.f32 0.03125, %v3601_v53  ;;  %v3879_v53 = vld [vmem:[#allocation16 + $0x5b0] sm:$0xff] }
 0xd10   :  { %v3603_v55 = vadd.f32 1e-05, %v3602_v54  ;;  %v3862_v54 = vld [vmem:[#allocation16 + $0x528] sm:$0xff] }
 0xd12   :  { %10755 = vrsqrt.f32 %v3603_v55  ;;  %v3864_v55 = vld [vmem:[#allocation16 + $0x538] sm:$0xff] }
 0xd1f   :  { %v10756_v56 = vpop.eup %10755 }
 0xd20   :  { %v3605_v59 = vmul.f32 %v10756_v56, %v3597_v43  ;;  %v3861_v56 = vld [vmem:[#allocation16 + $0x520] sm:$0xff] }
 0xd22   :  { %v3612_v61 = vmul.f32 %v10392_v57, %v3605_v59  ;;  %v3863_v57 = vld [vmem:[#allocation16 + $0x530] sm:$0xff]  ;;  %v3846_v59 = vld [vmem:[#allocation16 + $0x4a8] sm:$0xff] }
 0xd24   :  { %v3619_v2 = vadd.f32 %v10393_v60, %v3612_v61  ;;  %v3848_v60 = vld [vmem:[#allocation16 + $0x4b8] sm:$0xff]  ;;  %v3845_v61 = vld [vmem:[#allocation16 + $0x4a0] sm:$0xff] }
 0xd26   :  { %10607 = vmatmul.mubr.msk.f32.vlgmr.msra.gmra.mxu1 %vm429_vm2, %v3619_v2 }
 0xd27   :  { %4041 = vmatprep.mubr.f32.mxu1 %v11249_v0  ;;  %4002 = vmatpush1.msra.mxu1 %v3873_v24  ;;  %v3835_v24 = vld [vmem:[#allocation16 + $0x450] sm:$0xff] }
 0xd28   :  { %4003 = vmatprep.subr.mxu1 %v3858_v26  ;;  %v3888_v26 = vld [vmem:[#allocation16 + $0x5f8] sm:$0xff] }
 0xd29   :  { %4004 = vmatpush1.msra.mxu1 %v3857_v28  ;;  %v3887_v28 = vld [vmem:[#allocation16 + $0x5f0] sm:$0xff] }
 0xd2a   :  { %4005 = vmatprep.subr.mxu1 %v3842_v30  ;;  %v3872_v30 = vld [vmem:[#allocation16 + $0x578] sm:$0xff] }
 0xd2b   :  { %4006 = vmatpush1.msra.mxu1 %v3841_v34  ;;  %v3871_v34 = vld [vmem:[#allocation16 + $0x570] sm:$0xff] }
 0xd2c   :  { %4007 = vmatprep.subr.mxu1 %v3826_v36  ;;  %v3856_v36 = vld [vmem:[#allocation16 + $0x4f8] sm:$0xff] }
 0xd2d   :  { %4008 = vmatpush1.msra.mxu1 %v3825_v38  ;;  %v3855_v38 = vld [vmem:[#allocation16 + $0x4f0] sm:$0xff] }
 0xd2e   :  { %4143 = vmatprep.subr.mxu1 %v3878_v40  ;;  %v3840_v40 = vld [vmem:[#allocation16 + $0x478] sm:$0xff] }
 0xde6   :  { %v3702_v8 = vpop.f32.mrf.mxu1 }
 0xde7   :  { %v3703_v9 = vadd.f32 %v10394_v7, %v3702_v8  ;;  %v3829_v7 = vld [vmem:[#allocation16 + $0x420] sm:$0xff]  ;;  %v3831_v8 = vld [vmem:[#allocation16 + $0x430] sm:$0xff] }
 0xde8   :  { %v10608_v49 = vpop.f32.mrf.mxu1 }
 0xde9   :  { %10618 = vmatmul.mubr.msk.f32.vlgmr.msra.gmra.mxu0 %vm429_vm2, %v3703_v9  ;;  %v3882_v9 = vld [vmem:[#allocation16 + $0x5c8] sm:$0xff]  ;;  %v3884_v49 = vld [vmem:[#allocation16 + $0x5d8] sm:$0xff] }
 0xdea   :  { %4112 = vmatprep.mubr.f32.mxu0 %v11249_v0  ;;  %4073 = vmatpush1.msra.mxu0 %v3875_v25  ;;  %v3886_v25 = vld [vmem:[#allocation16 + $0x5e8] sm:$0xff] }
 0xdeb   :  { %4074 = vmatprep.subr.mxu0 %v3860_v27  ;;  %v3885_v27 = vld [vmem:[#allocation16 + $0x5e0] sm:$0xff] }
 0xdec   :  { %4075 = vmatpush1.msra.mxu0 %v3859_v29  ;;  %v3870_v29 = vld [vmem:[#allocation16 + $0x568] sm:$0xff] }
 0xded   :  { %4076 = vmatprep.subr.mxu0 %v3844_v33  ;;  %v3869_v33 = vld [vmem:[#allocation16 + $0x560] sm:$0xff] }
 0xdee   :  { %4077 = vmatpush1.msra.mxu0 %v3843_v35  ;;  %v3854_v35 = vld [vmem:[#allocation16 + $0x4e8] sm:$0xff] }
 0xdef   :  { %4078 = vmatprep.subr.mxu0 %v3828_v37  ;;  %v3853_v37 = vld [vmem:[#allocation16 + $0x4e0] sm:$0xff] }
 0xdf0   :  { %4079 = vmatpush1.msra.mxu0 %v3827_v39  ;;  %v3838_v39 = vld [vmem:[#allocation16 + $0x468] sm:$0xff] }
 0xdf1   :  { %4214 = vmatprep.subr.mxu0 %v3880_v41  ;;  %v3837_v41 = vld [vmem:[#allocation16 + $0x460] sm:$0xff] }
 0xea9   :  { %v3788_v10 = vpop.f32.mrf.mxu0 }
 0xeaa   :  { %v3789_v11 = vadd.f32 %v10396_v58, %v3788_v10  ;;  %v3881_v58 = vld [vmem:[#allocation16 + $0x5c0] sm:$0xff]  ;;  %v3883_v10 = vld [vmem:[#allocation16 + $0x5d0] sm:$0xff] }
 0xeab   :  { %v10619_v12 = vpop.f32.mrf.mxu0 }
 0xeac   :  { %v3792_v13 = vadd.f32 %v3789_v11, %v3619_v2  ;;  %v3847_v2 = vld [vmem:[#allocation16 + $0x4b0] sm:$0xff]  ;;  %v3866_v11 = vld [vmem:[#allocation16 + $0x548] sm:$0xff]  ;;  %v3868_v12 = vld [vmem:[#allocation16 + $0x558] sm:$0xff] }
 0xeae   :  { %v3797_v14 = vsel %vm429_vm2, %v3792_v13, 0.0 }
 0xeaf   :  { %3798 = vadd.xlane.f32.xlu0 %v3797_v14  ;;  %v3867_v14 = vld [vmem:[#allocation16 + $0x550] sm:$0xff] }
 0xf38   :  { %v3799_v15 = vpop.xlane.xlu0 %3798 }
 0xf39   :  { %v3800_v16 = vmul.f32 0.03125, %v3799_v15  ;;  %v3850_v15 = vld [vmem:[#allocation16 + $0x4c8] sm:$0xff] }
 0xf3b   :  { %v3801_v19 = vsub.f32 %v3792_v13, %v3800_v16  ;;  %v3865_v13 = vld [vmem:[#allocation16 + $0x540] sm:$0xff]  ;;  %v3852_v16 = vld [vmem:[#allocation16 + $0x4d8] sm:$0xff] }
 0xf3d   :  { %v3802_v20 = vmul.f32 %v3801_v19, %v3801_v19 }
 0xf3f   :  { %v3803_v21 = vsel %vm429_vm2, %v3802_v20, 0.0  ;;  %v3851_v20 = vld [vmem:[#allocation16 + $0x4d0] sm:$0xff] }
 0xf40   :  { %3804 = vadd.xlane.f32.xlu1 %v3803_v21  ;;  %v3834_v21 = vld [vmem:[#allocation16 + $0x448] sm:$0xff] }
 0xfc9   :  { %v3805_v42 = vpop.xlane.xlu1 %3804 }
 0xfca   :  { %v3806_v43 = vmul.f32 0.03125, %v3805_v42  ;;  %v3839_v42 = vld [vmem:[#allocation16 + $0x470] sm:$0xff] }
 0xfcc   :  { %v3807_v44 = vadd.f32 1e-05, %v3806_v43  ;;  %v4611_v43 = vld [vmem:[#allocation19 + $0x588] sm:$0xff] }
 0xfce   :  { %10757 = vrsqrt.f32 %v3807_v44  ;;  %v4613_v44 = vld [vmem:[#allocation19 + $0x598] sm:$0xff] }
 0xfdb   :  { %v10758_v45 = vpop.eup %10757 }
 0xfdc   :  { %v3809_v47 = vmul.f32 %v10758_v45, %v3801_v19  ;;  %v3849_v19 = vld [vmem:[#allocation16 + $0x4c0] sm:$0xff] }
 0xfdd   :  { %v4610_v45 = vld [vmem:[#allocation19 + $0x580] sm:$0xff] }
 0xfde   :  { %v3816_v50 = vmul.f32 %v10398_v46, %v3809_v47  ;;  %v4612_v46 = vld [vmem:[#allocation19 + $0x590] sm:$0xff]  ;;  %v4595_v47 = vld [vmem:[#allocation19 + $0x508] sm:$0xff] }
 0xfe0   :  { %v11682_v51 = vadd.f32 %v10399_v48, %v3816_v50  ;;  %v4597_v48 = vld [vmem:[#allocation19 + $0x518] sm:$0xff]  ;;  %v4594_v50 = vld [vmem:[#allocation19 + $0x500] sm:$0xff] }
 0xfe2   :  { %10400 = vmatmul.mubr.msk.f32.vlgmr.msra.gmra.mxu1 %vm429_vm2, %v11682_v51  ;;  %10401 = vmatmul.mubr.msk.f32.vlgmr.msra.gmra.mxu0 %vm429_vm2, %v11682_v51 }
 0xfe3   :  { %4144 = vmatpush1.msra.mxu1 %v3877_v52  ;;  %4215 = vmatpush1.msra.mxu0 %v3879_v53  ;;  %v4596_v52 = vld [vmem:[#allocation19 + $0x510] sm:$0xff]  ;;  %v4579_v53 = vld [vmem:[#allocation19 + $0x488] sm:$0xff] }
 0xfe4   :  { %4145 = vmatprep.subr.mxu1 %v3862_v54  ;;  %4216 = vmatprep.subr.mxu0 %v3864_v55  ;;  %v4581_v54 = vld [vmem:[#allocation19 + $0x498] sm:$0xff]  ;;  %v4578_v55 = vld [vmem:[#allocation19 + $0x480] sm:$0xff] }
 0xfe5   :  { %4146 = vmatpush1.msra.mxu1 %v3861_v56  ;;  %4217 = vmatpush1.msra.mxu0 %v3863_v57  ;;  %v4580_v56 = vld [vmem:[#allocation19 + $0x490] sm:$0xff]  ;;  %v4563_v57 = vld [vmem:[#allocation19 + $0x408] sm:$0xff] }
 0xfe6   :  { %4147 = vmatprep.subr.mxu1 %v3846_v59  ;;  %4218 = vmatprep.subr.mxu0 %v3848_v60  ;;  %v4565_v59 = vld [vmem:[#allocation19 + $0x418] sm:$0xff]  ;;  %v4562_v60 = vld [vmem:[#allocation19 + $0x400] sm:$0xff] }
 0xfe7   :  { %4148 = vmatpush1.msra.mxu1 %v3845_v61  ;;  %4219 = vmatpush1.msra.mxu0 %v3847_v2  ;;  %v4564_v61 = vld [vmem:[#allocation19 + $0x410] sm:$0xff]  ;;  %v4615_v2 = vld [vmem:[#allocation19 + $0x5a8] sm:$0xff] }
 0xfe8   :  { %4149 = vmatprep.subr.mxu1 %v3830_v5  ;;  %4220 = vmatprep.subr.mxu0 %v3832_v6  ;;  %v4617_v5 = vld [vmem:[#allocation19 + $0x5b8] sm:$0xff]  ;;  %v3890_v6 = vld [vmem:[#allocation17 + $0x20] sm:$0xff] }
 0xfe9   :  { %4150 = vmatpush1.msra.mxu1 %v3829_v7  ;;  %4183 = vmatprep.mubr.f32.mxu1 %v11249_v0  ;;  %v3897_v7 = vrot.slane %v3890_v6, %v11519_v63 }
 0xfea   :  { %4221 = vmatpush1.msra.mxu0 %v3831_v8  ;;  %4254 = vmatprep.mubr.f32.mxu0 %v11249_v0  ;;  %v3905_v8 = vrot.slane %v3890_v6, %v11522_v1 }
 0xfeb   :  { %10402 = vmatmul.mubr.msk.f32.vlgmr.msra.gmra.mxu1 %vm429_vm2, %v11682_v51  ;;  %10403 = vmatmul.mubr.msk.f32.vlgmr.msra.gmra.mxu0 %vm429_vm2, %v11682_v51 }
 0xfec   :  { %4285 = vmatprep.subr.mxu1 %v3882_v9  ;;  %4356 = vmatprep.subr.mxu0 %v3884_v49  ;;  %v3901_v9 = vrot.slane %v3890_v6, %v11527_v3  ;;  %v3909_v49 = vrot.slane %v3890_v6, %v11530_v4 }
 0xfed   :  { %4286 = vmatpush1.msra.mxu1 %v3881_v58  ;;  %4357 = vmatpush1.msra.mxu0 %v3883_v10 }
 0xfee   :  { %4287 = vmatprep.subr.mxu1 %v3866_v11  ;;  %4358 = vmatprep.subr.mxu0 %v3868_v12 }
 0xfef   :  { %4288 = vmatpush1.msra.mxu1 %v3865_v13  ;;  %4359 = vmatpush1.msra.mxu0 %v3867_v14 }
 0xff0   :  { %4289 = vmatprep.subr.mxu1 %v3850_v15  ;;  %4360 = vmatprep.subr.mxu0 %v3852_v16 }
 0xff1   :  { %4290 = vmatpush1.msra.mxu1 %v3849_v19  ;;  %4361 = vmatpush1.msra.mxu0 %v3851_v20 }
 0xff2   :  { %4291 = vmatprep.subr.mxu1 %v3834_v21  ;;  %4362 = vmatprep.subr.mxu0 %v3836_v22 }
 0xff3   :  { %4292 = vmatpush1.msra.mxu1 %v3833_v23  ;;  %4325 = vmatprep.mubr.f32.mxu1 %v11249_v0  ;;  %v4614_v23 = vld [vmem:[#allocation19 + $0x5a0] sm:$0xff] }
 0xff4   :  { %4363 = vmatpush1.msra.mxu0 %v3835_v24  ;;  %4396 = vmatprep.mubr.f32.mxu0 %v11249_v0  ;;  %v4616_v24 = vld [vmem:[#allocation19 + $0x5b0] sm:$0xff] }
 0xff5   :  { %10404 = vmatmul.mubr.msk.f32.vlgmr.msra.gmra.mxu1 %vm429_vm2, %v11682_v51  ;;  %10405 = vmatmul.mubr.msk.f32.vlgmr.msra.gmra.mxu0 %vm429_vm2, %v11682_v51 }
 0xff6   :  { %4427 = vmatprep.subr.mxu1 %v3886_v25  ;;  %4498 = vmatprep.subr.mxu0 %v3888_v26  ;;  %v4599_v25 = vld [vmem:[#allocation19 + $0x528] sm:$0xff]  ;;  %v4601_v26 = vld [vmem:[#allocation19 + $0x538] sm:$0xff] }
 0xff7   :  { %4428 = vmatpush1.msra.mxu1 %v3885_v27  ;;  %4499 = vmatpush1.msra.mxu0 %v3887_v28  ;;  %v3917_v27 = vrot.slane %v3890_v6, %v11541_v17  ;;  %v3925_v28 = vrot.slane %v3890_v6, %v11544_v18 }
 0xff8   :  { %4429 = vmatprep.subr.mxu1 %v3870_v29  ;;  %4500 = vmatprep.subr.mxu0 %v3872_v30 }
 0xff9   :  { %4430 = vmatpush1.msra.mxu1 %v3869_v33  ;;  %4501 = vmatpush1.msra.mxu0 %v3871_v34  ;;  %v4598_v33 = vld [vmem:[#allocation19 + $0x520] sm:$0xff]  ;;  %v4600_v34 = vld [vmem:[#allocation19 + $0x530] sm:$0xff] }
 0xffa   :  { %4431 = vmatprep.subr.mxu1 %v3854_v35  ;;  %4502 = vmatprep.subr.mxu0 %v3856_v36 }
 0xffb   :  { %4432 = vmatpush1.msra.mxu1 %v3853_v37  ;;  %4503 = vmatpush1.msra.mxu0 %v3855_v38  ;;  %v4583_v37 = vld [vmem:[#allocation19 + $0x4a8] sm:$0xff]  ;;  %v4585_v38 = vld [vmem:[#allocation19 + $0x4b8] sm:$0xff] }
 0xffc   :  { %4433 = vmatprep.subr.mxu1 %v3838_v39  ;;  %4504 = vmatprep.subr.mxu0 %v3840_v40 }
 0xffd   :  { %4434 = vmatpush1.msra.mxu1 %v3837_v41  ;;  %4467 = vmatprep.mubr.f32.mxu1 %v11249_v0  ;;  %v3913_v41 = vrot.slane %v3890_v6, %v11551_v31 }
 0xffe   :  { %4505 = vmatpush1.msra.mxu0 %v3839_v42  ;;  %4538 = vmatprep.mubr.f32.mxu0 %v11249_v0  ;;  %v3921_v42 = vrot.slane %v3890_v6, %v11554_v32 }
 0xfff   :  { %10406 = vmatmul.mubr.msk.f32.vlgmr.msra.gmra.mxu1 %vm429_vm2, %v11682_v51  ;;  %10407 = vmatmul.mubr.msk.f32.vlgmr.msra.gmra.mxu0 %vm429_vm2, %v11682_v51 }
0x1000   :  { %4658 = vmatprep.subr.mxu1 %v4611_v43  ;;  %4728 = vmatprep.subr.mxu0 %v4613_v44 }
0x1001   :  { %4659 = vmatpush1.xpose.msra.mxu1 %v4610_v45  ;;  %4729 = vmatpush1.xpose.msra.mxu0 %v4612_v46  ;;  %v4582_v45 = vld [vmem:[#allocation19 + $0x4a0] sm:$0xff]  ;;  %v4584_v46 = vld [vmem:[#allocation19 + $0x4b0] sm:$0xff] }
0x1002   :  { %4660 = vmatprep.subr.mxu1 %v4595_v47  ;;  %4730 = vmatprep.subr.mxu0 %v4597_v48  ;;  %v4567_v47 = vld [vmem:[#allocation19 + $0x428] sm:$0xff]  ;;  %v4569_v48 = vld [vmem:[#allocation19 + $0x438] sm:$0xff] }
0x1005   :  { %4661 = vmatpush1.xpose.msra.mxu1 %v4594_v50  ;;  %4731 = vmatpush1.xpose.msra.mxu0 %v4596_v52  ;;  %v11714_v50 = vld [vmem:[#allocation17 + $0x28] sm:$0xff] }
0x1006   :  { %4662 = vmatprep.subr.mxu1 %v4579_v53  ;;  %4732 = vmatprep.subr.mxu0 %v4581_v54  ;;  %v3933_v52 = vrot.slane %v11714_v50, %v11527_v3 }
0x1009   :  { %4663 = vmatpush1.xpose.msra.mxu1 %v4578_v55  ;;  %4733 = vmatpush1.xpose.msra.mxu0 %v4580_v56  ;;  %v3941_v55 = vrot.slane %v11714_v50, %v11530_v4  ;;  %v4566_v56 = vld [vmem:[#allocation19 + $0x420] sm:$0xff] }
0x100a   :  { %4664 = vmatprep.subr.mxu1 %v4563_v57  ;;  %4734 = vmatprep.subr.mxu0 %v4565_v59  ;;  %v4568_v57 = vld [vmem:[#allocation19 + $0x430] sm:$0xff] }
0x100d   :  { %4665 = vmatpush1.xpose.msra.mxu1 %v4562_v60  ;;  %4735 = vmatpush1.xpose.msra.mxu0 %v4564_v61  ;;  %v4619_v61 = vld [vmem:[#allocation19 + $0x5c8] sm:$0xff] }
0x100e   :  { %4798 = vmatprep.subr.mxu1 %v4615_v2  ;;  %4868 = vmatprep.subr.mxu0 %v4617_v5  ;;  %v4621_v2 = vld [vmem:[#allocation19 + $0x5d8] sm:$0xff] }
0x10a2   :  { %v4043_v58 = vpop.f32.mrf.mxu1  ;;  %v4114_v10 = vpop.f32.mrf.mxu0 }
0x10a3   :  { %v4044_v11 = vadd.f32 %v4043_v58, %v3897_v7  ;;  %v4115_v12 = vadd.f32 %v4114_v10, %v3905_v8  ;;  %v4618_v58 = vld [vmem:[#allocation19 + $0x5c0] sm:$0xff]  ;;  %v4620_v10 = vld [vmem:[#allocation19 + $0x5d0] sm:$0xff] }
0x10a4   :  { %v4045_v13 = vpop.f32.mrf.mxu1  ;;  %v4116_v14 = vpop.f32.mrf.mxu0 }
0x10a5   :  { %v4046_v15 = vadd.f32 %v4045_v13, %v3901_v9  ;;  %v4117_v16 = vadd.f32 %v4116_v14, %v3909_v49  ;;  %v4545_v21 = vmax.f32 %v4044_v11, 0.0  ;;  %v4547_v22 = vmax.f32 %v4115_v12, 0.0  ;;  %v4603_v13 = vld [vmem:[#allocation19 + $0x548] sm:$0xff]  ;;  %v4605_v14 = vld [vmem:[#allocation19 + $0x558] sm:$0xff] }
0x10a7   :  { %v4546_v19 = vmax.f32 %v4046_v15, 0.0  ;;  %v4548_v20 = vmax.f32 %v4117_v16, 0.0  ;;  %v4602_v15 = vld [vmem:[#allocation19 + $0x540] sm:$0xff]  ;;  %v4604_v16 = vld [vmem:[#allocation19 + $0x550] sm:$0xff] }
0x10a9   :  { %4698 = vmatprep.mubr.f32.mxu1 %v4546_v19  ;;  %4768 = vmatprep.mubr.f32.mxu0 %v4548_v20  ;;  %v4587_v19 = vld [vmem:[#allocation19 + $0x4c8] sm:$0xff]  ;;  %v4589_v20 = vld [vmem:[#allocation19 + $0x4d8] sm:$0xff] }
0x10aa   :  { %4699 = vmatmul.mubr.f32.vlgmr.msra.gmra.mxu1 %v4545_v21  ;;  %4769 = vmatmul.mubr.f32.vlgmr.msra.gmra.mxu0 %v4547_v22 }
0x10ab   :  { %v4185_v29 = vpop.f32.mrf.mxu1  ;;  %v4256_v30 = vpop.f32.mrf.mxu0  ;;  %4799 = vmatpush1.xpose.msra.mxu1 %v4614_v23  ;;  %4869 = vmatpush1.xpose.msra.mxu0 %v4616_v24  ;;  %v3929_v23 = vrot.slane %v11714_v50, %v11519_v63  ;;  %v3937_v24 = vrot.slane %v11714_v50, %v11522_v1 }
0x10ac   :  { %4800 = vmatprep.subr.mxu1 %v4599_v25  ;;  %4870 = vmatprep.subr.mxu0 %v4601_v26  ;;  %v4186_v53 = vadd.f32 %v4185_v29, %v3913_v41  ;;  %v4257_v54 = vadd.f32 %v4256_v30, %v3921_v42  ;;  %v4586_v25 = vld [vmem:[#allocation19 + $0x4c0] sm:$0xff]  ;;  %v4588_v26 = vld [vmem:[#allocation19 + $0x4d0] sm:$0xff]  ;;  %v4573_v29 = vld [vmem:[#allocation19 + $0x458] sm:$0xff] }
0x10ad   :  { %v4187_v35 = vpop.f32.mrf.mxu1  ;;  %v4258_v36 = vpop.f32.mrf.mxu0  ;;  %v4625_v41 = vld [vmem:[#allocation19 + $0x5f8] sm:$0xff] }
0x10ae   :  { %v4188_v39 = vadd.f32 %v4187_v35, %v3917_v27  ;;  %v4259_v40 = vadd.f32 %v4258_v36, %v3925_v28  ;;  %v4549_v7 = vmax.f32 %v4186_v53, 0.0  ;;  %v4551_v8 = vmax.f32 %v4257_v54, 0.0  ;;  %v4571_v28 = vld [vmem:[#allocation19 + $0x448] sm:$0xff]  ;;  %v4609_v53 = vld [vmem:[#allocation19 + $0x578] sm:$0xff]  ;;  %v4606_v54 = vld [vmem:[#allocation19 + $0x560] sm:$0xff] }
0x10af   :  { %4801 = vmatpush1.xpose.msra.mxu1 %v4598_v33  ;;  %4871 = vmatpush1.xpose.msra.mxu0 %v4600_v34  ;;  %v3949_v27 = vrot.slane %v11714_v50, %v11541_v17  ;;  %v3957_v33 = vrot.slane %v11714_v50, %v11544_v18 }
0x10b0   :  { %v4550_v43 = vmax.f32 %v4188_v39, 0.0  ;;  %v4552_v44 = vmax.f32 %v4259_v40, 0.0  ;;  %4802 = vmatprep.subr.mxu1 %v4583_v37  ;;  %4872 = vmatprep.subr.mxu0 %v4585_v38  ;;  %v4570_v37 = vld [vmem:[#allocation19 + $0x440] sm:$0xff]  ;;  %v4572_v38 = vld [vmem:[#allocation19 + $0x450] sm:$0xff]  ;;  %v4623_v40 = vld [vmem:[#allocation19 + $0x5e8] sm:$0xff] }
0x10b2   :  { %4838 = vmatprep.mubr.f32.mxu1 %v4550_v43  ;;  %4908 = vmatprep.mubr.f32.mxu0 %v4552_v44 }
0x10b3   :  { %4803 = vmatpush1.xpose.msra.mxu1 %v4582_v45  ;;  %4873 = vmatpush1.xpose.msra.mxu0 %v4584_v46  ;;  %v4622_v45 = vld [vmem:[#allocation19 + $0x5e0] sm:$0xff] }
0x10b4   :  { %4804 = vmatprep.subr.mxu1 %v4567_v47  ;;  %4874 = vmatprep.subr.mxu0 %v4569_v48  ;;  %v4624_v47 = vld [vmem:[#allocation19 + $0x5f0] sm:$0xff] }
0x10b5   :  { %v4327_v59 = vpop.f32.mrf.mxu1  ;;  %v4398_v60 = vpop.f32.mrf.mxu0 }
0x10b6   :  { %v4328_v35 = vadd.f32 %v4327_v59, %v3929_v23  ;;  %v4399_v36 = vadd.f32 %v4398_v60, %v3937_v24  ;;  %v3945_v59 = vrot.slane %v11714_v50, %v11551_v31  ;;  %v4590_v60 = vld [vmem:[#allocation19 + $0x4e0] sm:$0xff] }
0x10b7   :  { %v4329_v5 = vpop.f32.mrf.mxu1  ;;  %v4400_v6 = vpop.f32.mrf.mxu0  ;;  %4805 = vmatpush1.xpose.msra.mxu1 %v4566_v56  ;;  %4875 = vmatpush1.xpose.msra.mxu0 %v4568_v57  ;;  %v4591_v56 = vld [vmem:[#allocation19 + $0x4e8] sm:$0xff]  ;;  %v4593_v57 = vld [vmem:[#allocation19 + $0x4f8] sm:$0xff] }
0x10b8   :  { %v4330_v9 = vadd.f32 %v4329_v5, %v3933_v52  ;;  %v4401_v49 = vadd.f32 %v4400_v6, %v3941_v55  ;;  %4938 = vmatprep.subr.mxu1 %v4619_v61  ;;  %5008 = vmatprep.subr.mxu0 %v4621_v2  ;;  %v4553_v43 = vmax.f32 %v4328_v35, 0.0  ;;  %v4555_v44 = vmax.f32 %v4399_v36, 0.0  ;;  %v4607_v52 = vld [vmem:[#allocation19 + $0x568] sm:$0xff]  ;;  %v4608_v55 = vld [vmem:[#allocation19 + $0x570] sm:$0xff]  ;;  %v4577_v6 = vld [vmem:[#allocation19 + $0x478] sm:$0xff] }
0x10b9   :  { %v3953_v61 = vrot.slane %v11714_v50, %v11554_v32  ;;  %v4592_v2 = vld [vmem:[#allocation19 + $0x4f0] sm:$0xff]  ;;  %v4575_v5 = vld [vmem:[#allocation19 + $0x468] sm:$0xff] }
0x10ba   :  { %v4554_v11 = vmax.f32 %v4330_v9, 0.0  ;;  %v4556_v12 = vmax.f32 %v4401_v49, 0.0  ;;  %4839 = vmatmul.mubr.f32.vlgmr.msra.gmra.mxu1 %v4549_v7  ;;  %4909 = vmatmul.mubr.f32.vlgmr.msra.gmra.mxu0 %v4551_v8  ;;  %v4574_v8 = vld [vmem:[#allocation19 + $0x460] sm:$0xff]  ;;  %v4576_v49 = vld [vmem:[#allocation19 + $0x470] sm:$0xff] }
0x10bb   :  { %4939 = vmatpush1.xpose.msra.mxu1 %v4618_v58  ;;  %5009 = vmatpush1.xpose.msra.mxu0 %v4620_v10 }
0x10bc   :  { %4978 = vmatprep.mubr.f32.mxu1 %v4554_v11  ;;  %5048 = vmatprep.mubr.f32.mxu0 %v4556_v12 }
0x10bd   :  { %4940 = vmatprep.subr.mxu1 %v4603_v13  ;;  %5010 = vmatprep.subr.mxu0 %v4605_v14 }
0x10bf   :  { %v11720_v21 = vpop.f32.mrf.mxu1  ;;  %v11722_v22 = vpop.f32.mrf.mxu0  ;;  %4941 = vmatpush1.xpose.msra.mxu1 %v4602_v15  ;;  %5011 = vmatpush1.xpose.msra.mxu0 %v4604_v16 }
0x10c0   :  { %4942 = vmatprep.subr.mxu1 %v4587_v19  ;;  %5012 = vmatprep.subr.mxu0 %v4589_v20  ;;  %v4470_v7 = vadd.f32 %v11720_v21, %v3945_v59  ;;  %v4541_v9 = vadd.f32 %v11722_v22, %v3953_v61  ;;  %v10408_v20 = vld [vmem:[#allocation20 + $0x2] ss:$0 sm:$0xff]  ;;  %v10409_v59 = vld [vmem:[#allocation22 + $0x2] ss:$0 sm:$0xff]  ;;  %v10410_v61 = vld [vmem:[#allocation23 + $0x2] ss:$0 sm:$0xff] }
0x10c1   :  { %v4471_v30 = vpop.f32.mrf.mxu1  ;;  %v4542_v34 = vpop.f32.mrf.mxu0 }
0x10c2   :  { %v4472_v39 = vadd.f32 %v4471_v30, %v3949_v27  ;;  %v4543_v42 = vadd.f32 %v4542_v34, %v3957_v33  ;;  %v4557_v58 = vmax.f32 %v4470_v7, 0.0  ;;  %v4559_v50 = vmax.f32 %v4541_v9, 0.0  ;;  %v5313_v7 = vld [vmem:[#allocation10 + $0x60] sm:$0xff] }
0x10c3   :  { %4943 = vmatpush1.xpose.msra.mxu1 %v4586_v25  ;;  %5013 = vmatpush1.xpose.msra.mxu0 %v4588_v26 }
0x10c4   :  { %4944 = vmatprep.subr.mxu1 %v4571_v28  ;;  %5014 = vmatprep.subr.mxu0 %v4573_v29  ;;  %v4558_v46 = vmax.f32 %v4472_v39, 0.0  ;;  %v4560_v48 = vmax.f32 %v4543_v42, 0.0 }
0x10c7   :  { %4945 = vmatpush1.xpose.msra.mxu1 %v4570_v37  ;;  %5015 = vmatpush1.xpose.msra.mxu0 %v4572_v38 }
0x10c8   :  { %5078 = vmatprep.subr.mxu1 %v4623_v40  ;;  %5148 = vmatprep.subr.mxu0 %v4625_v41 }
0x10ca   :  { %4979 = vmatmul.mubr.f32.vlgmr.msra.gmra.mxu1 %v4553_v43  ;;  %5049 = vmatmul.mubr.f32.vlgmr.msra.gmra.mxu0 %v4555_v44 }
0x10cb   :  { %5079 = vmatpush1.xpose.msra.mxu1 %v4622_v45  ;;  %5118 = vmatprep.mubr.f32.mxu1 %v4558_v46  ;;  %v5230_v46 = vld [vmem:[#allocation7 + $0x78] sm:$0xff] }
0x10cc   :  { %5149 = vmatpush1.xpose.msra.mxu0 %v4624_v47  ;;  %5188 = vmatprep.mubr.f32.mxu0 %v4560_v48  ;;  %v5229_v47 = vld [vmem:[#allocation7 + $0x70] sm:$0xff]  ;;  %v5228_v48 = vld [vmem:[#allocation7 + $0x68] sm:$0xff] }
0x10cd   :  { %5080 = vmatprep.subr.mxu1 %v4607_v52  ;;  %5150 = vmatprep.subr.mxu0 %v4609_v53  ;;  %v5316_v52 = vld [vmem:[#allocation10 + $0x78] sm:$0xff]  ;;  %v5315_v53 = vld [vmem:[#allocation10 + $0x70] sm:$0xff] }
0x10cf   :  { %5081 = vmatpush1.xpose.msra.mxu1 %v4606_v54 }
0x10d0   :  { %5151 = vmatpush1.xpose.msra.mxu0 %v4608_v55  ;;  %5082 = vmatprep.subr.mxu1 %v4591_v56 }
0x10d1   :  { %5152 = vmatprep.subr.mxu0 %v4593_v57 }
0x10d3   :  { %5083 = vmatpush1.xpose.msra.mxu1 %v4590_v60 }
0x10d4   :  { %5153 = vmatpush1.xpose.msra.mxu0 %v4592_v2  ;;  %5084 = vmatprep.subr.mxu1 %v4575_v5 }
0x10d5   :  { %5154 = vmatprep.subr.mxu0 %v4577_v6  ;;  %v5314_v6 = vld [vmem:[#allocation10 + $0x68] sm:$0xff] }
0x10d7   :  { %5085 = vmatpush1.xpose.msra.mxu1 %v4574_v8  ;;  %v10411_v8 = vld [vmem:[#allocation8 + $0x3] ss:$0 sm:$0xff] }
0x10d8   :  { %5155 = vmatpush1.xpose.msra.mxu0 %v4576_v49  ;;  %10620 = vmatprep.subr.mxu1 %v11249_v0 }
0x10d9   :  { %10631 = vmatprep.subr.mxu0 %v11249_v0 }
0x10da   :  { %5119 = vmatmul.mubr.f32.vlgmr.msra.gmra.mxu1 %v4557_v58 }
0x10db   :  { %5189 = vmatmul.mubr.f32.vlgmr.msra.gmra.mxu0 %v4559_v50  ;;  %10628 = vmatprep.mubr.msk.f32.mxu1 %vm11250_vm0, %v11249_v0  ;;  %v10413_v50 = vld [vmem:[#allocation11 + $0x3] ss:$0 sm:$0xff] }
0x10dc   :  { %10639 = vmatprep.mubr.msk.f32.mxu0 %vm11250_vm0, %v11249_v0  ;;  %10621 = vmatpush3.msra.mxu1 %v5230_v46  ;;  %v10415_v46 = vld [vmem:[#allocation13 + $0x3] ss:$0 sm:$0xff] }
0x10dd   :  { %10622 = vmatprep.subr.mxu1 %v11249_v0  ;;  %10632 = vmatpush3.msra.mxu0 %v5316_v52 }
0x10de   :  { %10623 = vmatpush3.msra.mxu1 %v5229_v47  ;;  %10633 = vmatprep.subr.mxu0 %v11249_v0 }
0x10df   :  { %10624 = vmatprep.subr.mxu1 %v11249_v0  ;;  %10634 = vmatpush3.msra.mxu0 %v5315_v53  ;;  %v5483_v53 = vld [vmem:[#allocation16 + $0x7a0] sm:$0xff] }
0x10e0   :  { %10625 = vmatpush3.msra.mxu1 %v5228_v48  ;;  %10635 = vmatprep.subr.mxu0 %v11249_v0  ;;  %v10416_v48 = vld [vmem:[#allocation14 + $0x3] ss:$0 sm:$0xff] }
0x10e1   :  { %10626 = vmatprep.subr.mxu1 %v11249_v0  ;;  %10636 = vmatpush3.msra.mxu0 %v5314_v6  ;;  %v5436_v6 = vld [vmem:[#allocation16 + $0x628] sm:$0xff] }
0x10e2   :  { %10637 = vmatprep.subr.mxu0 %v11249_v0 }
0x10e3   :  { %10638 = vmatpush3.msra.mxu0 %v5313_v7  ;;  %v5438_v7 = vld [vmem:[#allocation16 + $0x638] sm:$0xff] }
0x116a   :  { %v4700_v10 = vpop.f32.mrf.mxu1  ;;  %v4770_v11 = vpop.f32.mrf.mxu0 }
0x116b   :  { %v4701_v21 = vadd.f32 %v10408_v20, %v4700_v10 }
0x116c   :  { %v4702_v12 = vpop.f32.mrf.mxu1  ;;  %v4772_v13 = vpop.f32.mrf.mxu0 }
0x116d   :  { %v4771_v26 = vadd.f32 %v4770_v11, %v4701_v21 }
0x117a   :  { %v4840_v14 = vpop.f32.mrf.mxu1  ;;  %v4910_v15 = vpop.f32.mrf.mxu0 }
0x117b   :  { %v4841_v27 = vadd.f32 %v4840_v14, %v4771_v26  ;;  %v5464_v26 = vld [vmem:[#allocation16 + $0x708] sm:$0xff] }
0x117c   :  { %v4842_v16 = vpop.f32.mrf.mxu1  ;;  %v4912_v19 = vpop.f32.mrf.mxu0 }
0x117d   :  { %v4911_v28 = vadd.f32 %v4910_v15, %v4841_v27  ;;  %v5466_v27 = vld [vmem:[#allocation16 + $0x718] sm:$0xff] }
0x118a   :  { %v4980_v22 = vpop.f32.mrf.mxu1  ;;  %v5050_v23 = vpop.f32.mrf.mxu0 }
0x118b   :  { %v4981_v29 = vadd.f32 %v4980_v22, %v4911_v28  ;;  %v5480_v22 = vld [vmem:[#allocation16 + $0x788] sm:$0xff]  ;;  %v5463_v28 = vld [vmem:[#allocation16 + $0x700] sm:$0xff] }
0x118c   :  { %v4982_v24 = vpop.f32.mrf.mxu1  ;;  %v5052_v25 = vpop.f32.mrf.mxu0 }
0x118d   :  { %v5051_v30 = vadd.f32 %v5050_v23, %v4981_v29  ;;  %v5482_v23 = vld [vmem:[#allocation16 + $0x798] sm:$0xff]  ;;  %v5479_v24 = vld [vmem:[#allocation16 + $0x780] sm:$0xff]  ;;  %v5481_v25 = vld [vmem:[#allocation16 + $0x790] sm:$0xff] }
0x118e   :  { %5678 = vmatprep.subr.mxu0 %v5482_v23  ;;  %v5465_v29 = vld [vmem:[#allocation16 + $0x710] sm:$0xff]  ;;  %v5439_v23 = vld [vmem:[#allocation16 + $0x640] sm:$0xff] }
0x119a   :  { %v5120_v33 = vpop.f32.mrf.mxu1 }
0x119b   :  { %v5121_v34 = vadd.f32 %v5120_v33, %v5051_v30  ;;  %v5190_v35 = vpop.f32.mrf.mxu0  ;;  %v5448_v30 = vld [vmem:[#allocation16 + $0x688] sm:$0xff]  ;;  %v5450_v33 = vld [vmem:[#allocation16 + $0x698] sm:$0xff] }
0x119c   :  { %v5122_v36 = vpop.f32.mrf.mxu1 }
0x119d   :  { %v5191_v37 = vadd.f32 %v5190_v35, %v5121_v34  ;;  %v5192_v38 = vpop.f32.mrf.mxu0  ;;  %v5447_v34 = vld [vmem:[#allocation16 + $0x680] sm:$0xff]  ;;  %v5449_v35 = vld [vmem:[#allocation16 + $0x690] sm:$0xff]  ;;  %v5432_v36 = vld [vmem:[#allocation16 + $0x608] sm:$0xff] }
0x119e   :  { %v5431_v38 = vld [vmem:[#allocation16 + $0x600] sm:$0xff] }
0x119f   :  { %v5194_v39 = vadd.f32 %v5191_v37, %v11682_v51  ;;  %v5227_v51 = vld [vmem:[#allocation7 + $0x60] sm:$0xff]  ;;  %v5434_v37 = vld [vmem:[#allocation16 + $0x618] sm:$0xff] }
0x11a0   :  { %10627 = vmatpush3.msra.mxu1 %v5227_v51 }
0x11a1   :  { %v5199_v40 = vsel %vm429_vm2, %v5194_v39, 0.0  ;;  %5607 = vmatprep.subr.mxu1 %v5480_v22  ;;  %v5442_v22 = vld [vmem:[#allocation16 + $0x658] sm:$0xff] }
0x11a2   :  { %5200 = vadd.xlane.f32.xlu0 %v5199_v40  ;;  %v5484_v40 = vld [vmem:[#allocation16 + $0x7a8] sm:$0xff] }
0x122b   :  { %v5201_v41 = vpop.xlane.xlu0 %5200 }
0x122c   :  { %v5202_v42 = vmul.f32 0.03125, %v5201_v41  ;;  %v5486_v41 = vld [vmem:[#allocation16 + $0x7b8] sm:$0xff] }
0x122e   :  { %v5203_v43 = vsub.f32 %v5194_v39, %v5202_v42  ;;  %v5433_v39 = vld [vmem:[#allocation16 + $0x610] sm:$0xff] }
0x1230   :  { %v5204_v44 = vmul.f32 %v5203_v43, %v5203_v43 }
0x1232   :  { %v5205_v45 = vsel %vm429_vm2, %v5204_v44, 0.0 }
0x1233   :  { %5206 = vadd.xlane.f32.xlu1 %v5205_v45 }
0x12bc   :  { %v5207_v54 = vpop.xlane.xlu1 %5206 }
0x12bd   :  { %v5208_v55 = vmul.f32 0.03125, %v5207_v54  ;;  %v5485_v54 = vld [vmem:[#allocation16 + $0x7b0] sm:$0xff] }
0x12bf   :  { %v5209_v56 = vadd.f32 1e-05, %v5208_v55  ;;  %v5468_v55 = vld [vmem:[#allocation16 + $0x728] sm:$0xff] }
0x12c1   :  { %10759 = vrsqrt.f32 %v5209_v56  ;;  %v5470_v56 = vld [vmem:[#allocation16 + $0x738] sm:$0xff] }
0x12ce   :  { %v10760_v57 = vpop.eup %10759 }
0x12cf   :  { %v5211_v60 = vmul.f32 %v10760_v57, %v5203_v43  ;;  %v5467_v57 = vld [vmem:[#allocation16 + $0x720] sm:$0xff] }
0x12d1   :  { %v5218_v2 = vmul.f32 %v10409_v59, %v5211_v60  ;;  %v5469_v59 = vld [vmem:[#allocation16 + $0x730] sm:$0xff]  ;;  %v5452_v60 = vld [vmem:[#allocation16 + $0x6a8] sm:$0xff] }
0x12d3   :  { %v5225_v5 = vadd.f32 %v10410_v61, %v5218_v2  ;;  %v5454_v61 = vld [vmem:[#allocation16 + $0x6b8] sm:$0xff]  ;;  %v5451_v2 = vld [vmem:[#allocation16 + $0x6a0] sm:$0xff] }
0x12d5   :  { %10629 = vmatmul.mubr.msk.f32.vlgmr.msra.gmra.mxu1 %vm429_vm2, %v5225_v5 }
0x12d6   :  { %5647 = vmatprep.mubr.f32.mxu1 %v11249_v0  ;;  %5608 = vmatpush1.msra.mxu1 %v5479_v24  ;;  %v5441_v24 = vld [vmem:[#allocation16 + $0x650] sm:$0xff] }
0x12d7   :  { %5609 = vmatprep.subr.mxu1 %v5464_v26  ;;  %v5494_v26 = vld [vmem:[#allocation16 + $0x7f8] sm:$0xff] }
0x12d8   :  { %5610 = vmatpush1.msra.mxu1 %v5463_v28  ;;  %v5493_v28 = vld [vmem:[#allocation16 + $0x7f0] sm:$0xff] }
0x12d9   :  { %5611 = vmatprep.subr.mxu1 %v5448_v30  ;;  %v5478_v30 = vld [vmem:[#allocation16 + $0x778] sm:$0xff] }
0x12da   :  { %5612 = vmatpush1.msra.mxu1 %v5447_v34  ;;  %v5477_v34 = vld [vmem:[#allocation16 + $0x770] sm:$0xff] }
0x12db   :  { %5613 = vmatprep.subr.mxu1 %v5432_v36  ;;  %v5462_v36 = vld [vmem:[#allocation16 + $0x6f8] sm:$0xff] }
0x12dc   :  { %5614 = vmatpush1.msra.mxu1 %v5431_v38  ;;  %v5461_v38 = vld [vmem:[#allocation16 + $0x6f0] sm:$0xff] }
0x12dd   :  { %5749 = vmatprep.subr.mxu1 %v5484_v40  ;;  %v5446_v40 = vld [vmem:[#allocation16 + $0x678] sm:$0xff] }
0x1395   :  { %v5308_v9 = vpop.f32.mrf.mxu1 }
0x1396   :  { %v5309_v49 = vadd.f32 %v10411_v8, %v5308_v9  ;;  %v5435_v8 = vld [vmem:[#allocation16 + $0x620] sm:$0xff]  ;;  %v5437_v9 = vld [vmem:[#allocation16 + $0x630] sm:$0xff] }
0x1397   :  { %v10630_v58 = vpop.f32.mrf.mxu1 }
0x1398   :  { %10640 = vmatmul.mubr.msk.f32.vlgmr.msra.gmra.mxu0 %vm429_vm2, %v5309_v49  ;;  %v5488_v49 = vld [vmem:[#allocation16 + $0x7c8] sm:$0xff]  ;;  %v5490_v58 = vld [vmem:[#allocation16 + $0x7d8] sm:$0xff] }
0x1399   :  { %5718 = vmatprep.mubr.f32.mxu0 %v11249_v0  ;;  %5679 = vmatpush1.msra.mxu0 %v5481_v25  ;;  %v5492_v25 = vld [vmem:[#allocation16 + $0x7e8] sm:$0xff] }
0x139a   :  { %5680 = vmatprep.subr.mxu0 %v5466_v27  ;;  %v5491_v27 = vld [vmem:[#allocation16 + $0x7e0] sm:$0xff] }
0x139b   :  { %5681 = vmatpush1.msra.mxu0 %v5465_v29  ;;  %v5476_v29 = vld [vmem:[#allocation16 + $0x768] sm:$0xff] }
0x139c   :  { %5682 = vmatprep.subr.mxu0 %v5450_v33  ;;  %v5475_v33 = vld [vmem:[#allocation16 + $0x760] sm:$0xff] }
0x139d   :  { %5683 = vmatpush1.msra.mxu0 %v5449_v35  ;;  %v5460_v35 = vld [vmem:[#allocation16 + $0x6e8] sm:$0xff] }
0x139e   :  { %5684 = vmatprep.subr.mxu0 %v5434_v37  ;;  %v5459_v37 = vld [vmem:[#allocation16 + $0x6e0] sm:$0xff] }
0x139f   :  { %5685 = vmatpush1.msra.mxu0 %v5433_v39  ;;  %v5444_v39 = vld [vmem:[#allocation16 + $0x668] sm:$0xff] }
0x13a0   :  { %5820 = vmatprep.subr.mxu0 %v5486_v41  ;;  %v5443_v41 = vld [vmem:[#allocation16 + $0x660] sm:$0xff] }
0x1458   :  { %v5394_v10 = vpop.f32.mrf.mxu0 }
0x1459   :  { %v5395_v11 = vadd.f32 %v10413_v50, %v5394_v10  ;;  %v5487_v50 = vld [vmem:[#allocation16 + $0x7c0] sm:$0xff]  ;;  %v5489_v10 = vld [vmem:[#allocation16 + $0x7d0] sm:$0xff] }
0x145a   :  { %v10641_v12 = vpop.f32.mrf.mxu0 }
0x145b   :  { %v5398_v13 = vadd.f32 %v5395_v11, %v5225_v5  ;;  %v5453_v5 = vld [vmem:[#allocation16 + $0x6b0] sm:$0xff]  ;;  %v5472_v11 = vld [vmem:[#allocation16 + $0x748] sm:$0xff]  ;;  %v5474_v12 = vld [vmem:[#allocation16 + $0x758] sm:$0xff] }
0x145d   :  { %v5403_v14 = vsel %vm429_vm2, %v5398_v13, 0.0 }
0x145e   :  { %5404 = vadd.xlane.f32.xlu0 %v5403_v14  ;;  %v5473_v14 = vld [vmem:[#allocation16 + $0x750] sm:$0xff] }
0x14e7   :  { %v5405_v15 = vpop.xlane.xlu0 %5404 }
0x14e8   :  { %v5406_v16 = vmul.f32 0.03125, %v5405_v15  ;;  %v5456_v15 = vld [vmem:[#allocation16 + $0x6c8] sm:$0xff] }
0x14ea   :  { %v5407_v19 = vsub.f32 %v5398_v13, %v5406_v16  ;;  %v5471_v13 = vld [vmem:[#allocation16 + $0x740] sm:$0xff]  ;;  %v5458_v16 = vld [vmem:[#allocation16 + $0x6d8] sm:$0xff] }
0x14ec   :  { %v5408_v20 = vmul.f32 %v5407_v19, %v5407_v19 }
0x14ee   :  { %v5409_v21 = vsel %vm429_vm2, %v5408_v20, 0.0  ;;  %v5457_v20 = vld [vmem:[#allocation16 + $0x6d0] sm:$0xff] }
0x14ef   :  { %5410 = vadd.xlane.f32.xlu1 %v5409_v21  ;;  %v5440_v21 = vld [vmem:[#allocation16 + $0x648] sm:$0xff] }
0x1578   :  { %v5411_v42 = vpop.xlane.xlu1 %5410 }
0x1579   :  { %v5412_v43 = vmul.f32 0.03125, %v5411_v42  ;;  %v5445_v42 = vld [vmem:[#allocation16 + $0x670] sm:$0xff] }
0x157b   :  { %v5413_v44 = vadd.f32 1e-05, %v5412_v43  ;;  %v6217_v43 = vld [vmem:[#allocation19 + $0x788] sm:$0xff] }
0x157d   :  { %10761 = vrsqrt.f32 %v5413_v44  ;;  %v6219_v44 = vld [vmem:[#allocation19 + $0x798] sm:$0xff] }
0x158a   :  { %v10762_v45 = vpop.eup %10761 }
0x158b   :  { %v5415_v47 = vmul.f32 %v10762_v45, %v5407_v19  ;;  %v5455_v19 = vld [vmem:[#allocation16 + $0x6c0] sm:$0xff] }
0x158c   :  { %v6216_v45 = vld [vmem:[#allocation19 + $0x780] sm:$0xff] }
0x158d   :  { %v5422_v51 = vmul.f32 %v10415_v46, %v5415_v47  ;;  %v6218_v46 = vld [vmem:[#allocation19 + $0x790] sm:$0xff]  ;;  %v6201_v47 = vld [vmem:[#allocation19 + $0x708] sm:$0xff] }
0x158f   :  { %v11759_v52 = vadd.f32 %v10416_v48, %v5422_v51  ;;  %v6203_v48 = vld [vmem:[#allocation19 + $0x718] sm:$0xff]  ;;  %v6200_v51 = vld [vmem:[#allocation19 + $0x700] sm:$0xff] }
0x1591   :  { %10417 = vmatmul.mubr.msk.f32.vlgmr.msra.gmra.mxu1 %vm429_vm2, %v11759_v52  ;;  %10418 = vmatmul.mubr.msk.f32.vlgmr.msra.gmra.mxu0 %vm429_vm2, %v11759_v52 }
0x1592   :  { %5750 = vmatpush1.msra.mxu1 %v5483_v53  ;;  %5821 = vmatpush1.msra.mxu0 %v5485_v54  ;;  %v6202_v53 = vld [vmem:[#allocation19 + $0x710] sm:$0xff]  ;;  %v6185_v54 = vld [vmem:[#allocation19 + $0x688] sm:$0xff] }
0x1593   :  { %5751 = vmatprep.subr.mxu1 %v5468_v55  ;;  %5822 = vmatprep.subr.mxu0 %v5470_v56  ;;  %v6187_v55 = vld [vmem:[#allocation19 + $0x698] sm:$0xff]  ;;  %v6184_v56 = vld [vmem:[#allocation19 + $0x680] sm:$0xff] }
0x1594   :  { %5752 = vmatpush1.msra.mxu1 %v5467_v57  ;;  %5823 = vmatpush1.msra.mxu0 %v5469_v59  ;;  %v6186_v57 = vld [vmem:[#allocation19 + $0x690] sm:$0xff]  ;;  %v6169_v59 = vld [vmem:[#allocation19 + $0x608] sm:$0xff] }
0x1595   :  { %5753 = vmatprep.subr.mxu1 %v5452_v60  ;;  %5824 = vmatprep.subr.mxu0 %v5454_v61  ;;  %v6171_v60 = vld [vmem:[#allocation19 + $0x618] sm:$0xff]  ;;  %v6168_v61 = vld [vmem:[#allocation19 + $0x600] sm:$0xff] }
0x1596   :  { %5754 = vmatpush1.msra.mxu1 %v5451_v2  ;;  %5825 = vmatpush1.msra.mxu0 %v5453_v5  ;;  %v6170_v2 = vld [vmem:[#allocation19 + $0x610] sm:$0xff]  ;;  %v6221_v5 = vld [vmem:[#allocation19 + $0x7a8] sm:$0xff] }
0x1597   :  { %5755 = vmatprep.subr.mxu1 %v5436_v6  ;;  %5826 = vmatprep.subr.mxu0 %v5438_v7  ;;  %v6223_v6 = vld [vmem:[#allocation19 + $0x7b8] sm:$0xff]  ;;  %v5496_v7 = vld [vmem:[#allocation17 + $0x30] sm:$0xff] }
0x1598   :  { %5756 = vmatpush1.msra.mxu1 %v5435_v8  ;;  %5789 = vmatprep.mubr.f32.mxu1 %v11249_v0  ;;  %v5503_v8 = vrot.slane %v5496_v7, %v11519_v63 }
0x1599   :  { %5827 = vmatpush1.msra.mxu0 %v5437_v9  ;;  %5860 = vmatprep.mubr.f32.mxu0 %v11249_v0  ;;  %v5511_v9 = vrot.slane %v5496_v7, %v11522_v1 }
0x159a   :  { %10419 = vmatmul.mubr.msk.f32.vlgmr.msra.gmra.mxu1 %vm429_vm2, %v11759_v52  ;;  %10420 = vmatmul.mubr.msk.f32.vlgmr.msra.gmra.mxu0 %vm429_vm2, %v11759_v52 }
0x159b   :  { %5891 = vmatprep.subr.mxu1 %v5488_v49  ;;  %5962 = vmatprep.subr.mxu0 %v5490_v58  ;;  %v5507_v49 = vrot.slane %v5496_v7, %v11527_v3  ;;  %v5515_v58 = vrot.slane %v5496_v7, %v11530_v4 }
0x159c   :  { %5892 = vmatpush1.msra.mxu1 %v5487_v50  ;;  %5963 = vmatpush1.msra.mxu0 %v5489_v10 }
0x159d   :  { %5893 = vmatprep.subr.mxu1 %v5472_v11  ;;  %5964 = vmatprep.subr.mxu0 %v5474_v12 }
0x159e   :  { %5894 = vmatpush1.msra.mxu1 %v5471_v13  ;;  %5965 = vmatpush1.msra.mxu0 %v5473_v14 }
0x159f   :  { %5895 = vmatprep.subr.mxu1 %v5456_v15  ;;  %5966 = vmatprep.subr.mxu0 %v5458_v16 }
0x15a0   :  { %5896 = vmatpush1.msra.mxu1 %v5455_v19  ;;  %5967 = vmatpush1.msra.mxu0 %v5457_v20 }
0x15a1   :  { %5897 = vmatprep.subr.mxu1 %v5440_v21  ;;  %5968 = vmatprep.subr.mxu0 %v5442_v22 }
0x15a2   :  { %5898 = vmatpush1.msra.mxu1 %v5439_v23  ;;  %5931 = vmatprep.mubr.f32.mxu1 %v11249_v0  ;;  %v6220_v23 = vld [vmem:[#allocation19 + $0x7a0] sm:$0xff] }
0x15a3   :  { %5969 = vmatpush1.msra.mxu0 %v5441_v24  ;;  %6002 = vmatprep.mubr.f32.mxu0 %v11249_v0  ;;  %v6222_v24 = vld [vmem:[#allocation19 + $0x7b0] sm:$0xff] }
0x15a4   :  { %10421 = vmatmul.mubr.msk.f32.vlgmr.msra.gmra.mxu1 %vm429_vm2, %v11759_v52  ;;  %10422 = vmatmul.mubr.msk.f32.vlgmr.msra.gmra.mxu0 %vm429_vm2, %v11759_v52 }
0x15a5   :  { %6033 = vmatprep.subr.mxu1 %v5492_v25  ;;  %6104 = vmatprep.subr.mxu0 %v5494_v26  ;;  %v6205_v25 = vld [vmem:[#allocation19 + $0x728] sm:$0xff]  ;;  %v6207_v26 = vld [vmem:[#allocation19 + $0x738] sm:$0xff] }
0x15a6   :  { %6034 = vmatpush1.msra.mxu1 %v5491_v27  ;;  %6105 = vmatpush1.msra.mxu0 %v5493_v28  ;;  %v5523_v27 = vrot.slane %v5496_v7, %v11541_v17  ;;  %v5531_v28 = vrot.slane %v5496_v7, %v11544_v18 }
0x15a7   :  { %6035 = vmatprep.subr.mxu1 %v5476_v29  ;;  %6106 = vmatprep.subr.mxu0 %v5478_v30 }
0x15a8   :  { %6036 = vmatpush1.msra.mxu1 %v5475_v33  ;;  %6107 = vmatpush1.msra.mxu0 %v5477_v34  ;;  %v6204_v33 = vld [vmem:[#allocation19 + $0x720] sm:$0xff]  ;;  %v6206_v34 = vld [vmem:[#allocation19 + $0x730] sm:$0xff] }
0x15a9   :  { %6037 = vmatprep.subr.mxu1 %v5460_v35  ;;  %6108 = vmatprep.subr.mxu0 %v5462_v36 }
0x15aa   :  { %6038 = vmatpush1.msra.mxu1 %v5459_v37  ;;  %6109 = vmatpush1.msra.mxu0 %v5461_v38  ;;  %v6189_v37 = vld [vmem:[#allocation19 + $0x6a8] sm:$0xff]  ;;  %v6191_v38 = vld [vmem:[#allocation19 + $0x6b8] sm:$0xff] }
0x15ab   :  { %6039 = vmatprep.subr.mxu1 %v5444_v39  ;;  %6110 = vmatprep.subr.mxu0 %v5446_v40 }
0x15ac   :  { %6040 = vmatpush1.msra.mxu1 %v5443_v41  ;;  %6073 = vmatprep.mubr.f32.mxu1 %v11249_v0  ;;  %v5519_v41 = vrot.slane %v5496_v7, %v11551_v31 }
0x15ad   :  { %6111 = vmatpush1.msra.mxu0 %v5445_v42  ;;  %6144 = vmatprep.mubr.f32.mxu0 %v11249_v0  ;;  %v5527_v42 = vrot.slane %v5496_v7, %v11554_v32 }
0x15ae   :  { %10423 = vmatmul.mubr.msk.f32.vlgmr.msra.gmra.mxu1 %vm429_vm2, %v11759_v52  ;;  %10424 = vmatmul.mubr.msk.f32.vlgmr.msra.gmra.mxu0 %vm429_vm2, %v11759_v52 }
0x15af   :  { %6264 = vmatprep.subr.mxu1 %v6217_v43  ;;  %6334 = vmatprep.subr.mxu0 %v6219_v44 }
0x15b0   :  { %6265 = vmatpush1.xpose.msra.mxu1 %v6216_v45  ;;  %6335 = vmatpush1.xpose.msra.mxu0 %v6218_v46  ;;  %v6188_v45 = vld [vmem:[#allocation19 + $0x6a0] sm:$0xff]  ;;  %v6190_v46 = vld [vmem:[#allocation19 + $0x6b0] sm:$0xff] }
0x15b1   :  { %6266 = vmatprep.subr.mxu1 %v6201_v47  ;;  %6336 = vmatprep.subr.mxu0 %v6203_v48  ;;  %v6173_v47 = vld [vmem:[#allocation19 + $0x628] sm:$0xff]  ;;  %v6175_v48 = vld [vmem:[#allocation19 + $0x638] sm:$0xff] }
0x15b4   :  { %6267 = vmatpush1.xpose.msra.mxu1 %v6200_v51  ;;  %6337 = vmatpush1.xpose.msra.mxu0 %v6202_v53  ;;  %v11791_v51 = vld [vmem:[#allocation17 + $0x38] sm:$0xff] }
0x15b5   :  { %6268 = vmatprep.subr.mxu1 %v6185_v54  ;;  %6338 = vmatprep.subr.mxu0 %v6187_v55  ;;  %v5539_v53 = vrot.slane %v11791_v51, %v11527_v3 }
0x15b8   :  { %6269 = vmatpush1.xpose.msra.mxu1 %v6184_v56  ;;  %6339 = vmatpush1.xpose.msra.mxu0 %v6186_v57  ;;  %v5547_v56 = vrot.slane %v11791_v51, %v11530_v4  ;;  %v6172_v57 = vld [vmem:[#allocation19 + $0x620] sm:$0xff] }
0x15b9   :  { %6270 = vmatprep.subr.mxu1 %v6169_v59  ;;  %6340 = vmatprep.subr.mxu0 %v6171_v60  ;;  %v6174_v59 = vld [vmem:[#allocation19 + $0x630] sm:$0xff] }
0x15bc   :  { %6271 = vmatpush1.xpose.msra.mxu1 %v6168_v61  ;;  %6341 = vmatpush1.xpose.msra.mxu0 %v6170_v2  ;;  %v6225_v2 = vld [vmem:[#allocation19 + $0x7c8] sm:$0xff] }
0x15bd   :  { %6404 = vmatprep.subr.mxu1 %v6221_v5  ;;  %6474 = vmatprep.subr.mxu0 %v6223_v6  ;;  %v6227_v5 = vld [vmem:[#allocation19 + $0x7d8] sm:$0xff] }
0x1651   :  { %v5649_v50 = vpop.f32.mrf.mxu1  ;;  %v5720_v10 = vpop.f32.mrf.mxu0 }
0x1652   :  { %v5650_v11 = vadd.f32 %v5649_v50, %v5503_v8  ;;  %v5721_v12 = vadd.f32 %v5720_v10, %v5511_v9  ;;  %v6224_v50 = vld [vmem:[#allocation19 + $0x7c0] sm:$0xff]  ;;  %v6226_v10 = vld [vmem:[#allocation19 + $0x7d0] sm:$0xff] }
0x1653   :  { %v5651_v13 = vpop.f32.mrf.mxu1  ;;  %v5722_v14 = vpop.f32.mrf.mxu0 }
0x1654   :  { %v5652_v15 = vadd.f32 %v5651_v13, %v5507_v49  ;;  %v5723_v16 = vadd.f32 %v5722_v14, %v5515_v58  ;;  %v6151_v21 = vmax.f32 %v5650_v11, 0.0  ;;  %v6153_v22 = vmax.f32 %v5721_v12, 0.0  ;;  %v6209_v13 = vld [vmem:[#allocation19 + $0x748] sm:$0xff]  ;;  %v6211_v14 = vld [vmem:[#allocation19 + $0x758] sm:$0xff] }
0x1656   :  { %v6152_v19 = vmax.f32 %v5652_v15, 0.0  ;;  %v6154_v20 = vmax.f32 %v5723_v16, 0.0  ;;  %v6208_v15 = vld [vmem:[#allocation19 + $0x740] sm:$0xff]  ;;  %v6210_v16 = vld [vmem:[#allocation19 + $0x750] sm:$0xff] }
0x1658   :  { %6304 = vmatprep.mubr.f32.mxu1 %v6152_v19  ;;  %6374 = vmatprep.mubr.f32.mxu0 %v6154_v20  ;;  %v6193_v19 = vld [vmem:[#allocation19 + $0x6c8] sm:$0xff]  ;;  %v6195_v20 = vld [vmem:[#allocation19 + $0x6d8] sm:$0xff] }
0x1659   :  { %6305 = vmatmul.mubr.f32.vlgmr.msra.gmra.mxu1 %v6151_v21  ;;  %6375 = vmatmul.mubr.f32.vlgmr.msra.gmra.mxu0 %v6153_v22 }
0x165a   :  { %v5791_v29 = vpop.f32.mrf.mxu1  ;;  %v5862_v30 = vpop.f32.mrf.mxu0  ;;  %6405 = vmatpush1.xpose.msra.mxu1 %v6220_v23  ;;  %6475 = vmatpush1.xpose.msra.mxu0 %v6222_v24  ;;  %v5535_v23 = vrot.slane %v11791_v51, %v11519_v63  ;;  %v5543_v24 = vrot.slane %v11791_v51, %v11522_v1 }
0x165b   :  { %6406 = vmatprep.subr.mxu1 %v6205_v25  ;;  %6476 = vmatprep.subr.mxu0 %v6207_v26  ;;  %v5792_v54 = vadd.f32 %v5791_v29, %v5519_v41  ;;  %v5863_v55 = vadd.f32 %v5862_v30, %v5527_v42  ;;  %v6192_v25 = vld [vmem:[#allocation19 + $0x6c0] sm:$0xff]  ;;  %v6194_v26 = vld [vmem:[#allocation19 + $0x6d0] sm:$0xff]  ;;  %v6179_v29 = vld [vmem:[#allocation19 + $0x658] sm:$0xff] }
0x165c   :  { %v5793_v35 = vpop.f32.mrf.mxu1  ;;  %v5864_v36 = vpop.f32.mrf.mxu0  ;;  %v6231_v41 = vld [vmem:[#allocation19 + $0x7f8] sm:$0xff] }
0x165d   :  { %v5794_v39 = vadd.f32 %v5793_v35, %v5523_v27  ;;  %v5865_v40 = vadd.f32 %v5864_v36, %v5531_v28  ;;  %v6155_v8 = vmax.f32 %v5792_v54, 0.0  ;;  %v6157_v9 = vmax.f32 %v5863_v55, 0.0  ;;  %v6177_v28 = vld [vmem:[#allocation19 + $0x648] sm:$0xff]  ;;  %v6215_v54 = vld [vmem:[#allocation19 + $0x778] sm:$0xff]  ;;  %v6212_v55 = vld [vmem:[#allocation19 + $0x760] sm:$0xff] }
0x165e   :  { %6407 = vmatpush1.xpose.msra.mxu1 %v6204_v33  ;;  %6477 = vmatpush1.xpose.msra.mxu0 %v6206_v34  ;;  %v5555_v27 = vrot.slane %v11791_v51, %v11541_v17  ;;  %v5563_v33 = vrot.slane %v11791_v51, %v11544_v18 }
0x165f   :  { %v6156_v43 = vmax.f32 %v5794_v39, 0.0  ;;  %v6158_v44 = vmax.f32 %v5865_v40, 0.0  ;;  %6408 = vmatprep.subr.mxu1 %v6189_v37  ;;  %6478 = vmatprep.subr.mxu0 %v6191_v38  ;;  %v6176_v37 = vld [vmem:[#allocation19 + $0x640] sm:$0xff]  ;;  %v6178_v38 = vld [vmem:[#allocation19 + $0x650] sm:$0xff]  ;;  %v6229_v40 = vld [vmem:[#allocation19 + $0x7e8] sm:$0xff] }
0x1661   :  { %6444 = vmatprep.mubr.f32.mxu1 %v6156_v43  ;;  %6514 = vmatprep.mubr.f32.mxu0 %v6158_v44 }
0x1662   :  { %6409 = vmatpush1.xpose.msra.mxu1 %v6188_v45  ;;  %6479 = vmatpush1.xpose.msra.mxu0 %v6190_v46  ;;  %v6228_v45 = vld [vmem:[#allocation19 + $0x7e0] sm:$0xff] }
0x1663   :  { %6410 = vmatprep.subr.mxu1 %v6173_v47  ;;  %6480 = vmatprep.subr.mxu0 %v6175_v48  ;;  %v6230_v47 = vld [vmem:[#allocation19 + $0x7f0] sm:$0xff] }
0x1664   :  { %v5933_v60 = vpop.f32.mrf.mxu1  ;;  %v6004_v61 = vpop.f32.mrf.mxu0 }
0x1665   :  { %v5934_v35 = vadd.f32 %v5933_v60, %v5535_v23  ;;  %v6005_v36 = vadd.f32 %v6004_v61, %v5543_v24  ;;  %v5551_v60 = vrot.slane %v11791_v51, %v11551_v31  ;;  %v6196_v61 = vld [vmem:[#allocation19 + $0x6e0] sm:$0xff] }
0x1666   :  { %v5935_v6 = vpop.f32.mrf.mxu1  ;;  %v6006_v7 = vpop.f32.mrf.mxu0  ;;  %6411 = vmatpush1.xpose.msra.mxu1 %v6172_v57  ;;  %6481 = vmatpush1.xpose.msra.mxu0 %v6174_v59  ;;  %v6197_v57 = vld [vmem:[#allocation19 + $0x6e8] sm:$0xff]  ;;  %v6199_v59 = vld [vmem:[#allocation19 + $0x6f8] sm:$0xff] }
0x1667   :  { %v5936_v49 = vadd.f32 %v5935_v6, %v5539_v53  ;;  %v6007_v58 = vadd.f32 %v6006_v7, %v5547_v56  ;;  %6544 = vmatprep.subr.mxu1 %v6225_v2  ;;  %6614 = vmatprep.subr.mxu0 %v6227_v5  ;;  %v6159_v43 = vmax.f32 %v5934_v35, 0.0  ;;  %v6161_v44 = vmax.f32 %v6005_v36, 0.0  ;;  %v6213_v53 = vld [vmem:[#allocation19 + $0x768] sm:$0xff]  ;;  %v6214_v56 = vld [vmem:[#allocation19 + $0x770] sm:$0xff]  ;;  %v6183_v7 = vld [vmem:[#allocation19 + $0x678] sm:$0xff] }
0x1668   :  { %v5559_v2 = vrot.slane %v11791_v51, %v11554_v32  ;;  %v6198_v5 = vld [vmem:[#allocation19 + $0x6f0] sm:$0xff]  ;;  %v6181_v6 = vld [vmem:[#allocation19 + $0x668] sm:$0xff] }
0x1669   :  { %v6160_v11 = vmax.f32 %v5936_v49, 0.0  ;;  %v6162_v12 = vmax.f32 %v6007_v58, 0.0  ;;  %6445 = vmatmul.mubr.f32.vlgmr.msra.gmra.mxu1 %v6155_v8  ;;  %6515 = vmatmul.mubr.f32.vlgmr.msra.gmra.mxu0 %v6157_v9  ;;  %v6180_v9 = vld [vmem:[#allocation19 + $0x660] sm:$0xff]  ;;  %v6182_v58 = vld [vmem:[#allocation19 + $0x670] sm:$0xff] }
0x166a   :  { %6545 = vmatpush1.xpose.msra.mxu1 %v6224_v50  ;;  %6615 = vmatpush1.xpose.msra.mxu0 %v6226_v10 }
0x166b   :  { %6584 = vmatprep.mubr.f32.mxu1 %v6160_v11  ;;  %6654 = vmatprep.mubr.f32.mxu0 %v6162_v12 }
0x166c   :  { %6546 = vmatprep.subr.mxu1 %v6209_v13  ;;  %6616 = vmatprep.subr.mxu0 %v6211_v14 }
0x166e   :  { %v11797_v21 = vpop.f32.mrf.mxu1  ;;  %v11799_v22 = vpop.f32.mrf.mxu0  ;;  %6547 = vmatpush1.xpose.msra.mxu1 %v6208_v15  ;;  %6617 = vmatpush1.xpose.msra.mxu0 %v6210_v16 }
0x166f   :  { %6548 = vmatprep.subr.mxu1 %v6193_v19  ;;  %6618 = vmatprep.subr.mxu0 %v6195_v20  ;;  %v6076_v8 = vadd.f32 %v11797_v21, %v5551_v60  ;;  %v6147_v49 = vadd.f32 %v11799_v22, %v5559_v2  ;;  %v10425_v20 = vld [vmem:[#allocation20 + $0x3] ss:$0 sm:$0xff]  ;;  %v10426_v60 = vld [vmem:[#allocation22 + $0x3] ss:$0 sm:$0xff]  ;;  %v10427_v2 = vld [vmem:[#allocation23 + $0x3] ss:$0 sm:$0xff] }
0x1670   :  { %v6077_v30 = vpop.f32.mrf.mxu1  ;;  %v6148_v34 = vpop.f32.mrf.mxu0 }
0x1671   :  { %v6078_v39 = vadd.f32 %v6077_v30, %v5555_v27  ;;  %v6149_v42 = vadd.f32 %v6148_v34, %v5563_v33  ;;  %v6163_v50 = vmax.f32 %v6076_v8, 0.0  ;;  %v6165_v51 = vmax.f32 %v6147_v49, 0.0  ;;  %v6919_v8 = vld [vmem:[#allocation10 + $0x80] sm:$0xff] }
0x1672   :  { %6549 = vmatpush1.xpose.msra.mxu1 %v6192_v25  ;;  %6619 = vmatpush1.xpose.msra.mxu0 %v6194_v26 }
0x1673   :  { %6550 = vmatprep.subr.mxu1 %v6177_v28  ;;  %6620 = vmatprep.subr.mxu0 %v6179_v29  ;;  %v6164_v46 = vmax.f32 %v6078_v39, 0.0  ;;  %v6166_v48 = vmax.f32 %v6149_v42, 0.0 }
0x1676   :  { %6551 = vmatpush1.xpose.msra.mxu1 %v6176_v37  ;;  %6621 = vmatpush1.xpose.msra.mxu0 %v6178_v38 }
0x1677   :  { %6684 = vmatprep.subr.mxu1 %v6229_v40  ;;  %6754 = vmatprep.subr.mxu0 %v6231_v41 }
0x1679   :  { %6585 = vmatmul.mubr.f32.vlgmr.msra.gmra.mxu1 %v6159_v43  ;;  %6655 = vmatmul.mubr.f32.vlgmr.msra.gmra.mxu0 %v6161_v44 }
0x167a   :  { %6685 = vmatpush1.xpose.msra.mxu1 %v6228_v45  ;;  %6724 = vmatprep.mubr.f32.mxu1 %v6164_v46  ;;  %v6836_v46 = vld [vmem:[#allocation7 + $0x98] sm:$0xff] }
0x167b   :  { %6755 = vmatpush1.xpose.msra.mxu0 %v6230_v47  ;;  %6794 = vmatprep.mubr.f32.mxu0 %v6166_v48  ;;  %v6835_v47 = vld [vmem:[#allocation7 + $0x90] sm:$0xff]  ;;  %v6834_v48 = vld [vmem:[#allocation7 + $0x88] sm:$0xff] }
0x167c   :  { %6686 = vmatprep.subr.mxu1 %v6213_v53  ;;  %6756 = vmatprep.subr.mxu0 %v6215_v54  ;;  %v6922_v53 = vld [vmem:[#allocation10 + $0x98] sm:$0xff]  ;;  %v6921_v54 = vld [vmem:[#allocation10 + $0x90] sm:$0xff] }
0x167e   :  { %6687 = vmatpush1.xpose.msra.mxu1 %v6212_v55 }
0x167f   :  { %6757 = vmatpush1.xpose.msra.mxu0 %v6214_v56  ;;  %6688 = vmatprep.subr.mxu1 %v6197_v57 }
0x1680   :  { %6758 = vmatprep.subr.mxu0 %v6199_v59 }
0x1682   :  { %6689 = vmatpush1.xpose.msra.mxu1 %v6196_v61 }
0x1683   :  { %6759 = vmatpush1.xpose.msra.mxu0 %v6198_v5  ;;  %6690 = vmatprep.subr.mxu1 %v6181_v6 }
0x1684   :  { %6760 = vmatprep.subr.mxu0 %v6183_v7  ;;  %v6920_v7 = vld [vmem:[#allocation10 + $0x88] sm:$0xff] }
0x1686   :  { %6691 = vmatpush1.xpose.msra.mxu1 %v6180_v9  ;;  %v10428_v9 = vld [vmem:[#allocation8 + $0x4] ss:$0 sm:$0xff] }
0x1687   :  { %6761 = vmatpush1.xpose.msra.mxu0 %v6182_v58  ;;  %10642 = vmatprep.subr.mxu1 %v11249_v0 }
0x1688   :  { %10653 = vmatprep.subr.mxu0 %v11249_v0 }
0x1689   :  { %6725 = vmatmul.mubr.f32.vlgmr.msra.gmra.mxu1 %v6163_v50 }
0x168a   :  { %6795 = vmatmul.mubr.f32.vlgmr.msra.gmra.mxu0 %v6165_v51  ;;  %10650 = vmatprep.mubr.msk.f32.mxu1 %vm11250_vm0, %v11249_v0  ;;  %v10430_v51 = vld [vmem:[#allocation11 + $0x4] ss:$0 sm:$0xff] }
0x168b   :  { %10661 = vmatprep.mubr.msk.f32.mxu0 %vm11250_vm0, %v11249_v0  ;;  %10643 = vmatpush3.msra.mxu1 %v6836_v46  ;;  %v10432_v46 = vld [vmem:[#allocation13 + $0x4] ss:$0 sm:$0xff] }
0x168c   :  { %10644 = vmatprep.subr.mxu1 %v11249_v0  ;;  %10654 = vmatpush3.msra.mxu0 %v6922_v53 }
0x168d   :  { %10645 = vmatpush3.msra.mxu1 %v6835_v47  ;;  %10655 = vmatprep.subr.mxu0 %v11249_v0 }
0x168e   :  { %10646 = vmatprep.subr.mxu1 %v11249_v0  ;;  %10656 = vmatpush3.msra.mxu0 %v6921_v54  ;;  %v7089_v54 = vld [vmem:[#allocation16 + $0x9a0] sm:$0xff] }
0x168f   :  { %10647 = vmatpush3.msra.mxu1 %v6834_v48  ;;  %10657 = vmatprep.subr.mxu0 %v11249_v0  ;;  %v10433_v48 = vld [vmem:[#allocation14 + $0x4] ss:$0 sm:$0xff] }
0x1690   :  { %10648 = vmatprep.subr.mxu1 %v11249_v0  ;;  %10658 = vmatpush3.msra.mxu0 %v6920_v7  ;;  %v7042_v7 = vld [vmem:[#allocation16 + $0x828] sm:$0xff] }
0x1691   :  { %10659 = vmatprep.subr.mxu0 %v11249_v0 }
0x1692   :  { %10660 = vmatpush3.msra.mxu0 %v6919_v8  ;;  %v7044_v8 = vld [vmem:[#allocation16 + $0x838] sm:$0xff] }
0x1719   :  { %v6306_v10 = vpop.f32.mrf.mxu1  ;;  %v6376_v11 = vpop.f32.mrf.mxu0 }
0x171a   :  { %v6307_v21 = vadd.f32 %v10425_v20, %v6306_v10 }
0x171b   :  { %v6308_v12 = vpop.f32.mrf.mxu1  ;;  %v6378_v13 = vpop.f32.mrf.mxu0 }
0x171c   :  { %v6377_v26 = vadd.f32 %v6376_v11, %v6307_v21 }
0x1729   :  { %v6446_v14 = vpop.f32.mrf.mxu1  ;;  %v6516_v15 = vpop.f32.mrf.mxu0 }
0x172a   :  { %v6447_v27 = vadd.f32 %v6446_v14, %v6377_v26  ;;  %v7070_v26 = vld [vmem:[#allocation16 + $0x908] sm:$0xff] }
0x172b   :  { %v6448_v16 = vpop.f32.mrf.mxu1  ;;  %v6518_v19 = vpop.f32.mrf.mxu0 }
0x172c   :  { %v6517_v28 = vadd.f32 %v6516_v15, %v6447_v27  ;;  %v7072_v27 = vld [vmem:[#allocation16 + $0x918] sm:$0xff] }
0x1739   :  { %v6586_v22 = vpop.f32.mrf.mxu1  ;;  %v6656_v23 = vpop.f32.mrf.mxu0 }
0x173a   :  { %v6587_v29 = vadd.f32 %v6586_v22, %v6517_v28  ;;  %v7086_v22 = vld [vmem:[#allocation16 + $0x988] sm:$0xff]  ;;  %v7069_v28 = vld [vmem:[#allocation16 + $0x900] sm:$0xff] }
0x173b   :  { %v6588_v24 = vpop.f32.mrf.mxu1  ;;  %v6658_v25 = vpop.f32.mrf.mxu0 }
0x173c   :  { %v6657_v30 = vadd.f32 %v6656_v23, %v6587_v29  ;;  %v7088_v23 = vld [vmem:[#allocation16 + $0x998] sm:$0xff]  ;;  %v7085_v24 = vld [vmem:[#allocation16 + $0x980] sm:$0xff]  ;;  %v7087_v25 = vld [vmem:[#allocation16 + $0x990] sm:$0xff] }
0x173d   :  { %7284 = vmatprep.subr.mxu0 %v7088_v23  ;;  %v7071_v29 = vld [vmem:[#allocation16 + $0x910] sm:$0xff]  ;;  %v7045_v23 = vld [vmem:[#allocation16 + $0x840] sm:$0xff] }
0x1749   :  { %v6726_v33 = vpop.f32.mrf.mxu1 }
0x174a   :  { %v6727_v34 = vadd.f32 %v6726_v33, %v6657_v30  ;;  %v6796_v35 = vpop.f32.mrf.mxu0  ;;  %v7054_v30 = vld [vmem:[#allocation16 + $0x888] sm:$0xff]  ;;  %v7056_v33 = vld [vmem:[#allocation16 + $0x898] sm:$0xff] }
0x174b   :  { %v6728_v36 = vpop.f32.mrf.mxu1 }
0x174c   :  { %v6797_v37 = vadd.f32 %v6796_v35, %v6727_v34  ;;  %v6798_v38 = vpop.f32.mrf.mxu0  ;;  %v7053_v34 = vld [vmem:[#allocation16 + $0x880] sm:$0xff]  ;;  %v7055_v35 = vld [vmem:[#allocation16 + $0x890] sm:$0xff]  ;;  %v7038_v36 = vld [vmem:[#allocation16 + $0x808] sm:$0xff] }
0x174d   :  { %v7037_v38 = vld [vmem:[#allocation16 + $0x800] sm:$0xff] }
0x174e   :  { %v6800_v39 = vadd.f32 %v6797_v37, %v11759_v52  ;;  %v6833_v52 = vld [vmem:[#allocation7 + $0x80] sm:$0xff]  ;;  %v7040_v37 = vld [vmem:[#allocation16 + $0x818] sm:$0xff] }
0x174f   :  { %10649 = vmatpush3.msra.mxu1 %v6833_v52 }
0x1750   :  { %v6805_v40 = vsel %vm429_vm2, %v6800_v39, 0.0  ;;  %7213 = vmatprep.subr.mxu1 %v7086_v22  ;;  %v7048_v22 = vld [vmem:[#allocation16 + $0x858] sm:$0xff] }
0x1751   :  { %6806 = vadd.xlane.f32.xlu0 %v6805_v40  ;;  %v7090_v40 = vld [vmem:[#allocation16 + $0x9a8] sm:$0xff] }
0x17da   :  { %v6807_v41 = vpop.xlane.xlu0 %6806 }
0x17db   :  { %v6808_v42 = vmul.f32 0.03125, %v6807_v41  ;;  %v7092_v41 = vld [vmem:[#allocation16 + $0x9b8] sm:$0xff] }
0x17dd   :  { %v6809_v43 = vsub.f32 %v6800_v39, %v6808_v42  ;;  %v7039_v39 = vld [vmem:[#allocation16 + $0x810] sm:$0xff] }
0x17df   :  { %v6810_v44 = vmul.f32 %v6809_v43, %v6809_v43 }
0x17e1   :  { %v6811_v45 = vsel %vm429_vm2, %v6810_v44, 0.0 }
0x17e2   :  { %6812 = vadd.xlane.f32.xlu1 %v6811_v45 }
0x186b   :  { %v6813_v55 = vpop.xlane.xlu1 %6812 }
0x186c   :  { %v6814_v56 = vmul.f32 0.03125, %v6813_v55  ;;  %v7091_v55 = vld [vmem:[#allocation16 + $0x9b0] sm:$0xff] }
0x186e   :  { %v6815_v57 = vadd.f32 1e-05, %v6814_v56  ;;  %v7074_v56 = vld [vmem:[#allocation16 + $0x928] sm:$0xff] }
0x1870   :  { %10763 = vrsqrt.f32 %v6815_v57  ;;  %v7076_v57 = vld [vmem:[#allocation16 + $0x938] sm:$0xff] }
0x187d   :  { %v10764_v59 = vpop.eup %10763 }
0x187e   :  { %v6817_v61 = vmul.f32 %v10764_v59, %v6809_v43  ;;  %v7073_v59 = vld [vmem:[#allocation16 + $0x920] sm:$0xff] }
0x1880   :  { %v6824_v5 = vmul.f32 %v10426_v60, %v6817_v61  ;;  %v7075_v60 = vld [vmem:[#allocation16 + $0x930] sm:$0xff]  ;;  %v7058_v61 = vld [vmem:[#allocation16 + $0x8a8] sm:$0xff] }
0x1882   :  { %v6831_v6 = vadd.f32 %v10427_v2, %v6824_v5  ;;  %v7060_v2 = vld [vmem:[#allocation16 + $0x8b8] sm:$0xff]  ;;  %v7057_v5 = vld [vmem:[#allocation16 + $0x8a0] sm:$0xff] }
0x1884   :  { %10651 = vmatmul.mubr.msk.f32.vlgmr.msra.gmra.mxu1 %vm429_vm2, %v6831_v6 }
0x1885   :  { %7253 = vmatprep.mubr.f32.mxu1 %v11249_v0  ;;  %7214 = vmatpush1.msra.mxu1 %v7085_v24  ;;  %v7047_v24 = vld [vmem:[#allocation16 + $0x850] sm:$0xff] }
0x1886   :  { %7215 = vmatprep.subr.mxu1 %v7070_v26  ;;  %v7100_v26 = vld [vmem:[#allocation16 + $0x9f8] sm:$0xff] }
0x1887   :  { %7216 = vmatpush1.msra.mxu1 %v7069_v28  ;;  %v7099_v28 = vld [vmem:[#allocation16 + $0x9f0] sm:$0xff] }
0x1888   :  { %7217 = vmatprep.subr.mxu1 %v7054_v30  ;;  %v7084_v30 = vld [vmem:[#allocation16 + $0x978] sm:$0xff] }
0x1889   :  { %7218 = vmatpush1.msra.mxu1 %v7053_v34  ;;  %v7083_v34 = vld [vmem:[#allocation16 + $0x970] sm:$0xff] }
0x188a   :  { %7219 = vmatprep.subr.mxu1 %v7038_v36  ;;  %v7068_v36 = vld [vmem:[#allocation16 + $0x8f8] sm:$0xff] }
0x188b   :  { %7220 = vmatpush1.msra.mxu1 %v7037_v38  ;;  %v7067_v38 = vld [vmem:[#allocation16 + $0x8f0] sm:$0xff] }
0x188c   :  { %7355 = vmatprep.subr.mxu1 %v7090_v40  ;;  %v7052_v40 = vld [vmem:[#allocation16 + $0x878] sm:$0xff] }
0x1944   :  { %v6914_v49 = vpop.f32.mrf.mxu1 }
0x1945   :  { %v6915_v58 = vadd.f32 %v10428_v9, %v6914_v49  ;;  %v7041_v9 = vld [vmem:[#allocation16 + $0x820] sm:$0xff]  ;;  %v7043_v49 = vld [vmem:[#allocation16 + $0x830] sm:$0xff] }
0x1946   :  { %v10652_v50 = vpop.f32.mrf.mxu1 }
0x1947   :  { %10662 = vmatmul.mubr.msk.f32.vlgmr.msra.gmra.mxu0 %vm429_vm2, %v6915_v58  ;;  %v7094_v58 = vld [vmem:[#allocation16 + $0x9c8] sm:$0xff]  ;;  %v7096_v50 = vld [vmem:[#allocation16 + $0x9d8] sm:$0xff] }
0x1948   :  { %7324 = vmatprep.mubr.f32.mxu0 %v11249_v0  ;;  %7285 = vmatpush1.msra.mxu0 %v7087_v25  ;;  %v7098_v25 = vld [vmem:[#allocation16 + $0x9e8] sm:$0xff] }
0x1949   :  { %7286 = vmatprep.subr.mxu0 %v7072_v27  ;;  %v7097_v27 = vld [vmem:[#allocation16 + $0x9e0] sm:$0xff] }
0x194a   :  { %7287 = vmatpush1.msra.mxu0 %v7071_v29  ;;  %v7082_v29 = vld [vmem:[#allocation16 + $0x968] sm:$0xff] }
0x194b   :  { %7288 = vmatprep.subr.mxu0 %v7056_v33  ;;  %v7081_v33 = vld [vmem:[#allocation16 + $0x960] sm:$0xff] }
0x194c   :  { %7289 = vmatpush1.msra.mxu0 %v7055_v35  ;;  %v7066_v35 = vld [vmem:[#allocation16 + $0x8e8] sm:$0xff] }
0x194d   :  { %7290 = vmatprep.subr.mxu0 %v7040_v37  ;;  %v7065_v37 = vld [vmem:[#allocation16 + $0x8e0] sm:$0xff] }
0x194e   :  { %7291 = vmatpush1.msra.mxu0 %v7039_v39  ;;  %v7050_v39 = vld [vmem:[#allocation16 + $0x868] sm:$0xff] }
0x194f   :  { %7426 = vmatprep.subr.mxu0 %v7092_v41  ;;  %v7049_v41 = vld [vmem:[#allocation16 + $0x860] sm:$0xff] }
0x1a07   :  { %v7000_v10 = vpop.f32.mrf.mxu0 }
0x1a08   :  { %v7001_v11 = vadd.f32 %v10430_v51, %v7000_v10  ;;  %v7093_v51 = vld [vmem:[#allocation16 + $0x9c0] sm:$0xff]  ;;  %v7095_v10 = vld [vmem:[#allocation16 + $0x9d0] sm:$0xff] }
0x1a09   :  { %v10663_v12 = vpop.f32.mrf.mxu0 }
0x1a0a   :  { %v7004_v13 = vadd.f32 %v7001_v11, %v6831_v6  ;;  %v7059_v6 = vld [vmem:[#allocation16 + $0x8b0] sm:$0xff]  ;;  %v7078_v11 = vld [vmem:[#allocation16 + $0x948] sm:$0xff]  ;;  %v7080_v12 = vld [vmem:[#allocation16 + $0x958] sm:$0xff] }
0x1a0c   :  { %v7009_v14 = vsel %vm429_vm2, %v7004_v13, 0.0 }
0x1a0d   :  { %7010 = vadd.xlane.f32.xlu0 %v7009_v14  ;;  %v7079_v14 = vld [vmem:[#allocation16 + $0x950] sm:$0xff] }
0x1a96   :  { %v7011_v15 = vpop.xlane.xlu0 %7010 }
0x1a97   :  { %v7012_v16 = vmul.f32 0.03125, %v7011_v15  ;;  %v7062_v15 = vld [vmem:[#allocation16 + $0x8c8] sm:$0xff] }
0x1a99   :  { %v7013_v19 = vsub.f32 %v7004_v13, %v7012_v16  ;;  %v7077_v13 = vld [vmem:[#allocation16 + $0x940] sm:$0xff]  ;;  %v7064_v16 = vld [vmem:[#allocation16 + $0x8d8] sm:$0xff] }
0x1a9b   :  { %v7014_v20 = vmul.f32 %v7013_v19, %v7013_v19 }
0x1a9d   :  { %v7015_v21 = vsel %vm429_vm2, %v7014_v20, 0.0  ;;  %v7063_v20 = vld [vmem:[#allocation16 + $0x8d0] sm:$0xff] }
0x1a9e   :  { %7016 = vadd.xlane.f32.xlu1 %v7015_v21  ;;  %v7046_v21 = vld [vmem:[#allocation16 + $0x848] sm:$0xff] }
0x1b27   :  { %v7017_v42 = vpop.xlane.xlu1 %7016 }
0x1b28   :  { %v7018_v43 = vmul.f32 0.03125, %v7017_v42  ;;  %v7051_v42 = vld [vmem:[#allocation16 + $0x870] sm:$0xff] }
0x1b2a   :  { %v7019_v44 = vadd.f32 1e-05, %v7018_v43  ;;  %v7823_v43 = vld [vmem:[#allocation19 + $0x988] sm:$0xff] }
0x1b2c   :  { %10765 = vrsqrt.f32 %v7019_v44  ;;  %v7825_v44 = vld [vmem:[#allocation19 + $0x998] sm:$0xff] }
0x1b39   :  { %v10766_v45 = vpop.eup %10765 }
0x1b3a   :  { %v7021_v47 = vmul.f32 %v10766_v45, %v7013_v19  ;;  %v7061_v19 = vld [vmem:[#allocation16 + $0x8c0] sm:$0xff] }
0x1b3b   :  { %v7822_v45 = vld [vmem:[#allocation19 + $0x980] sm:$0xff] }
0x1b3c   :  { %v7028_v52 = vmul.f32 %v10432_v46, %v7021_v47  ;;  %v7824_v46 = vld [vmem:[#allocation19 + $0x990] sm:$0xff]  ;;  %v7807_v47 = vld [vmem:[#allocation19 + $0x908] sm:$0xff] }
0x1b3e   :  { %v11836_v53 = vadd.f32 %v10433_v48, %v7028_v52  ;;  %v7809_v48 = vld [vmem:[#allocation19 + $0x918] sm:$0xff]  ;;  %v7806_v52 = vld [vmem:[#allocation19 + $0x900] sm:$0xff] }
0x1b40   :  { %10434 = vmatmul.mubr.msk.f32.vlgmr.msra.gmra.mxu1 %vm429_vm2, %v11836_v53  ;;  %10435 = vmatmul.mubr.msk.f32.vlgmr.msra.gmra.mxu0 %vm429_vm2, %v11836_v53 }
0x1b41   :  { %7356 = vmatpush1.msra.mxu1 %v7089_v54  ;;  %7427 = vmatpush1.msra.mxu0 %v7091_v55  ;;  %v7808_v54 = vld [vmem:[#allocation19 + $0x910] sm:$0xff]  ;;  %v7791_v55 = vld [vmem:[#allocation19 + $0x888] sm:$0xff] }
0x1b42   :  { %7357 = vmatprep.subr.mxu1 %v7074_v56  ;;  %7428 = vmatprep.subr.mxu0 %v7076_v57  ;;  %v7793_v56 = vld [vmem:[#allocation19 + $0x898] sm:$0xff]  ;;  %v7790_v57 = vld [vmem:[#allocation19 + $0x880] sm:$0xff] }
0x1b43   :  { %7358 = vmatpush1.msra.mxu1 %v7073_v59  ;;  %7429 = vmatpush1.msra.mxu0 %v7075_v60  ;;  %v7792_v59 = vld [vmem:[#allocation19 + $0x890] sm:$0xff]  ;;  %v7775_v60 = vld [vmem:[#allocation19 + $0x808] sm:$0xff] }
0x1b44   :  { %7359 = vmatprep.subr.mxu1 %v7058_v61  ;;  %7430 = vmatprep.subr.mxu0 %v7060_v2  ;;  %v7777_v61 = vld [vmem:[#allocation19 + $0x818] sm:$0xff]  ;;  %v7774_v2 = vld [vmem:[#allocation19 + $0x800] sm:$0xff] }
0x1b45   :  { %7360 = vmatpush1.msra.mxu1 %v7057_v5  ;;  %7431 = vmatpush1.msra.mxu0 %v7059_v6  ;;  %v7776_v5 = vld [vmem:[#allocation19 + $0x810] sm:$0xff]  ;;  %v7827_v6 = vld [vmem:[#allocation19 + $0x9a8] sm:$0xff] }
0x1b46   :  { %7361 = vmatprep.subr.mxu1 %v7042_v7  ;;  %7432 = vmatprep.subr.mxu0 %v7044_v8  ;;  %v7829_v7 = vld [vmem:[#allocation19 + $0x9b8] sm:$0xff]  ;;  %v7102_v8 = vld [vmem:[#allocation17 + $0x40] sm:$0xff] }
0x1b47   :  { %7362 = vmatpush1.msra.mxu1 %v7041_v9  ;;  %7395 = vmatprep.mubr.f32.mxu1 %v11249_v0  ;;  %v7109_v9 = vrot.slane %v7102_v8, %v11519_v63 }
0x1b48   :  { %7433 = vmatpush1.msra.mxu0 %v7043_v49  ;;  %7466 = vmatprep.mubr.f32.mxu0 %v11249_v0  ;;  %v7117_v49 = vrot.slane %v7102_v8, %v11522_v1 }
0x1b49   :  { %10436 = vmatmul.mubr.msk.f32.vlgmr.msra.gmra.mxu1 %vm429_vm2, %v11836_v53  ;;  %10437 = vmatmul.mubr.msk.f32.vlgmr.msra.gmra.mxu0 %vm429_vm2, %v11836_v53 }
0x1b4a   :  { %7497 = vmatprep.subr.mxu1 %v7094_v58  ;;  %7568 = vmatprep.subr.mxu0 %v7096_v50  ;;  %v7113_v58 = vrot.slane %v7102_v8, %v11527_v3  ;;  %v7121_v50 = vrot.slane %v7102_v8, %v11530_v4 }
0x1b4b   :  { %7498 = vmatpush1.msra.mxu1 %v7093_v51  ;;  %7569 = vmatpush1.msra.mxu0 %v7095_v10 }
0x1b4c   :  { %7499 = vmatprep.subr.mxu1 %v7078_v11  ;;  %7570 = vmatprep.subr.mxu0 %v7080_v12 }
0x1b4d   :  { %7500 = vmatpush1.msra.mxu1 %v7077_v13  ;;  %7571 = vmatpush1.msra.mxu0 %v7079_v14 }
0x1b4e   :  { %7501 = vmatprep.subr.mxu1 %v7062_v15  ;;  %7572 = vmatprep.subr.mxu0 %v7064_v16 }
0x1b4f   :  { %7502 = vmatpush1.msra.mxu1 %v7061_v19  ;;  %7573 = vmatpush1.msra.mxu0 %v7063_v20 }
0x1b50   :  { %7503 = vmatprep.subr.mxu1 %v7046_v21  ;;  %7574 = vmatprep.subr.mxu0 %v7048_v22 }
0x1b51   :  { %7504 = vmatpush1.msra.mxu1 %v7045_v23  ;;  %7537 = vmatprep.mubr.f32.mxu1 %v11249_v0  ;;  %v7826_v23 = vld [vmem:[#allocation19 + $0x9a0] sm:$0xff] }
0x1b52   :  { %7575 = vmatpush1.msra.mxu0 %v7047_v24  ;;  %7608 = vmatprep.mubr.f32.mxu0 %v11249_v0  ;;  %v7828_v24 = vld [vmem:[#allocation19 + $0x9b0] sm:$0xff] }
0x1b53   :  { %10438 = vmatmul.mubr.msk.f32.vlgmr.msra.gmra.mxu1 %vm429_vm2, %v11836_v53  ;;  %10439 = vmatmul.mubr.msk.f32.vlgmr.msra.gmra.mxu0 %vm429_vm2, %v11836_v53 }
0x1b54   :  { %7639 = vmatprep.subr.mxu1 %v7098_v25  ;;  %7710 = vmatprep.subr.mxu0 %v7100_v26  ;;  %v7811_v25 = vld [vmem:[#allocation19 + $0x928] sm:$0xff]  ;;  %v7813_v26 = vld [vmem:[#allocation19 + $0x938] sm:$0xff] }
0x1b55   :  { %7640 = vmatpush1.msra.mxu1 %v7097_v27  ;;  %7711 = vmatpush1.msra.mxu0 %v7099_v28  ;;  %v7129_v27 = vrot.slane %v7102_v8, %v11541_v17  ;;  %v7137_v28 = vrot.slane %v7102_v8, %v11544_v18 }
0x1b56   :  { %7641 = vmatprep.subr.mxu1 %v7082_v29  ;;  %7712 = vmatprep.subr.mxu0 %v7084_v30 }
0x1b57   :  { %7642 = vmatpush1.msra.mxu1 %v7081_v33  ;;  %7713 = vmatpush1.msra.mxu0 %v7083_v34  ;;  %v7810_v33 = vld [vmem:[#allocation19 + $0x920] sm:$0xff]  ;;  %v7812_v34 = vld [vmem:[#allocation19 + $0x930] sm:$0xff] }
0x1b58   :  { %7643 = vmatprep.subr.mxu1 %v7066_v35  ;;  %7714 = vmatprep.subr.mxu0 %v7068_v36 }
0x1b59   :  { %7644 = vmatpush1.msra.mxu1 %v7065_v37  ;;  %7715 = vmatpush1.msra.mxu0 %v7067_v38  ;;  %v7795_v37 = vld [vmem:[#allocation19 + $0x8a8] sm:$0xff]  ;;  %v7797_v38 = vld [vmem:[#allocation19 + $0x8b8] sm:$0xff] }
0x1b5a   :  { %7645 = vmatprep.subr.mxu1 %v7050_v39  ;;  %7716 = vmatprep.subr.mxu0 %v7052_v40 }
0x1b5b   :  { %7646 = vmatpush1.msra.mxu1 %v7049_v41  ;;  %7679 = vmatprep.mubr.f32.mxu1 %v11249_v0  ;;  %v7125_v41 = vrot.slane %v7102_v8, %v11551_v31 }
0x1b5c   :  { %7717 = vmatpush1.msra.mxu0 %v7051_v42  ;;  %7750 = vmatprep.mubr.f32.mxu0 %v11249_v0  ;;  %v7133_v42 = vrot.slane %v7102_v8, %v11554_v32 }
0x1b5d   :  { %10440 = vmatmul.mubr.msk.f32.vlgmr.msra.gmra.mxu1 %vm429_vm2, %v11836_v53  ;;  %10441 = vmatmul.mubr.msk.f32.vlgmr.msra.gmra.mxu0 %vm429_vm2, %v11836_v53 }
0x1b5e   :  { %7870 = vmatprep.subr.mxu1 %v7823_v43  ;;  %7940 = vmatprep.subr.mxu0 %v7825_v44 }
0x1b5f   :  { %7871 = vmatpush1.xpose.msra.mxu1 %v7822_v45  ;;  %7941 = vmatpush1.xpose.msra.mxu0 %v7824_v46  ;;  %v7794_v45 = vld [vmem:[#allocation19 + $0x8a0] sm:$0xff]  ;;  %v7796_v46 = vld [vmem:[#allocation19 + $0x8b0] sm:$0xff] }
0x1b60   :  { %7872 = vmatprep.subr.mxu1 %v7807_v47  ;;  %7942 = vmatprep.subr.mxu0 %v7809_v48  ;;  %v7779_v47 = vld [vmem:[#allocation19 + $0x828] sm:$0xff]  ;;  %v7781_v48 = vld [vmem:[#allocation19 + $0x838] sm:$0xff] }
0x1b63   :  { %7873 = vmatpush1.xpose.msra.mxu1 %v7806_v52  ;;  %7943 = vmatpush1.xpose.msra.mxu0 %v7808_v54  ;;  %v11868_v52 = vld [vmem:[#allocation17 + $0x48] sm:$0xff] }
0x1b64   :  { %7874 = vmatprep.subr.mxu1 %v7791_v55  ;;  %7944 = vmatprep.subr.mxu0 %v7793_v56  ;;  %v7145_v54 = vrot.slane %v11868_v52, %v11527_v3 }
0x1b67   :  { %7875 = vmatpush1.xpose.msra.mxu1 %v7790_v57  ;;  %7945 = vmatpush1.xpose.msra.mxu0 %v7792_v59  ;;  %v7153_v57 = vrot.slane %v11868_v52, %v11530_v4  ;;  %v7778_v59 = vld [vmem:[#allocation19 + $0x820] sm:$0xff] }
0x1b68   :  { %7876 = vmatprep.subr.mxu1 %v7775_v60  ;;  %7946 = vmatprep.subr.mxu0 %v7777_v61  ;;  %v7780_v60 = vld [vmem:[#allocation19 + $0x830] sm:$0xff] }
0x1b6b   :  { %7877 = vmatpush1.xpose.msra.mxu1 %v7774_v2  ;;  %7947 = vmatpush1.xpose.msra.mxu0 %v7776_v5  ;;  %v7831_v5 = vld [vmem:[#allocation19 + $0x9c8] sm:$0xff] }
0x1b6c   :  { %8010 = vmatprep.subr.mxu1 %v7827_v6  ;;  %8080 = vmatprep.subr.mxu0 %v7829_v7  ;;  %v7833_v6 = vld [vmem:[#allocation19 + $0x9d8] sm:$0xff] }
0x1c00   :  { %v7255_v51 = vpop.f32.mrf.mxu1  ;;  %v7326_v10 = vpop.f32.mrf.mxu0 }
0x1c01   :  { %v7256_v11 = vadd.f32 %v7255_v51, %v7109_v9  ;;  %v7327_v12 = vadd.f32 %v7326_v10, %v7117_v49  ;;  %v7830_v51 = vld [vmem:[#allocation19 + $0x9c0] sm:$0xff]  ;;  %v7832_v10 = vld [vmem:[#allocation19 + $0x9d0] sm:$0xff] }
0x1c02   :  { %v7257_v13 = vpop.f32.mrf.mxu1  ;;  %v7328_v14 = vpop.f32.mrf.mxu0 }
0x1c03   :  { %v7258_v15 = vadd.f32 %v7257_v13, %v7113_v58  ;;  %v7329_v16 = vadd.f32 %v7328_v14, %v7121_v50  ;;  %v7757_v21 = vmax.f32 %v7256_v11, 0.0  ;;  %v7759_v22 = vmax.f32 %v7327_v12, 0.0  ;;  %v7815_v13 = vld [vmem:[#allocation19 + $0x948] sm:$0xff]  ;;  %v7817_v14 = vld [vmem:[#allocation19 + $0x958] sm:$0xff] }
0x1c05   :  { %v7758_v19 = vmax.f32 %v7258_v15, 0.0  ;;  %v7760_v20 = vmax.f32 %v7329_v16, 0.0  ;;  %v7814_v15 = vld [vmem:[#allocation19 + $0x940] sm:$0xff]  ;;  %v7816_v16 = vld [vmem:[#allocation19 + $0x950] sm:$0xff] }
0x1c07   :  { %7910 = vmatprep.mubr.f32.mxu1 %v7758_v19  ;;  %7980 = vmatprep.mubr.f32.mxu0 %v7760_v20  ;;  %v7799_v19 = vld [vmem:[#allocation19 + $0x8c8] sm:$0xff]  ;;  %v7801_v20 = vld [vmem:[#allocation19 + $0x8d8] sm:$0xff] }
0x1c08   :  { %7911 = vmatmul.mubr.f32.vlgmr.msra.gmra.mxu1 %v7757_v21  ;;  %7981 = vmatmul.mubr.f32.vlgmr.msra.gmra.mxu0 %v7759_v22 }
0x1c09   :  { %v7397_v29 = vpop.f32.mrf.mxu1  ;;  %v7468_v30 = vpop.f32.mrf.mxu0  ;;  %8011 = vmatpush1.xpose.msra.mxu1 %v7826_v23  ;;  %8081 = vmatpush1.xpose.msra.mxu0 %v7828_v24  ;;  %v7141_v23 = vrot.slane %v11868_v52, %v11519_v63  ;;  %v7149_v24 = vrot.slane %v11868_v52, %v11522_v1 }
0x1c0a   :  { %8012 = vmatprep.subr.mxu1 %v7811_v25  ;;  %8082 = vmatprep.subr.mxu0 %v7813_v26  ;;  %v7398_v55 = vadd.f32 %v7397_v29, %v7125_v41  ;;  %v7469_v56 = vadd.f32 %v7468_v30, %v7133_v42  ;;  %v7798_v25 = vld [vmem:[#allocation19 + $0x8c0] sm:$0xff]  ;;  %v7800_v26 = vld [vmem:[#allocation19 + $0x8d0] sm:$0xff]  ;;  %v7785_v29 = vld [vmem:[#allocation19 + $0x858] sm:$0xff] }
0x1c0b   :  { %v7399_v35 = vpop.f32.mrf.mxu1  ;;  %v7470_v36 = vpop.f32.mrf.mxu0  ;;  %v7837_v41 = vld [vmem:[#allocation19 + $0x9f8] sm:$0xff] }
0x1c0c   :  { %v7400_v39 = vadd.f32 %v7399_v35, %v7129_v27  ;;  %v7471_v40 = vadd.f32 %v7470_v36, %v7137_v28  ;;  %v7761_v9 = vmax.f32 %v7398_v55, 0.0  ;;  %v7763_v49 = vmax.f32 %v7469_v56, 0.0  ;;  %v7783_v28 = vld [vmem:[#allocation19 + $0x848] sm:$0xff]  ;;  %v7821_v55 = vld [vmem:[#allocation19 + $0x978] sm:$0xff]  ;;  %v7818_v56 = vld [vmem:[#allocation19 + $0x960] sm:$0xff] }
0x1c0d   :  { %8013 = vmatpush1.xpose.msra.mxu1 %v7810_v33  ;;  %8083 = vmatpush1.xpose.msra.mxu0 %v7812_v34  ;;  %v7161_v27 = vrot.slane %v11868_v52, %v11541_v17  ;;  %v7169_v33 = vrot.slane %v11868_v52, %v11544_v18 }
0x1c0e   :  { %v7762_v43 = vmax.f32 %v7400_v39, 0.0  ;;  %v7764_v44 = vmax.f32 %v7471_v40, 0.0  ;;  %8014 = vmatprep.subr.mxu1 %v7795_v37  ;;  %8084 = vmatprep.subr.mxu0 %v7797_v38  ;;  %v7782_v37 = vld [vmem:[#allocation19 + $0x840] sm:$0xff]  ;;  %v7784_v38 = vld [vmem:[#allocation19 + $0x850] sm:$0xff]  ;;  %v7835_v40 = vld [vmem:[#allocation19 + $0x9e8] sm:$0xff] }
0x1c10   :  { %8050 = vmatprep.mubr.f32.mxu1 %v7762_v43  ;;  %8120 = vmatprep.mubr.f32.mxu0 %v7764_v44 }
0x1c11   :  { %8015 = vmatpush1.xpose.msra.mxu1 %v7794_v45  ;;  %8085 = vmatpush1.xpose.msra.mxu0 %v7796_v46  ;;  %v7834_v45 = vld [vmem:[#allocation19 + $0x9e0] sm:$0xff] }
0x1c12   :  { %8016 = vmatprep.subr.mxu1 %v7779_v47  ;;  %8086 = vmatprep.subr.mxu0 %v7781_v48  ;;  %v7836_v47 = vld [vmem:[#allocation19 + $0x9f0] sm:$0xff] }
0x1c13   :  { %v7539_v61 = vpop.f32.mrf.mxu1  ;;  %v7610_v2 = vpop.f32.mrf.mxu0 }
0x1c14   :  { %v7540_v35 = vadd.f32 %v7539_v61, %v7141_v23  ;;  %v7611_v36 = vadd.f32 %v7610_v2, %v7149_v24  ;;  %v7157_v61 = vrot.slane %v11868_v52, %v11551_v31  ;;  %v7802_v2 = vld [vmem:[#allocation19 + $0x8e0] sm:$0xff] }
0x1c15   :  { %v7541_v7 = vpop.f32.mrf.mxu1  ;;  %v7612_v8 = vpop.f32.mrf.mxu0  ;;  %8017 = vmatpush1.xpose.msra.mxu1 %v7778_v59  ;;  %8087 = vmatpush1.xpose.msra.mxu0 %v7780_v60  ;;  %v7803_v59 = vld [vmem:[#allocation19 + $0x8e8] sm:$0xff]  ;;  %v7805_v60 = vld [vmem:[#allocation19 + $0x8f8] sm:$0xff] }
0x1c16   :  { %v7542_v58 = vadd.f32 %v7541_v7, %v7145_v54  ;;  %v7613_v50 = vadd.f32 %v7612_v8, %v7153_v57  ;;  %8150 = vmatprep.subr.mxu1 %v7831_v5  ;;  %8220 = vmatprep.subr.mxu0 %v7833_v6  ;;  %v7765_v43 = vmax.f32 %v7540_v35, 0.0  ;;  %v7767_v44 = vmax.f32 %v7611_v36, 0.0  ;;  %v7819_v54 = vld [vmem:[#allocation19 + $0x968] sm:$0xff]  ;;  %v7820_v57 = vld [vmem:[#allocation19 + $0x970] sm:$0xff]  ;;  %v7789_v8 = vld [vmem:[#allocation19 + $0x878] sm:$0xff] }
0x1c17   :  { %v7165_v5 = vrot.slane %v11868_v52, %v11554_v32  ;;  %v7804_v6 = vld [vmem:[#allocation19 + $0x8f0] sm:$0xff]  ;;  %v7787_v7 = vld [vmem:[#allocation19 + $0x868] sm:$0xff] }
0x1c18   :  { %v7766_v11 = vmax.f32 %v7542_v58, 0.0  ;;  %v7768_v12 = vmax.f32 %v7613_v50, 0.0  ;;  %8051 = vmatmul.mubr.f32.vlgmr.msra.gmra.mxu1 %v7761_v9  ;;  %8121 = vmatmul.mubr.f32.vlgmr.msra.gmra.mxu0 %v7763_v49  ;;  %v7786_v49 = vld [vmem:[#allocation19 + $0x860] sm:$0xff]  ;;  %v7788_v50 = vld [vmem:[#allocation19 + $0x870] sm:$0xff] }
0x1c19   :  { %8151 = vmatpush1.xpose.msra.mxu1 %v7830_v51  ;;  %8221 = vmatpush1.xpose.msra.mxu0 %v7832_v10 }
0x1c1a   :  { %8190 = vmatprep.mubr.f32.mxu1 %v7766_v11  ;;  %8260 = vmatprep.mubr.f32.mxu0 %v7768_v12 }
0x1c1b   :  { %8152 = vmatprep.subr.mxu1 %v7815_v13  ;;  %8222 = vmatprep.subr.mxu0 %v7817_v14 }
0x1c1d   :  { %v11874_v21 = vpop.f32.mrf.mxu1  ;;  %v11876_v22 = vpop.f32.mrf.mxu0  ;;  %8153 = vmatpush1.xpose.msra.mxu1 %v7814_v15  ;;  %8223 = vmatpush1.xpose.msra.mxu0 %v7816_v16 }
0x1c1e   :  { %8154 = vmatprep.subr.mxu1 %v7799_v19  ;;  %8224 = vmatprep.subr.mxu0 %v7801_v20  ;;  %v7682_v9 = vadd.f32 %v11874_v21, %v7157_v61  ;;  %v7753_v58 = vadd.f32 %v11876_v22, %v7165_v5  ;;  %v10442_v20 = vld [vmem:[#allocation20 + $0x4] ss:$0 sm:$0xff]  ;;  %v10443_v61 = vld [vmem:[#allocation22 + $0x4] ss:$0 sm:$0xff]  ;;  %v10444_v5 = vld [vmem:[#allocation23 + $0x4] ss:$0 sm:$0xff] }
0x1c1f   :  { %v7683_v30 = vpop.f32.mrf.mxu1  ;;  %v7754_v34 = vpop.f32.mrf.mxu0 }
0x1c20   :  { %v7684_v39 = vadd.f32 %v7683_v30, %v7161_v27  ;;  %v7755_v42 = vadd.f32 %v7754_v34, %v7169_v33  ;;  %v7769_v51 = vmax.f32 %v7682_v9, 0.0  ;;  %v7771_v52 = vmax.f32 %v7753_v58, 0.0  ;;  %v8525_v9 = vld [vmem:[#allocation10 + $0xa0] sm:$0xff] }
0x1c21   :  { %8155 = vmatpush1.xpose.msra.mxu1 %v7798_v25  ;;  %8225 = vmatpush1.xpose.msra.mxu0 %v7800_v26 }
0x1c22   :  { %8156 = vmatprep.subr.mxu1 %v7783_v28  ;;  %8226 = vmatprep.subr.mxu0 %v7785_v29  ;;  %v7770_v46 = vmax.f32 %v7684_v39, 0.0  ;;  %v7772_v48 = vmax.f32 %v7755_v42, 0.0 }
0x1c25   :  { %8157 = vmatpush1.xpose.msra.mxu1 %v7782_v37  ;;  %8227 = vmatpush1.xpose.msra.mxu0 %v7784_v38 }
0x1c26   :  { %8290 = vmatprep.subr.mxu1 %v7835_v40  ;;  %8360 = vmatprep.subr.mxu0 %v7837_v41 }
0x1c28   :  { %8191 = vmatmul.mubr.f32.vlgmr.msra.gmra.mxu1 %v7765_v43  ;;  %8261 = vmatmul.mubr.f32.vlgmr.msra.gmra.mxu0 %v7767_v44 }
0x1c29   :  { %8291 = vmatpush1.xpose.msra.mxu1 %v7834_v45  ;;  %8330 = vmatprep.mubr.f32.mxu1 %v7770_v46  ;;  %v8442_v46 = vld [vmem:[#allocation7 + $0xb8] sm:$0xff] }
0x1c2a   :  { %8361 = vmatpush1.xpose.msra.mxu0 %v7836_v47  ;;  %8400 = vmatprep.mubr.f32.mxu0 %v7772_v48  ;;  %v8441_v47 = vld [vmem:[#allocation7 + $0xb0] sm:$0xff]  ;;  %v8440_v48 = vld [vmem:[#allocation7 + $0xa8] sm:$0xff] }
0x1c2b   :  { %8292 = vmatprep.subr.mxu1 %v7819_v54  ;;  %8362 = vmatprep.subr.mxu0 %v7821_v55  ;;  %v8528_v54 = vld [vmem:[#allocation10 + $0xb8] sm:$0xff]  ;;  %v8527_v55 = vld [vmem:[#allocation10 + $0xb0] sm:$0xff] }
0x1c2d   :  { %8293 = vmatpush1.xpose.msra.mxu1 %v7818_v56 }
0x1c2e   :  { %8363 = vmatpush1.xpose.msra.mxu0 %v7820_v57  ;;  %8294 = vmatprep.subr.mxu1 %v7803_v59 }
0x1c2f   :  { %8364 = vmatprep.subr.mxu0 %v7805_v60 }
0x1c31   :  { %8295 = vmatpush1.xpose.msra.mxu1 %v7802_v2 }
0x1c32   :  { %8365 = vmatpush1.xpose.msra.mxu0 %v7804_v6  ;;  %8296 = vmatprep.subr.mxu1 %v7787_v7 }
0x1c33   :  { %8366 = vmatprep.subr.mxu0 %v7789_v8  ;;  %v8526_v8 = vld [vmem:[#allocation10 + $0xa8] sm:$0xff] }
0x1c35   :  { %8297 = vmatpush1.xpose.msra.mxu1 %v7786_v49  ;;  %v10445_v49 = vld [vmem:[#allocation8 + $0x5] ss:$0 sm:$0xff] }
0x1c36   :  { %8367 = vmatpush1.xpose.msra.mxu0 %v7788_v50  ;;  %10664 = vmatprep.subr.mxu1 %v11249_v0 }
0x1c37   :  { %10675 = vmatprep.subr.mxu0 %v11249_v0 }
0x1c38   :  { %8331 = vmatmul.mubr.f32.vlgmr.msra.gmra.mxu1 %v7769_v51 }
0x1c39   :  { %8401 = vmatmul.mubr.f32.vlgmr.msra.gmra.mxu0 %v7771_v52  ;;  %10672 = vmatprep.mubr.msk.f32.mxu1 %vm11250_vm0, %v11249_v0  ;;  %v10447_v52 = vld [vmem:[#allocation11 + $0x5] ss:$0 sm:$0xff] }
0x1c3a   :  { %10683 = vmatprep.mubr.msk.f32.mxu0 %vm11250_vm0, %v11249_v0  ;;  %10665 = vmatpush3.msra.mxu1 %v8442_v46  ;;  %v10449_v46 = vld [vmem:[#allocation13 + $0x5] ss:$0 sm:$0xff] }
0x1c3b   :  { %10666 = vmatprep.subr.mxu1 %v11249_v0  ;;  %10676 = vmatpush3.msra.mxu0 %v8528_v54 }
0x1c3c   :  { %10667 = vmatpush3.msra.mxu1 %v8441_v47  ;;  %10677 = vmatprep.subr.mxu0 %v11249_v0 }
0x1c3d   :  { %10668 = vmatprep.subr.mxu1 %v11249_v0  ;;  %10678 = vmatpush3.msra.mxu0 %v8527_v55  ;;  %v8695_v55 = vld [vmem:[#allocation16 + $0xba0] sm:$0xff] }
0x1c3e   :  { %10669 = vmatpush3.msra.mxu1 %v8440_v48  ;;  %10679 = vmatprep.subr.mxu0 %v11249_v0  ;;  %v10450_v48 = vld [vmem:[#allocation14 + $0x5] ss:$0 sm:$0xff] }
0x1c3f   :  { %10670 = vmatprep.subr.mxu1 %v11249_v0  ;;  %10680 = vmatpush3.msra.mxu0 %v8526_v8  ;;  %v8648_v8 = vld [vmem:[#allocation16 + $0xa28] sm:$0xff] }
0x1c40   :  { %10681 = vmatprep.subr.mxu0 %v11249_v0 }
0x1c41   :  { %10682 = vmatpush3.msra.mxu0 %v8525_v9  ;;  %v8650_v9 = vld [vmem:[#allocation16 + $0xa38] sm:$0xff] }
0x1cc8   :  { %v7912_v10 = vpop.f32.mrf.mxu1  ;;  %v7982_v11 = vpop.f32.mrf.mxu0 }
0x1cc9   :  { %v7913_v21 = vadd.f32 %v10442_v20, %v7912_v10 }
0x1cca   :  { %v7914_v12 = vpop.f32.mrf.mxu1  ;;  %v7984_v13 = vpop.f32.mrf.mxu0 }
0x1ccb   :  { %v7983_v26 = vadd.f32 %v7982_v11, %v7913_v21 }
0x1cd8   :  { %v8052_v14 = vpop.f32.mrf.mxu1  ;;  %v8122_v15 = vpop.f32.mrf.mxu0 }
0x1cd9   :  { %v8053_v27 = vadd.f32 %v8052_v14, %v7983_v26  ;;  %v8676_v26 = vld [vmem:[#allocation16 + $0xb08] sm:$0xff] }
0x1cda   :  { %v8054_v16 = vpop.f32.mrf.mxu1  ;;  %v8124_v19 = vpop.f32.mrf.mxu0 }
0x1cdb   :  { %v8123_v28 = vadd.f32 %v8122_v15, %v8053_v27  ;;  %v8678_v27 = vld [vmem:[#allocation16 + $0xb18] sm:$0xff] }
0x1ce8   :  { %v8192_v22 = vpop.f32.mrf.mxu1  ;;  %v8262_v23 = vpop.f32.mrf.mxu0 }
0x1ce9   :  { %v8193_v29 = vadd.f32 %v8192_v22, %v8123_v28  ;;  %v8692_v22 = vld [vmem:[#allocation16 + $0xb88] sm:$0xff]  ;;  %v8675_v28 = vld [vmem:[#allocation16 + $0xb00] sm:$0xff] }
0x1cea   :  { %v8194_v24 = vpop.f32.mrf.mxu1  ;;  %v8264_v25 = vpop.f32.mrf.mxu0 }
0x1ceb   :  { %v8263_v30 = vadd.f32 %v8262_v23, %v8193_v29  ;;  %v8694_v23 = vld [vmem:[#allocation16 + $0xb98] sm:$0xff]  ;;  %v8691_v24 = vld [vmem:[#allocation16 + $0xb80] sm:$0xff]  ;;  %v8693_v25 = vld [vmem:[#allocation16 + $0xb90] sm:$0xff] }
0x1cec   :  { %8890 = vmatprep.subr.mxu0 %v8694_v23  ;;  %v8677_v29 = vld [vmem:[#allocation16 + $0xb10] sm:$0xff]  ;;  %v8651_v23 = vld [vmem:[#allocation16 + $0xa40] sm:$0xff] }
0x1cf8   :  { %v8332_v33 = vpop.f32.mrf.mxu1 }
0x1cf9   :  { %v8333_v34 = vadd.f32 %v8332_v33, %v8263_v30  ;;  %v8402_v35 = vpop.f32.mrf.mxu0  ;;  %v8660_v30 = vld [vmem:[#allocation16 + $0xa88] sm:$0xff]  ;;  %v8662_v33 = vld [vmem:[#allocation16 + $0xa98] sm:$0xff] }
0x1cfa   :  { %v8334_v36 = vpop.f32.mrf.mxu1 }
0x1cfb   :  { %v8403_v37 = vadd.f32 %v8402_v35, %v8333_v34  ;;  %v8404_v38 = vpop.f32.mrf.mxu0  ;;  %v8659_v34 = vld [vmem:[#allocation16 + $0xa80] sm:$0xff]  ;;  %v8661_v35 = vld [vmem:[#allocation16 + $0xa90] sm:$0xff]  ;;  %v8644_v36 = vld [vmem:[#allocation16 + $0xa08] sm:$0xff] }
0x1cfc   :  { %v8643_v38 = vld [vmem:[#allocation16 + $0xa00] sm:$0xff] }
0x1cfd   :  { %v8406_v39 = vadd.f32 %v8403_v37, %v11836_v53  ;;  %v8439_v53 = vld [vmem:[#allocation7 + $0xa0] sm:$0xff]  ;;  %v8646_v37 = vld [vmem:[#allocation16 + $0xa18] sm:$0xff] }
0x1cfe   :  { %10671 = vmatpush3.msra.mxu1 %v8439_v53 }
0x1cff   :  { %v8411_v40 = vsel %vm429_vm2, %v8406_v39, 0.0  ;;  %8819 = vmatprep.subr.mxu1 %v8692_v22  ;;  %v8654_v22 = vld [vmem:[#allocation16 + $0xa58] sm:$0xff] }
0x1d00   :  { %8412 = vadd.xlane.f32.xlu0 %v8411_v40  ;;  %v8696_v40 = vld [vmem:[#allocation16 + $0xba8] sm:$0xff] }
0x1d89   :  { %v8413_v41 = vpop.xlane.xlu0 %8412 }
0x1d8a   :  { %v8414_v42 = vmul.f32 0.03125, %v8413_v41  ;;  %v8698_v41 = vld [vmem:[#allocation16 + $0xbb8] sm:$0xff] }
0x1d8c   :  { %v8415_v43 = vsub.f32 %v8406_v39, %v8414_v42  ;;  %v8645_v39 = vld [vmem:[#allocation16 + $0xa10] sm:$0xff] }
0x1d8e   :  { %v8416_v44 = vmul.f32 %v8415_v43, %v8415_v43 }
0x1d90   :  { %v8417_v45 = vsel %vm429_vm2, %v8416_v44, 0.0 }
0x1d91   :  { %8418 = vadd.xlane.f32.xlu1 %v8417_v45 }
0x1e1a   :  { %v8419_v56 = vpop.xlane.xlu1 %8418 }
0x1e1b   :  { %v8420_v57 = vmul.f32 0.03125, %v8419_v56  ;;  %v8697_v56 = vld [vmem:[#allocation16 + $0xbb0] sm:$0xff] }
0x1e1d   :  { %v8421_v59 = vadd.f32 1e-05, %v8420_v57  ;;  %v8680_v57 = vld [vmem:[#allocation16 + $0xb28] sm:$0xff] }
0x1e1f   :  { %10767 = vrsqrt.f32 %v8421_v59  ;;  %v8682_v59 = vld [vmem:[#allocation16 + $0xb38] sm:$0xff] }
0x1e2c   :  { %v10768_v60 = vpop.eup %10767 }
0x1e2d   :  { %v8423_v2 = vmul.f32 %v10768_v60, %v8415_v43  ;;  %v8679_v60 = vld [vmem:[#allocation16 + $0xb20] sm:$0xff] }
0x1e2f   :  { %v8430_v6 = vmul.f32 %v10443_v61, %v8423_v2  ;;  %v8681_v61 = vld [vmem:[#allocation16 + $0xb30] sm:$0xff]  ;;  %v8664_v2 = vld [vmem:[#allocation16 + $0xaa8] sm:$0xff] }
0x1e31   :  { %v8437_v7 = vadd.f32 %v10444_v5, %v8430_v6  ;;  %v8666_v5 = vld [vmem:[#allocation16 + $0xab8] sm:$0xff]  ;;  %v8663_v6 = vld [vmem:[#allocation16 + $0xaa0] sm:$0xff] }
0x1e33   :  { %10673 = vmatmul.mubr.msk.f32.vlgmr.msra.gmra.mxu1 %vm429_vm2, %v8437_v7 }
0x1e34   :  { %8859 = vmatprep.mubr.f32.mxu1 %v11249_v0  ;;  %8820 = vmatpush1.msra.mxu1 %v8691_v24  ;;  %v8653_v24 = vld [vmem:[#allocation16 + $0xa50] sm:$0xff] }
0x1e35   :  { %8821 = vmatprep.subr.mxu1 %v8676_v26  ;;  %v8706_v26 = vld [vmem:[#allocation16 + $0xbf8] sm:$0xff] }
0x1e36   :  { %8822 = vmatpush1.msra.mxu1 %v8675_v28  ;;  %v8705_v28 = vld [vmem:[#allocation16 + $0xbf0] sm:$0xff] }
0x1e37   :  { %8823 = vmatprep.subr.mxu1 %v8660_v30  ;;  %v8690_v30 = vld [vmem:[#allocation16 + $0xb78] sm:$0xff] }
0x1e38   :  { %8824 = vmatpush1.msra.mxu1 %v8659_v34  ;;  %v8689_v34 = vld [vmem:[#allocation16 + $0xb70] sm:$0xff] }
0x1e39   :  { %8825 = vmatprep.subr.mxu1 %v8644_v36  ;;  %v8674_v36 = vld [vmem:[#allocation16 + $0xaf8] sm:$0xff] }
0x1e3a   :  { %8826 = vmatpush1.msra.mxu1 %v8643_v38  ;;  %v8673_v38 = vld [vmem:[#allocation16 + $0xaf0] sm:$0xff] }
0x1e3b   :  { %8961 = vmatprep.subr.mxu1 %v8696_v40  ;;  %v8658_v40 = vld [vmem:[#allocation16 + $0xa78] sm:$0xff] }
0x1ef3   :  { %v8520_v58 = vpop.f32.mrf.mxu1 }
0x1ef4   :  { %v8521_v50 = vadd.f32 %v10445_v49, %v8520_v58  ;;  %v8647_v49 = vld [vmem:[#allocation16 + $0xa20] sm:$0xff]  ;;  %v8649_v58 = vld [vmem:[#allocation16 + $0xa30] sm:$0xff] }
0x1ef5   :  { %v10674_v51 = vpop.f32.mrf.mxu1 }
0x1ef6   :  { %10684 = vmatmul.mubr.msk.f32.vlgmr.msra.gmra.mxu0 %vm429_vm2, %v8521_v50  ;;  %v8700_v50 = vld [vmem:[#allocation16 + $0xbc8] sm:$0xff]  ;;  %v8702_v51 = vld [vmem:[#allocation16 + $0xbd8] sm:$0xff] }
0x1ef7   :  { %8930 = vmatprep.mubr.f32.mxu0 %v11249_v0  ;;  %8891 = vmatpush1.msra.mxu0 %v8693_v25  ;;  %v8704_v25 = vld [vmem:[#allocation16 + $0xbe8] sm:$0xff] }
0x1ef8   :  { %8892 = vmatprep.subr.mxu0 %v8678_v27  ;;  %v8703_v27 = vld [vmem:[#allocation16 + $0xbe0] sm:$0xff] }
0x1ef9   :  { %8893 = vmatpush1.msra.mxu0 %v8677_v29  ;;  %v8688_v29 = vld [vmem:[#allocation16 + $0xb68] sm:$0xff] }
0x1efa   :  { %8894 = vmatprep.subr.mxu0 %v8662_v33  ;;  %v8687_v33 = vld [vmem:[#allocation16 + $0xb60] sm:$0xff] }
0x1efb   :  { %8895 = vmatpush1.msra.mxu0 %v8661_v35  ;;  %v8672_v35 = vld [vmem:[#allocation16 + $0xae8] sm:$0xff] }
0x1efc   :  { %8896 = vmatprep.subr.mxu0 %v8646_v37  ;;  %v8671_v37 = vld [vmem:[#allocation16 + $0xae0] sm:$0xff] }
0x1efd   :  { %8897 = vmatpush1.msra.mxu0 %v8645_v39  ;;  %v8656_v39 = vld [vmem:[#allocation16 + $0xa68] sm:$0xff] }
0x1efe   :  { %9032 = vmatprep.subr.mxu0 %v8698_v41  ;;  %v8655_v41 = vld [vmem:[#allocation16 + $0xa60] sm:$0xff] }
0x1fb6   :  { %v8606_v10 = vpop.f32.mrf.mxu0 }
0x1fb7   :  { %v8607_v11 = vadd.f32 %v10447_v52, %v8606_v10  ;;  %v8699_v52 = vld [vmem:[#allocation16 + $0xbc0] sm:$0xff]  ;;  %v8701_v10 = vld [vmem:[#allocation16 + $0xbd0] sm:$0xff] }
0x1fb8   :  { %v10685_v12 = vpop.f32.mrf.mxu0 }
0x1fb9   :  { %v8610_v13 = vadd.f32 %v8607_v11, %v8437_v7  ;;  %v8665_v7 = vld [vmem:[#allocation16 + $0xab0] sm:$0xff]  ;;  %v8684_v11 = vld [vmem:[#allocation16 + $0xb48] sm:$0xff]  ;;  %v8686_v12 = vld [vmem:[#allocation16 + $0xb58] sm:$0xff] }
0x1fbb   :  { %v8615_v14 = vsel %vm429_vm2, %v8610_v13, 0.0 }
0x1fbc   :  { %8616 = vadd.xlane.f32.xlu0 %v8615_v14  ;;  %v8685_v14 = vld [vmem:[#allocation16 + $0xb50] sm:$0xff] }
0x2045   :  { %v8617_v15 = vpop.xlane.xlu0 %8616 }
0x2046   :  { %v8618_v16 = vmul.f32 0.03125, %v8617_v15  ;;  %v8668_v15 = vld [vmem:[#allocation16 + $0xac8] sm:$0xff] }
0x2048   :  { %v8619_v19 = vsub.f32 %v8610_v13, %v8618_v16  ;;  %v8683_v13 = vld [vmem:[#allocation16 + $0xb40] sm:$0xff]  ;;  %v8670_v16 = vld [vmem:[#allocation16 + $0xad8] sm:$0xff] }
0x204a   :  { %v8620_v20 = vmul.f32 %v8619_v19, %v8619_v19 }
0x204c   :  { %v8621_v21 = vsel %vm429_vm2, %v8620_v20, 0.0  ;;  %v8669_v20 = vld [vmem:[#allocation16 + $0xad0] sm:$0xff] }
0x204d   :  { %8622 = vadd.xlane.f32.xlu1 %v8621_v21  ;;  %v8652_v21 = vld [vmem:[#allocation16 + $0xa48] sm:$0xff] }
0x20d6   :  { %v8623_v42 = vpop.xlane.xlu1 %8622 }
0x20d7   :  { %v8624_v43 = vmul.f32 0.03125, %v8623_v42  ;;  %v8657_v42 = vld [vmem:[#allocation16 + $0xa70] sm:$0xff] }
0x20d9   :  { %v8625_v44 = vadd.f32 1e-05, %v8624_v43  ;;  %v9429_v43 = vld [vmem:[#allocation19 + $0xb88] sm:$0xff] }
0x20db   :  { %10769 = vrsqrt.f32 %v8625_v44  ;;  %v9431_v44 = vld [vmem:[#allocation19 + $0xb98] sm:$0xff] }
0x20e8   :  { %v10770_v45 = vpop.eup %10769 }
0x20e9   :  { %v8627_v47 = vmul.f32 %v10770_v45, %v8619_v19  ;;  %v8667_v19 = vld [vmem:[#allocation16 + $0xac0] sm:$0xff] }
0x20ea   :  { %v9428_v45 = vld [vmem:[#allocation19 + $0xb80] sm:$0xff] }
0x20eb   :  { %v8634_v53 = vmul.f32 %v10449_v46, %v8627_v47  ;;  %v9430_v46 = vld [vmem:[#allocation19 + $0xb90] sm:$0xff]  ;;  %v9413_v47 = vld [vmem:[#allocation19 + $0xb08] sm:$0xff] }
0x20ed   :  { %v11913_v54 = vadd.f32 %v10450_v48, %v8634_v53  ;;  %v9415_v48 = vld [vmem:[#allocation19 + $0xb18] sm:$0xff]  ;;  %v9412_v53 = vld [vmem:[#allocation19 + $0xb00] sm:$0xff] }
0x20ef   :  { %10451 = vmatmul.mubr.msk.f32.vlgmr.msra.gmra.mxu1 %vm429_vm2, %v11913_v54  ;;  %10452 = vmatmul.mubr.msk.f32.vlgmr.msra.gmra.mxu0 %vm429_vm2, %v11913_v54 }
0x20f0   :  { %8962 = vmatpush1.msra.mxu1 %v8695_v55  ;;  %9033 = vmatpush1.msra.mxu0 %v8697_v56  ;;  %v9414_v55 = vld [vmem:[#allocation19 + $0xb10] sm:$0xff]  ;;  %v9397_v56 = vld [vmem:[#allocation19 + $0xa88] sm:$0xff] }
0x20f1   :  { %8963 = vmatprep.subr.mxu1 %v8680_v57  ;;  %9034 = vmatprep.subr.mxu0 %v8682_v59  ;;  %v9399_v57 = vld [vmem:[#allocation19 + $0xa98] sm:$0xff]  ;;  %v9396_v59 = vld [vmem:[#allocation19 + $0xa80] sm:$0xff] }
0x20f2   :  { %8964 = vmatpush1.msra.mxu1 %v8679_v60  ;;  %9035 = vmatpush1.msra.mxu0 %v8681_v61  ;;  %v9398_v60 = vld [vmem:[#allocation19 + $0xa90] sm:$0xff]  ;;  %v9381_v61 = vld [vmem:[#allocation19 + $0xa08] sm:$0xff] }
0x20f3   :  { %8965 = vmatprep.subr.mxu1 %v8664_v2  ;;  %9036 = vmatprep.subr.mxu0 %v8666_v5  ;;  %v9383_v2 = vld [vmem:[#allocation19 + $0xa18] sm:$0xff]  ;;  %v9380_v5 = vld [vmem:[#allocation19 + $0xa00] sm:$0xff] }
0x20f4   :  { %8966 = vmatpush1.msra.mxu1 %v8663_v6  ;;  %9037 = vmatpush1.msra.mxu0 %v8665_v7  ;;  %v9382_v6 = vld [vmem:[#allocation19 + $0xa10] sm:$0xff]  ;;  %v9433_v7 = vld [vmem:[#allocation19 + $0xba8] sm:$0xff] }
0x20f5   :  { %8967 = vmatprep.subr.mxu1 %v8648_v8  ;;  %9038 = vmatprep.subr.mxu0 %v8650_v9  ;;  %v9435_v8 = vld [vmem:[#allocation19 + $0xbb8] sm:$0xff]  ;;  %v8708_v9 = vld [vmem:[#allocation17 + $0x50] sm:$0xff] }
0x20f6   :  { %8968 = vmatpush1.msra.mxu1 %v8647_v49  ;;  %9001 = vmatprep.mubr.f32.mxu1 %v11249_v0  ;;  %v8715_v49 = vrot.slane %v8708_v9, %v11519_v63 }
0x20f7   :  { %9039 = vmatpush1.msra.mxu0 %v8649_v58  ;;  %9072 = vmatprep.mubr.f32.mxu0 %v11249_v0  ;;  %v8723_v58 = vrot.slane %v8708_v9, %v11522_v1 }
0x20f8   :  { %10453 = vmatmul.mubr.msk.f32.vlgmr.msra.gmra.mxu1 %vm429_vm2, %v11913_v54  ;;  %10454 = vmatmul.mubr.msk.f32.vlgmr.msra.gmra.mxu0 %vm429_vm2, %v11913_v54 }
0x20f9   :  { %9103 = vmatprep.subr.mxu1 %v8700_v50  ;;  %9174 = vmatprep.subr.mxu0 %v8702_v51  ;;  %v8719_v50 = vrot.slane %v8708_v9, %v11527_v3  ;;  %v8727_v51 = vrot.slane %v8708_v9, %v11530_v4 }
0x20fa   :  { %9104 = vmatpush1.msra.mxu1 %v8699_v52  ;;  %9175 = vmatpush1.msra.mxu0 %v8701_v10 }
0x20fb   :  { %9105 = vmatprep.subr.mxu1 %v8684_v11  ;;  %9176 = vmatprep.subr.mxu0 %v8686_v12 }
0x20fc   :  { %9106 = vmatpush1.msra.mxu1 %v8683_v13  ;;  %9177 = vmatpush1.msra.mxu0 %v8685_v14 }
0x20fd   :  { %9107 = vmatprep.subr.mxu1 %v8668_v15  ;;  %9178 = vmatprep.subr.mxu0 %v8670_v16 }
0x20fe   :  { %9108 = vmatpush1.msra.mxu1 %v8667_v19  ;;  %9179 = vmatpush1.msra.mxu0 %v8669_v20 }
0x20ff   :  { %9109 = vmatprep.subr.mxu1 %v8652_v21  ;;  %9180 = vmatprep.subr.mxu0 %v8654_v22 }
0x2100   :  { %9110 = vmatpush1.msra.mxu1 %v8651_v23  ;;  %9143 = vmatprep.mubr.f32.mxu1 %v11249_v0  ;;  %v9432_v23 = vld [vmem:[#allocation19 + $0xba0] sm:$0xff] }
0x2101   :  { %9181 = vmatpush1.msra.mxu0 %v8653_v24  ;;  %9214 = vmatprep.mubr.f32.mxu0 %v11249_v0  ;;  %v9434_v24 = vld [vmem:[#allocation19 + $0xbb0] sm:$0xff] }
0x2102   :  { %10455 = vmatmul.mubr.msk.f32.vlgmr.msra.gmra.mxu1 %vm429_vm2, %v11913_v54  ;;  %10456 = vmatmul.mubr.msk.f32.vlgmr.msra.gmra.mxu0 %vm429_vm2, %v11913_v54 }
0x2103   :  { %9245 = vmatprep.subr.mxu1 %v8704_v25  ;;  %9316 = vmatprep.subr.mxu0 %v8706_v26  ;;  %v9417_v25 = vld [vmem:[#allocation19 + $0xb28] sm:$0xff]  ;;  %v9419_v26 = vld [vmem:[#allocation19 + $0xb38] sm:$0xff] }
0x2104   :  { %9246 = vmatpush1.msra.mxu1 %v8703_v27  ;;  %9317 = vmatpush1.msra.mxu0 %v8705_v28  ;;  %v8735_v27 = vrot.slane %v8708_v9, %v11541_v17  ;;  %v8743_v28 = vrot.slane %v8708_v9, %v11544_v18 }
0x2105   :  { %9247 = vmatprep.subr.mxu1 %v8688_v29  ;;  %9318 = vmatprep.subr.mxu0 %v8690_v30 }
0x2106   :  { %9248 = vmatpush1.msra.mxu1 %v8687_v33  ;;  %9319 = vmatpush1.msra.mxu0 %v8689_v34  ;;  %v9416_v33 = vld [vmem:[#allocation19 + $0xb20] sm:$0xff]  ;;  %v9418_v34 = vld [vmem:[#allocation19 + $0xb30] sm:$0xff] }
0x2107   :  { %9249 = vmatprep.subr.mxu1 %v8672_v35  ;;  %9320 = vmatprep.subr.mxu0 %v8674_v36 }
0x2108   :  { %9250 = vmatpush1.msra.mxu1 %v8671_v37  ;;  %9321 = vmatpush1.msra.mxu0 %v8673_v38  ;;  %v9401_v37 = vld [vmem:[#allocation19 + $0xaa8] sm:$0xff]  ;;  %v9403_v38 = vld [vmem:[#allocation19 + $0xab8] sm:$0xff] }
0x2109   :  { %9251 = vmatprep.subr.mxu1 %v8656_v39  ;;  %9322 = vmatprep.subr.mxu0 %v8658_v40 }
0x210a   :  { %9252 = vmatpush1.msra.mxu1 %v8655_v41  ;;  %9285 = vmatprep.mubr.f32.mxu1 %v11249_v0  ;;  %v8731_v41 = vrot.slane %v8708_v9, %v11551_v31 }
0x210b   :  { %9323 = vmatpush1.msra.mxu0 %v8657_v42  ;;  %9356 = vmatprep.mubr.f32.mxu0 %v11249_v0  ;;  %v8739_v42 = vrot.slane %v8708_v9, %v11554_v32 }
0x210c   :  { %10457 = vmatmul.mubr.msk.f32.vlgmr.msra.gmra.mxu1 %vm429_vm2, %v11913_v54  ;;  %10458 = vmatmul.mubr.msk.f32.vlgmr.msra.gmra.mxu0 %vm429_vm2, %v11913_v54 }
0x210d   :  { %9476 = vmatprep.subr.mxu1 %v9429_v43  ;;  %9546 = vmatprep.subr.mxu0 %v9431_v44 }
0x210e   :  { %9477 = vmatpush1.xpose.msra.mxu1 %v9428_v45  ;;  %9547 = vmatpush1.xpose.msra.mxu0 %v9430_v46  ;;  %v9400_v45 = vld [vmem:[#allocation19 + $0xaa0] sm:$0xff]  ;;  %v9402_v46 = vld [vmem:[#allocation19 + $0xab0] sm:$0xff] }
0x210f   :  { %9478 = vmatprep.subr.mxu1 %v9413_v47  ;;  %9548 = vmatprep.subr.mxu0 %v9415_v48  ;;  %v9385_v47 = vld [vmem:[#allocation19 + $0xa28] sm:$0xff]  ;;  %v9387_v48 = vld [vmem:[#allocation19 + $0xa38] sm:$0xff] }
0x2112   :  { %9479 = vmatpush1.xpose.msra.mxu1 %v9412_v53  ;;  %9549 = vmatpush1.xpose.msra.mxu0 %v9414_v55  ;;  %v11945_v53 = vld [vmem:[#allocation17 + $0x58] sm:$0xff] }
0x2113   :  { %9480 = vmatprep.subr.mxu1 %v9397_v56  ;;  %9550 = vmatprep.subr.mxu0 %v9399_v57  ;;  %v8751_v55 = vrot.slane %v11945_v53, %v11527_v3 }
0x2116   :  { %9481 = vmatpush1.xpose.msra.mxu1 %v9396_v59  ;;  %9551 = vmatpush1.xpose.msra.mxu0 %v9398_v60  ;;  %v8759_v59 = vrot.slane %v11945_v53, %v11530_v4  ;;  %v9384_v60 = vld [vmem:[#allocation19 + $0xa20] sm:$0xff]  ;;  %v9438_v4 = vld [vmem:[#allocation19 + $0xbd0] sm:$0xff] }
0x2117   :  { %9482 = vmatprep.subr.mxu1 %v9381_v61  ;;  %9552 = vmatprep.subr.mxu0 %v9383_v2  ;;  %v9386_v61 = vld [vmem:[#allocation19 + $0xa30] sm:$0xff] }
0x211a   :  { %9483 = vmatpush1.xpose.msra.mxu1 %v9380_v5  ;;  %9553 = vmatpush1.xpose.msra.mxu0 %v9382_v6  ;;  %v9437_v6 = vld [vmem:[#allocation19 + $0xbc8] sm:$0xff] }
0x211b   :  { %9616 = vmatprep.subr.mxu1 %v9433_v7  ;;  %9686 = vmatprep.subr.mxu0 %v9435_v8  ;;  %v9439_v7 = vld [vmem:[#allocation19 + $0xbd8] sm:$0xff] }
0x21af   :  { %v8861_v52 = vpop.f32.mrf.mxu1  ;;  %v8932_v10 = vpop.f32.mrf.mxu0 }
0x21b0   :  { %v8862_v11 = vadd.f32 %v8861_v52, %v8715_v49  ;;  %v8933_v12 = vadd.f32 %v8932_v10, %v8723_v58 }
0x21b1   :  { %v8863_v13 = vpop.f32.mrf.mxu1  ;;  %v8934_v14 = vpop.f32.mrf.mxu0 }
0x21b2   :  { %v8864_v15 = vadd.f32 %v8863_v13, %v8719_v50  ;;  %v8935_v16 = vadd.f32 %v8934_v14, %v8727_v51  ;;  %v9363_v21 = vmax.f32 %v8862_v11, 0.0  ;;  %v9365_v22 = vmax.f32 %v8933_v12, 0.0  ;;  %v9436_v51 = vld [vmem:[#allocation19 + $0xbc0] sm:$0xff]  ;;  %v9421_v11 = vld [vmem:[#allocation19 + $0xb48] sm:$0xff]  ;;  %v9423_v12 = vld [vmem:[#allocation19 + $0xb58] sm:$0xff] }
0x21b3   :  { %v9420_v13 = vld [vmem:[#allocation19 + $0xb40] sm:$0xff]  ;;  %v9422_v14 = vld [vmem:[#allocation19 + $0xb50] sm:$0xff] }
0x21b4   :  { %v9364_v19 = vmax.f32 %v8864_v15, 0.0  ;;  %v9366_v20 = vmax.f32 %v8935_v16, 0.0  ;;  %v9405_v15 = vld [vmem:[#allocation19 + $0xac8] sm:$0xff]  ;;  %v9407_v16 = vld [vmem:[#allocation19 + $0xad8] sm:$0xff] }
0x21b6   :  { %9516 = vmatprep.mubr.f32.mxu1 %v9364_v19  ;;  %9586 = vmatprep.mubr.f32.mxu0 %v9366_v20 }
0x21b7   :  { %9517 = vmatmul.mubr.f32.vlgmr.msra.gmra.mxu1 %v9363_v21  ;;  %9587 = vmatmul.mubr.f32.vlgmr.msra.gmra.mxu0 %v9365_v22  ;;  %v8747_v21 = vrot.slane %v11945_v53, %v11519_v63  ;;  %v8755_v22 = vrot.slane %v11945_v53, %v11522_v1  ;;  %v9388_v1 = vld [vmem:[#allocation19 + $0xa40] sm:$0xff] }
0x21b8   :  { %v9003_v29 = vpop.f32.mrf.mxu1  ;;  %v9074_v30 = vpop.f32.mrf.mxu0  ;;  %9617 = vmatpush1.xpose.msra.mxu1 %v9432_v23  ;;  %9687 = vmatpush1.xpose.msra.mxu0 %v9434_v24  ;;  %v9404_v23 = vld [vmem:[#allocation19 + $0xac0] sm:$0xff]  ;;  %v9406_v24 = vld [vmem:[#allocation19 + $0xad0] sm:$0xff] }
0x21b9   :  { %9618 = vmatprep.subr.mxu1 %v9417_v25  ;;  %9688 = vmatprep.subr.mxu0 %v9419_v26  ;;  %v9004_v56 = vadd.f32 %v9003_v29, %v8731_v41  ;;  %v9075_v57 = vadd.f32 %v9074_v30, %v8739_v42  ;;  %v8767_v25 = vrot.slane %v11945_v53, %v11541_v17  ;;  %v9389_v26 = vld [vmem:[#allocation19 + $0xa48] sm:$0xff]  ;;  %v9442_v42 = vld [vmem:[#allocation19 + $0xbf0] sm:$0xff] }
0x21ba   :  { %v9005_v35 = vpop.f32.mrf.mxu1  ;;  %v9076_v36 = vpop.f32.mrf.mxu0  ;;  %v8775_v29 = vrot.slane %v11945_v53, %v11544_v18  ;;  %v9440_v18 = vld [vmem:[#allocation19 + $0xbe0] sm:$0xff] }
0x21bb   :  { %v9006_v39 = vadd.f32 %v9005_v35, %v8735_v27  ;;  %v9077_v40 = vadd.f32 %v9076_v36, %v8743_v28  ;;  %v9367_v49 = vmax.f32 %v9004_v56, 0.0  ;;  %v9369_v58 = vmax.f32 %v9075_v57, 0.0  ;;  %v9391_v27 = vld [vmem:[#allocation19 + $0xa58] sm:$0xff]  ;;  %v9390_v35 = vld [vmem:[#allocation19 + $0xa50] sm:$0xff]  ;;  %v9408_v57 = vld [vmem:[#allocation19 + $0xae0] sm:$0xff] }
0x21bc   :  { %9619 = vmatpush1.xpose.msra.mxu1 %v9416_v33  ;;  %9689 = vmatpush1.xpose.msra.mxu0 %v9418_v34  ;;  %v8763_v56 = vrot.slane %v11945_v53, %v11551_v31  ;;  %v9394_v31 = vld [vmem:[#allocation19 + $0xa70] sm:$0xff] }
0x21bd   :  { %v9368_v43 = vmax.f32 %v9006_v39, 0.0  ;;  %v9370_v44 = vmax.f32 %v9077_v40, 0.0  ;;  %9620 = vmatprep.subr.mxu1 %v9401_v37  ;;  %9690 = vmatprep.subr.mxu0 %v9403_v38  ;;  %v9441_v37 = vld [vmem:[#allocation19 + $0xbe8] sm:$0xff]  ;;  %v9443_v38 = vld [vmem:[#allocation19 + $0xbf8] sm:$0xff] }
0x21bf   :  { %9656 = vmatprep.mubr.f32.mxu1 %v9368_v43  ;;  %9726 = vmatprep.mubr.f32.mxu0 %v9370_v44  ;;  %v9425_v44 = vld [vmem:[#allocation19 + $0xb68] sm:$0xff] }
0x21c0   :  { %9621 = vmatpush1.xpose.msra.mxu1 %v9400_v45  ;;  %9691 = vmatpush1.xpose.msra.mxu0 %v9402_v46  ;;  %v9427_v45 = vld [vmem:[#allocation19 + $0xb78] sm:$0xff]  ;;  %v9424_v46 = vld [vmem:[#allocation19 + $0xb60] sm:$0xff] }
0x21c1   :  { %9622 = vmatprep.subr.mxu1 %v9385_v47  ;;  %9692 = vmatprep.subr.mxu0 %v9387_v48  ;;  %v9426_v47 = vld [vmem:[#allocation19 + $0xb70] sm:$0xff]  ;;  %v9409_v48 = vld [vmem:[#allocation19 + $0xae8] sm:$0xff] }
0x21c2   :  { %v9145_v2 = vpop.f32.mrf.mxu1  ;;  %v9216_v5 = vpop.f32.mrf.mxu0 }
0x21c3   :  { %v9146_v33 = vadd.f32 %v9145_v2, %v8747_v21  ;;  %v9217_v34 = vadd.f32 %v9216_v5, %v8755_v22  ;;  %v9395_v2 = vld [vmem:[#allocation19 + $0xa78] sm:$0xff] }
0x21c4   :  { %v9147_v8 = vpop.f32.mrf.mxu1  ;;  %v9218_v9 = vpop.f32.mrf.mxu0  ;;  %9623 = vmatpush1.xpose.msra.mxu1 %v9384_v60  ;;  %9693 = vmatpush1.xpose.msra.mxu0 %v9386_v61  ;;  %v9410_v60 = vld [vmem:[#allocation19 + $0xaf0] sm:$0xff]  ;;  %v9393_v61 = vld [vmem:[#allocation19 + $0xa68] sm:$0xff] }
0x21c5   :  { %v9148_v3 = vadd.f32 %v9147_v8, %v8751_v55  ;;  %v9219_v50 = vadd.f32 %v9218_v9, %v8759_v59  ;;  %9756 = vmatprep.subr.mxu1 %v9437_v6  ;;  %9826 = vmatprep.subr.mxu0 %v9439_v7  ;;  %v9371_v17 = vmax.f32 %v9146_v33, 0.0  ;;  %v9373_v40 = vmax.f32 %v9217_v34, 0.0  ;;  %v9411_v55 = vld [vmem:[#allocation19 + $0xaf8] sm:$0xff]  ;;  %v9392_v6 = vld [vmem:[#allocation19 + $0xa60] sm:$0xff] }
0x21c6   :  { %v8771_v59 = vrot.slane %v11945_v53, %v11554_v32 }
0x21c7   :  { %v9372_v52 = vmax.f32 %v9148_v3, 0.0  ;;  %v9374_v10 = vmax.f32 %v9219_v50, 0.0  ;;  %9657 = vmatmul.mubr.f32.vlgmr.msra.gmra.mxu1 %v9367_v49  ;;  %9727 = vmatmul.mubr.f32.vlgmr.msra.gmra.mxu0 %v9369_v58 }
0x21c8   :  { %9757 = vmatpush1.xpose.msra.mxu1 %v9436_v51  ;;  %9827 = vmatpush1.xpose.msra.mxu0 %v9438_v4 }
0x21c9   :  { %9796 = vmatprep.mubr.f32.mxu1 %v9372_v52  ;;  %9866 = vmatprep.mubr.f32.mxu0 %v9374_v10  ;;  %v10459_v52 = vld [vmem:[#allocation20 + $0x5] ss:$0 sm:$0xff] }
0x21ca   :  { %9758 = vmatprep.subr.mxu1 %v9421_v11  ;;  %9828 = vmatprep.subr.mxu0 %v9423_v12 }
0x21cc   :  { %v11951_v19 = vpop.f32.mrf.mxu1  ;;  %v11953_v20 = vpop.f32.mrf.mxu0  ;;  %9759 = vmatpush1.xpose.msra.mxu1 %v9420_v13  ;;  %9829 = vmatpush1.xpose.msra.mxu0 %v9422_v14 }
0x21cd   :  { %9760 = vmatprep.subr.mxu1 %v9405_v15  ;;  %9830 = vmatprep.subr.mxu0 %v9407_v16  ;;  %v9288_v5 = vadd.f32 %v11951_v19, %v8763_v56  ;;  %v9359_v7 = vadd.f32 %v11953_v20, %v8771_v59  ;;  %v10217_v56 = vld [vmem:[%s12031_s19 + $0x18] sm:$0xff] }
0x21ce   :  { %v9289_v28 = vpop.f32.mrf.mxu1  ;;  %v9360_v30 = vpop.f32.mrf.mxu0 }
0x21cf   :  { %v9290_v36 = vadd.f32 %v9289_v28, %v8767_v25  ;;  %v9361_v39 = vadd.f32 %v9360_v30, %v8775_v29  ;;  %v9375_v8 = vmax.f32 %v9288_v5, 0.0  ;;  %v9377_v32 = vmax.f32 %v9359_v7, 0.0  ;;  %v10216_v5 = vld [vmem:[%s12031_s19 + $0x10] sm:$0xff]  ;;  %v10214_v7 = vld [vmem:[%s12031_s19] sm:$0xff] }
0x21d0   :  { %9761 = vmatpush1.xpose.msra.mxu1 %v9404_v23  ;;  %9831 = vmatpush1.xpose.msra.mxu0 %v9406_v24 }
0x21d1   :  { %9762 = vmatprep.subr.mxu1 %v9389_v26  ;;  %9832 = vmatprep.subr.mxu0 %v9391_v27  ;;  %v9376_v41 = vmax.f32 %v9290_v36, 0.0  ;;  %v9378_v43 = vmax.f32 %v9361_v39, 0.0  ;;  %v10047_v36 = vld [vmem:[#allocation25 + $0x18] sm:$0xff] }
0x21d2   :  { %v10132_v39 = vld [vmem:[#allocation28 + $0x18] sm:$0xff] }
0x21d4   :  { %9763 = vmatpush1.xpose.msra.mxu1 %v9388_v1  ;;  %9833 = vmatpush1.xpose.msra.mxu0 %v9390_v35 }
0x21d5   :  { %9896 = vmatprep.subr.mxu1 %v9441_v37  ;;  %9966 = vmatprep.subr.mxu0 %v9443_v38  ;;  %v10046_v37 = vld [vmem:[#allocation25 + $0x10] sm:$0xff]  ;;  %v10045_v38 = vld [vmem:[#allocation25 + $0x8] sm:$0xff] }
0x21d7   :  { %9797 = vmatmul.mubr.f32.vlgmr.msra.gmra.mxu1 %v9371_v17  ;;  %9867 = vmatmul.mubr.f32.vlgmr.msra.gmra.mxu0 %v9373_v40 }
0x21d8   :  { %9897 = vmatpush1.xpose.msra.mxu1 %v9440_v18  ;;  %9936 = vmatprep.mubr.f32.mxu1 %v9376_v41 }
0x21d9   :  { %9967 = vmatpush1.xpose.msra.mxu0 %v9442_v42  ;;  %10006 = vmatprep.mubr.f32.mxu0 %v9378_v43  ;;  %v10460_v42 = vld [vmem:[#allocation22 + $0x5] ss:$0 sm:$0xff] }
0x21da   :  { %9898 = vmatprep.subr.mxu1 %v9425_v44  ;;  %9968 = vmatprep.subr.mxu0 %v9427_v45  ;;  %v10461_v44 = vld [vmem:[#allocation23 + $0x5] ss:$0 sm:$0xff] }
0x21dc   :  { %9899 = vmatpush1.xpose.msra.mxu1 %v9424_v46 }
0x21dd   :  { %9969 = vmatpush1.xpose.msra.mxu0 %v9426_v47  ;;  %9900 = vmatprep.subr.mxu1 %v9409_v48  ;;  %v10131_v47 = vld [vmem:[#allocation28 + $0x10] sm:$0xff]  ;;  %v10130_v48 = vld [vmem:[#allocation28 + $0x8] sm:$0xff] }
0x21de   :  { %9970 = vmatprep.subr.mxu0 %v9411_v55  ;;  %v10129_v55 = vld [vmem:[#allocation28] sm:$0xff] }
0x21e0   :  { %9901 = vmatpush1.xpose.msra.mxu1 %v9408_v57  ;;  %v10462_v57 = vld [vmem:[#allocation26] ss:$0 sm:$0xff] }
0x21e1   :  { %9971 = vmatpush1.xpose.msra.mxu0 %v9410_v60  ;;  %9902 = vmatprep.subr.mxu1 %v9393_v61 }
0x21e2   :  { %9972 = vmatprep.subr.mxu0 %v9395_v2 }
0x21e4   :  { %9903 = vmatpush1.xpose.msra.mxu1 %v9392_v6  ;;  %v10215_v6 = vld [vmem:[%s12031_s19 + $0x8] sm:$0xff]  ;;  %s11252_s19 = smov [#allocation34]  }
0x21e5   :  { %9973 = vmatpush1.xpose.msra.mxu0 %v9394_v31  ;;  %10686 = vmatprep.subr.mxu1 %v11249_v0  ;;  %v10464_v31 = vld [vmem:[#allocation29] ss:$0 sm:$0xff]  ;;  %s10339_s12 = sshll.u32 %s11252_s19, 4  ;;  %s10340_s12 = int_to_ptr.vmem [resolvable:$true] %s10339_s12 }
0x21e6   :  { %10697 = vmatprep.subr.mxu0 %v11249_v0  ;;  %s11179_s11 = scalar_lea.vmem %s10340_s12, 128  ;;  %p11184_p3 = scmp.lt.s32.totalorder %s10340_s12, %s10340_s12 }
0x21e7   :  { %9937 = vmatmul.mubr.f32.vlgmr.msra.gmra.mxu1 %v9375_v8  ;;  %p11180_p2 = scmp.ne.s32.totalorder %s10340_s12, %s11179_s11  ;;  %p11185_p4 = scmp.lt.s32.totalorder %s11179_s11, %s11179_s11 }
0x21e8   :  { %10007 = vmatmul.mubr.f32.vlgmr.msra.gmra.mxu0 %v9377_v32  ;;  %10694 = vmatprep.mubr.msk.f32.mxu1 %vm11250_vm0, %v11249_v0 }
0x21e9   :  { %10705 = vmatprep.mubr.msk.f32.mxu0 %vm11250_vm0, %v11249_v0  ;;  %10687 = vmatpush3.msra.mxu1 %v10047_v36  ;;  %p11186_p5 = por %p11185_p4, %p11184_p3 }
0x21ea   :  { %10688 = vmatprep.subr.mxu1 %v11249_v0  ;;  %10698 = vmatpush3.msra.mxu0 %v10132_v39 }
0x21eb   :  { %10689 = vmatpush3.msra.mxu1 %v10046_v37  ;;  %10699 = vmatprep.subr.mxu0 %v11249_v0  ;;  %p11187_p6 = pnand %p11186_p5, %p11180_p2 }
0x21ec   :  { %10690 = vmatprep.subr.mxu1 %v11249_v0  ;;  %10700 = vmatpush3.msra.mxu0 %v10131_v47 }
0x21ed   :  { %10691 = vmatpush3.msra.mxu1 %v10045_v38  ;;  %10701 = vmatprep.subr.mxu0 %v11249_v0 }
0x21ee   :  { %10692 = vmatprep.subr.mxu1 %v11249_v0  ;;  %10702 = vmatpush3.msra.mxu0 %v10130_v48 }
0x21ef   :  { %10703 = vmatprep.subr.mxu0 %v11249_v0 }
0x21f0   :  { %10704 = vmatpush3.msra.mxu0 %v10129_v55 }
0x2277   :  { %v9518_v53 = vpop.f32.mrf.mxu1  ;;  %v9588_v9 = vpop.f32.mrf.mxu0 }
0x2278   :  { %v9519_v10 = vadd.f32 %v10459_v52, %v9518_v53 }
0x2279   :  { %v9520_v49 = vpop.f32.mrf.mxu1  ;;  %v9590_v58 = vpop.f32.mrf.mxu0 }
0x227a   :  { %v9589_v15 = vadd.f32 %v9588_v9, %v9519_v10  ;;  %v10466_v49 = vld [vmem:[#allocation31] ss:$0 sm:$0xff] }
0x2287   :  { %v9658_v3 = vpop.f32.mrf.mxu1  ;;  %v9728_v50 = vpop.f32.mrf.mxu0 }
0x2288   :  { %v9659_v16 = vadd.f32 %v9658_v3, %v9589_v15 }
0x2289   :  { %v9660_v51 = vpop.f32.mrf.mxu1  ;;  %v9730_v4 = vpop.f32.mrf.mxu0 }
0x228a   :  { %v9729_v19 = vadd.f32 %v9728_v50, %v9659_v16 }
0x2297   :  { %v9798_v11 = vpop.f32.mrf.mxu1  ;;  %v9868_v12 = vpop.f32.mrf.mxu0 }
0x2298   :  { %v9799_v20 = vadd.f32 %v9798_v11, %v9729_v19  ;;  %v10301_v11 = vld [vmem:[#allocation32 + $0x2] sm:$0x1] }
0x2299   :  { %v9800_v13 = vpop.f32.mrf.mxu1  ;;  %v9870_v14 = vpop.f32.mrf.mxu0  ;;  %vm10322_vm3 = vcmp.gt.f32.partialorder %v10301_v11, 0.5 }
0x229a   :  { %v9869_v21 = vadd.f32 %v9868_v12, %v9799_v20  ;;  %v10300_v12 = vld [vmem:[#allocation32 + $0x1] sm:$0x1]  ;;  %v11251_v13 = vmov 0  }
0x229b   :  { %v10323_v14 = vsel %vm10322_vm3, 1, %v11251_v13 }
0x229c   :  { %v10327_v16 = vrot.slane %v10323_v14, %v11519_v63 }
0x229e   :  { %vm10328_vm5 = vcmp.eq.s32.totalorder %v10327_v16, 1 }
0x229f   :  { %vm10329_vm6 = vmand %vm10321_vm4, %vm10328_vm5 }
0x22a7   :  { %v9938_v22 = vpop.f32.mrf.mxu1 }
0x22a8   :  { %v9939_v23 = vadd.f32 %v9938_v22, %v9869_v21  ;;  %v10008_v24 = vpop.f32.mrf.mxu0 }
0x22a9   :  { %v9940_v25 = vpop.f32.mrf.mxu1 }
0x22aa   :  { %v10009_v26 = vadd.f32 %v10008_v24, %v9939_v23  ;;  %v10010_v27 = vpop.f32.mrf.mxu0 }
0x22ac   :  { %v10012_v28 = vadd.f32 %v10009_v26, %v11913_v54  ;;  %v10044_v54 = vld [vmem:[#allocation25] sm:$0xff] }
0x22ad   :  { %10693 = vmatpush3.msra.mxu1 %v10044_v54 }
0x22ae   :  { %v10017_v29 = vsel %vm429_vm2, %v10012_v28, 0.0  ;;  %10708 = vmatprep.subr.mxu1 %v11249_v0 }
0x22af   :  { %10018 = vadd.xlane.f32.xlu0 %v10017_v29 }
0x2338   :  { %v10019_v30 = vpop.xlane.xlu0 %10018 }
0x2339   :  { %v10020_v33 = vmul.f32 0.03125, %v10019_v30 }
0x233b   :  { %v10021_v34 = vsub.f32 %v10012_v28, %v10020_v33 }
0x233d   :  { %v10022_v1 = vmul.f32 %v10021_v34, %v10021_v34 }
0x233f   :  { %v10023_v35 = vsel %vm429_vm2, %v10022_v1, 0.0 }
0x2340   :  { %10024 = vadd.xlane.f32.xlu1 %v10023_v35 }
0x23c9   :  { %v10025_v17 = vpop.xlane.xlu1 %10024 }
0x23ca   :  { %v10026_v40 = vmul.f32 0.03125, %v10025_v17 }
0x23cc   :  { %v10027_v18 = vadd.f32 1e-05, %v10026_v40 }
0x23ce   :  { %10771 = vrsqrt.f32 %v10027_v18 }
0x23db   :  { %v10772_v41 = vpop.eup %10771 }
0x23dc   :  { %v10029_v43 = vmul.f32 %v10772_v41, %v10021_v34 }
0x23de   :  { %v10036_v45 = vmul.f32 %v10460_v42, %v10029_v43 }
0x23e0   :  { %v10043_v46 = vadd.f32 %v10461_v44, %v10036_v45 }
0x23e2   :  { %10695 = vmatmul.mubr.msk.f32.vlgmr.msra.gmra.mxu1 %vm429_vm2, %v10043_v46 }
0x23e3   :  { %10716 = vmatprep.mubr.msk.f32.mxu1 %vm11250_vm0, %v11249_v0  ;;  %10709 = vmatpush3.msra.mxu1 %v10217_v56 }
0x23e4   :  { %10710 = vmatprep.subr.mxu1 %v11249_v0 }
0x23e5   :  { %10711 = vmatpush3.msra.mxu1 %v10216_v5 }
0x23e6   :  { %10712 = vmatprep.subr.mxu1 %v11249_v0 }
0x23e7   :  { %10713 = vmatpush3.msra.mxu1 %v10215_v6 }
0x23e8   :  { %10714 = vmatprep.subr.mxu1 %v11249_v0  ;;  %v10299_v0 = vld [vmem:[#allocation32] sm:$0x1] }
0x23e9   :  { %10715 = vmatpush3.msra.mxu1 %v10214_v7  ;;  %v10308_v15 = vsub.f32 %v10300_v12, %v10299_v0  ;;  %v10317_v20 = vrot.slane %v10299_v0, %v11519_v63 }
0x23eb   :  { %v10312_v19 = vrot.slane %v10308_v15, %v11519_v63 }
0x24a2   :  { %v10124_v59 = vpop.f32.mrf.mxu1 }
0x24a3   :  { %v10125_v60 = vadd.f32 %v10462_v57, %v10124_v59 }
0x24a4   :  { %v10696_v61 = vpop.f32.mrf.mxu1 }
0x24a5   :  { %v10128_v2 = vmax.f32 %v10125_v60, 0.0 }
0x24a7   :  { %10706 = vmatmul.mubr.msk.f32.vlgmr.msra.gmra.mxu0 %vm429_vm2, %v10128_v2 }
0x2567   :  { %v10209_v8 = vpop.f32.mrf.mxu0 }
0x2568   :  { %v10210_v32 = vadd.f32 %v10464_v31, %v10209_v8 }
0x2569   :  { %v10707_v53 = vpop.f32.mrf.mxu0 }
0x256a   :  { %v10213_v9 = vmax.f32 %v10210_v32, 0.0 }
0x256c   :  { %10717 = vmatmul.mubr.msk.f32.vlgmr.msra.gmra.mxu1 %vm429_vm2, %v10213_v9 }
0x262c   :  { %v10294_v58 = vpop.f32.mrf.mxu1 }
0x262d   :  { %v10295_v3 = vadd.f32 %v10466_v49, %v10294_v58 }
0x262e   :  { %v10718_v50 = vpop.f32.mrf.mxu1 }
0x262f   :  { %10773 = vtanh.f32 %v10295_v3 }
0x263c   :  { %v10774_v51 = vpop.eup %10773 }
0x263d   :  { %v10468_v4 = vmul.f32 -1.442695, %v10774_v51 }
0x263f   :  { %10775 = vpow2.f32 %v10468_v4 }
0x264c   :  { %v10776_v52 = vpop.eup %10775 }
0x264d   :  { %v10305_v10 = vadd.f32 1.0, %v10776_v52 }
0x264f   :  { %10777 = vrcp.f32 %v10305_v10 }
0x265c   :  { %v10778_v21 = vpop.eup %10777 }
0x265d   :  { %v10313_v22 = vmul.f32 %v10778_v21, %v10312_v19 }
0x265f   :  { %v10318_v23 = vadd.f32 %v10317_v20, %v10313_v22 }
0x2661   :  { %v10330_v24 = vsel %vm10329_vm6, %v10318_v23, %v10774_v51 }
0x2662   :  { %10332 = vst.msk [vmem:[#allocation34] sm:$0xff] %vm10331_vm7, %v10330_v24 }
0x2663   :  { %11190 = shalt.err (!%p11187_p6)
}
0x2664   :  { %10342 = dma.vmem_to_hbm [thread:$0]  %s10340_s12, 128, %s12034_s22, [#allocation4]  }
0x2665   :  { %11221 = dma.done.wait [#allocation4], 128  }
0x2666   :  { %11222 = vsyncadd [#allocation4], 4294967168 }
0x2667   :  { %10346 = vsyncpa [#allocation3], 1 }
0x2668   :  { %10347 = vsyncpa [#allocation6], 1 }
0x2669   :  { %10348 = vsyncpa [#allocation9], 1 }
0x266a   :  { %10349 = vsyncpa [#allocation12], 1 }
0x266b   :  { %10350 = vsyncpa [#allocation15], 1 }
0x266c   :  { %10351 = vsyncpa [#allocation18], 1 }
0x266d   :  { %10352 = vsyncpa [#allocation21], 1 }
0x266e   :  { %10353 = vsyncpa [#allocation24], 1 }
0x266f   :  { %10354 = vsyncpa [#allocation27], 1 }
0x2670   :  { %10355 = vsyncpa [#allocation30], 1 }
0x2671   :  { %10356 = vsyncpa [#allocation33], 1 }
0x2672   :  { %10357 = vsyncpa [#allocation4], 1 }

</bundles_post_ra>
